<compile_context>
chip_gen: v7x
topology: tpu7x:2x2x1
jax: 0.10.0
libtpu: 0.0.40
codegen_flags: <defaults>
</compile_context>

<pallas_src>
import functools
import math

import jax
import jax.numpy as jnp
from jax.experimental import pallas as pl
from jax.experimental.pallas import tpu as pltpu


def _cooc_kernel(scale_ref, x_ref, convmat_ref, co_ref, out_ref, *, num_q):
    """One block of TN images, flattened to (TN, L) with L = h*w on lanes.

    scale_ref   : (2,)            f32 SMEM  [gmin*num_q/gmax + 1e-5, num_q/gmax]
    x_ref       : (TN, L)         f32 VMEM  original inputs (one image per sublane row)
    convmat_ref : (L, L)          f32 VMEM  dense SAME-conv matrix (zero pad + row-wrap
                                            masking folded in): conv(img) == img @ T
    co_ref      : (num_q, num_q)  f32 SMEM  co-occurrence matrix
    out_ref     : (TN, L)         f32 VMEM
    """
    s0 = scale_ref[0]
    s1 = scale_ref[1]

    x = x_ref[...]                          # (TN, L)
    t_mat = convmat_ref[...]                # (L, L); block index is constant -> resident

    # Fused quantization, scalars pre-folded on the host:
    #   idx = floor(|exp(x) * (num_q/gmax) - (gmin*num_q/gmax + eps)|)
    idxf = jnp.floor(jnp.abs(jnp.exp(x) * s1 - s0))

    # One-hot bin masks hoisted out of the bin loop: num_q compares total.  The compare
    # is on the floored float (exact for small integers), so no int32 cast is needed.
    masks = [(idxf == jnp.float32(i)).astype(jnp.float32) for i in range(num_q)]

    acc = jnp.zeros_like(x)
    for j in range(num_q):                  # static unroll over bins
        # S_j[p] = co[idx[p], j]: one-hot mix of column j of the co matrix.
        s_j = masks[0] * co_ref[0, j]
        for i in range(1, num_q):
            s_j = s_j + masks[i] * co_ref[i, j]

        # P_j = x restricted to bin j; the SAME zero padding lives inside t_mat.
        p_j = x * masks[j]

        # conv_j on the MXU; HIGHEST precision keeps f32 accuracy for the 1e-3 check.
        conv_j = jnp.dot(p_j, t_mat,
                         preferred_element_type=jnp.float32,
                         precision=jax.lax.Precision.HIGHEST)

        acc = acc + s_j * conv_j

    out_ref[...] = acc                      # single store; accumulator stayed in vregs


def _build_conv_matrix(filt, h, w):
    """Dense (L, L) f32 matrix T with conv_SAME(img).reshape(L) == img.reshape(L) @ T.

    T[p, q] = filt[dy, dx] whenever output pixel q reads input pixel p through tap
    (dy, dx); taps that read outside the image (SAME zero padding) and flattened
    row-wrap positions contribute nothing."""
    kh, kw = filt.shape
    pt = (kh - 1) // 2
    pl0 = (kw - 1) // 2
    L = h * w
    yy = jnp.arange(h)[:, None]
    xx = jnp.arange(w)[None, :]
    q_idx = jnp.arange(L)
    t_mat = jnp.zeros((L, L), jnp.float32)
    for dy in range(kh):
        for dx in range(kw):
            ry = yy + (dy - pt)
            rx = xx + (dx - pl0)
            valid = ((ry >= 0) & (ry < h) & (rx >= 0) & (rx < w)).reshape(L)
            p_idx = (jnp.clip(ry, 0, h - 1) * w + jnp.clip(rx, 0, w - 1)).reshape(L)
            vals = jnp.where(valid, filt[dy, dx], jnp.float32(0.0))
            t_mat = t_mat.at[p_idx, q_idx].add(vals)
    return t_mat


def co_occurrence_forward(x, co_matrix, spatial_filter, *, block_images=16):
    """x: (B, C, H, W) float32 (NCHW; C must be 1 to match the PyTorch (1,1,kh,kw) conv)."""
    b, c, h, w = x.shape
    num_q = co_matrix.shape[0]
    L = h * w
    n = b * c

    xf = x.astype(jnp.float32)

    # Global min/max (inherently global reduction -> plain-JAX glue); exp is monotonic
    # so exp(min(x)) == min(exp(x)) without materializing exp(x).
    # TODO(synk): fold into a tiny pre-pass Pallas reduction to avoid re-reading x from
    # HBM once batches get large (irrelevant while the kernel is MXU/VALU bound).
    gmin = jnp.exp(jnp.min(xf))
    gmax = jnp.exp(jnp.max(xf))
    s1 = jnp.float32(num_q) / gmax
    s0 = gmin * s1 + jnp.float32(1e-5)
    scale = jnp.stack([s0, s1]).astype(jnp.float32)           # (2,) -> SMEM

    # Dense conv matrix; L^2*4 bytes (256 KB at 16x16) -- fine well past L=1024.
    convmat = _build_conv_matrix(spatial_filter.astype(jnp.float32), h, w)

    # Images on sublanes, flattened pixels (lane-dense, multiple of 128) on lanes.
    x2 = xf.reshape(n, L)

    # Tile size: multiple of 8 images.  Keep it moderate (vreg pressure from the num_q
    # hoisted masks) and keep >= 2 grid steps whenever the batch allows it so the
    # "parallel" batch axis is actually sharded across both TensorCores on v7x.
    tn = max(8, (min(block_images, max(n, 8)) // 8) * 8)
    if n >= 16:
        half = (((n + 1) // 2 + 7) // 8) * 8
        tn = min(tn, half)
    n_pad = ((n + tn - 1) // tn) * tn
    if n_pad != n:
        x2 = jnp.pad(x2, ((0, n_pad - n), (0, 0)))            # zero images, sliced off

    kernel = functools.partial(_cooc_kernel, num_q=num_q)

    out = pl.pallas_call(
        kernel,
        out_shape=jax.ShapeDtypeStruct((n_pad, L), jnp.float32),
        grid=(n_pad // tn,),
        in_specs=[
            pl.BlockSpec(memory_space=pltpu.MemorySpace.SMEM),   # scale (2,)
            pl.BlockSpec((tn, L), lambda i: (i, 0)),             # x, tn images / step
            pl.BlockSpec((L, L), lambda i: (0, 0)),              # conv matrix (resident)
            pl.BlockSpec(memory_space=pltpu.MemorySpace.SMEM),   # co_matrix
        ],
        out_specs=pl.BlockSpec((tn, L), lambda i: (i, 0)),
        compiler_params=pltpu.CompilerParams(dimension_semantics=("parallel",)),
    )(scale, x2, convmat, co_matrix.astype(jnp.float32))

    return out[:n].reshape(b, c, h, w)


def reference_forward(x, co_matrix, spatial_filter):
    """Pure-JAX reference mirroring the PyTorch forward (for verification)."""
    num_q = co_matrix.shape[0]
    kh, kw = spatial_filter.shape
    pt = (kh - 1) // 2
    pb = kh - 1 - pt
    pL = (kw - 1) // 2
    pr = kw - 1 - pL

    img = jnp.exp(x)
    idx = jnp.floor(jnp.abs((img - img.min()) / img.max() * num_q - 1e-5)).astype(jnp.int32)

    out = jnp.zeros_like(x)
    w4 = spatial_filter[None, None]  # (1, 1, kh, kw)
    for i in range(num_q):
        m_sel = co_matrix[i][idx]            # gather
        m_dot = m_sel * x                    # multiply original input
        spat = jax.lax.conv_general_dilated(
            m_dot, w4, window_strides=(1, 1),
            padding=((pt, pb), (pL, pr)),
            dimension_numbers=("NCHW", "OIHW", "NCHW"),
            precision=jax.lax.Precision.HIGHEST)
        out = out + spat * (idx == i).astype(x.dtype)
    return out


if __name__ == "__main__":
    key = jax.random.PRNGKey(0)
    k_co, k_sp, k_x = jax.random.split(key, 3)

    num_q = 8
    co_matrix_shape = (num_q, num_q)
    spatial_shape = [3, 3]
    b, c, h, w = 16, 1, 16, 16   # C=1 required by the PyTorch conv2d weight (1,1,kh,kw)

    # kaiming_uniform_(a=sqrt(5)) == U(-1/sqrt(fan_in), 1/sqrt(fan_in)) for 2-D tensors.
    bound_co = 1.0 / math.sqrt(co_matrix_shape[1])
    bound_sp = 1.0 / math.sqrt(spatial_shape[1])
    co_matrix = jax.random.uniform(k_co, co_matrix_shape, jnp.float32, -bound_co, bound_co)
    spatial_filter = jax.random.uniform(k_sp, tuple(spatial_shape), jnp.float32,
                                        -bound_sp, bound_sp)

    x = jax.random.normal(k_x, (b, c, h, w), jnp.float32)

    # 16 images -> tn=8 -> 2 grid steps (exercises the pipelined grid / megacore split).
    out = co_occurrence_forward(x, co_matrix, spatial_filter)
    out = jax.block_until_ready(out)

    ref = reference_forward(x, co_matrix, spatial_filter)
    assert out.shape == (b, c, h, w)
    assert jnp.allclose(out, ref, rtol=1e-3, atol=1e-3), "Pallas kernel mismatch vs reference"

    print("KERNEL_OK")
</pallas_src>

<mosaic_0001>
module attributes {stable_mosaic.version = 11 : i64} {
  func.func @_cooc_kernel(%arg0: i32, %arg1: memref<2xf32, #tpu.memory_space<smem>>, %arg2: memref<8x256xf32, #tpu.memory_space<vmem>>, %arg3: memref<256x256xf32, #tpu.memory_space<vmem>>, %arg4: memref<8x8xf32, #tpu.memory_space<smem>>, %arg5: memref<8x256xf32, #tpu.memory_space<vmem>>) attributes {dimension_semantics = [#tpu.dimension_semantics<parallel>], iteration_bounds = array<i64: 2>, scalar_prefetch = 0 : i64, scratch_operands = 0 : i64, tpu.core_type = #tpu.core_type<tc>, window_params = [{transform_indices = @transform_0, window_bounds = array<i64: 2>}, {transform_indices = @transform_1, window_bounds = array<i64: 8, 256>}, {pipeline_mode = #tpu.pipeline_mode<synchronous>, transform_indices = @transform_2, window_bounds = array<i64: 256, 256>}, {transform_indices = @transform_3, window_bounds = array<i64: 8, 8>}, {transform_indices = @transform_4, window_bounds = array<i64: 8, 256>}]} {
    %c0 = arith.constant 0 : index
    %0 = memref.load %arg1[%c0] : memref<2xf32, #tpu.memory_space<smem>>
    %c1 = arith.constant 1 : index
    %1 = memref.load %arg1[%c1] : memref<2xf32, #tpu.memory_space<smem>>
    %c0_0 = arith.constant 0 : index
    %c0_1 = arith.constant 0 : index
    %2 = vector.load %arg2[%c0_0, %c0_1] : memref<8x256xf32, #tpu.memory_space<vmem>>, vector<8x256xf32>
    %c0_2 = arith.constant 0 : index
    %c0_3 = arith.constant 0 : index
    %3 = vector.load %arg3[%c0_2, %c0_3] : memref<256x256xf32, #tpu.memory_space<vmem>>, vector<256x256xf32>
    %4 = math.exp %2 : vector<8x256xf32>
    %5 = vector.broadcast %1 : f32 to vector<8x256xf32>
    %6 = arith.mulf %4, %5 : vector<8x256xf32>
    %7 = vector.broadcast %0 : f32 to vector<8x256xf32>
    %8 = arith.subf %6, %7 : vector<8x256xf32>
    %9 = math.absf %8 : vector<8x256xf32>
    %10 = math.floor %9 : vector<8x256xf32>
    %cst = arith.constant 0.000000e+00 : f32
    %11 = vector.broadcast %cst : f32 to vector<8x256xf32>
    %12 = arith.cmpf oeq, %10, %11 : vector<8x256xf32>
    %13 = arith.extui %12 : vector<8x256xi1> to vector<8x256xi32>
    %14 = arith.sitofp %13 : vector<8x256xi32> to vector<8x256xf32>
    %cst_4 = arith.constant 1.000000e+00 : f32
    %15 = vector.broadcast %cst_4 : f32 to vector<8x256xf32>
    %16 = arith.cmpf oeq, %10, %15 : vector<8x256xf32>
    %17 = arith.extui %16 : vector<8x256xi1> to vector<8x256xi32>
    %18 = arith.sitofp %17 : vector<8x256xi32> to vector<8x256xf32>
    %cst_5 = arith.constant 2.000000e+00 : f32
    %19 = vector.broadcast %cst_5 : f32 to vector<8x256xf32>
    %20 = arith.cmpf oeq, %10, %19 : vector<8x256xf32>
    %21 = arith.extui %20 : vector<8x256xi1> to vector<8x256xi32>
    %22 = arith.sitofp %21 : vector<8x256xi32> to vector<8x256xf32>
    %cst_6 = arith.constant 3.000000e+00 : f32
    %23 = vector.broadcast %cst_6 : f32 to vector<8x256xf32>
    %24 = arith.cmpf oeq, %10, %23 : vector<8x256xf32>
    %25 = arith.extui %24 : vector<8x256xi1> to vector<8x256xi32>
    %26 = arith.sitofp %25 : vector<8x256xi32> to vector<8x256xf32>
    %cst_7 = arith.constant 4.000000e+00 : f32
    %27 = vector.broadcast %cst_7 : f32 to vector<8x256xf32>
    %28 = arith.cmpf oeq, %10, %27 : vector<8x256xf32>
    %29 = arith.extui %28 : vector<8x256xi1> to vector<8x256xi32>
    %30 = arith.sitofp %29 : vector<8x256xi32> to vector<8x256xf32>
    %cst_8 = arith.constant 5.000000e+00 : f32
    %31 = vector.broadcast %cst_8 : f32 to vector<8x256xf32>
    %32 = arith.cmpf oeq, %10, %31 : vector<8x256xf32>
    %33 = arith.extui %32 : vector<8x256xi1> to vector<8x256xi32>
    %34 = arith.sitofp %33 : vector<8x256xi32> to vector<8x256xf32>
    %cst_9 = arith.constant 6.000000e+00 : f32
    %35 = vector.broadcast %cst_9 : f32 to vector<8x256xf32>
    %36 = arith.cmpf oeq, %10, %35 : vector<8x256xf32>
    %37 = arith.extui %36 : vector<8x256xi1> to vector<8x256xi32>
    %38 = arith.sitofp %37 : vector<8x256xi32> to vector<8x256xf32>
    %cst_10 = arith.constant 7.000000e+00 : f32
    %39 = vector.broadcast %cst_10 : f32 to vector<8x256xf32>
    %40 = arith.cmpf oeq, %10, %39 : vector<8x256xf32>
    %41 = arith.extui %40 : vector<8x256xi1> to vector<8x256xi32>
    %42 = arith.sitofp %41 : vector<8x256xi32> to vector<8x256xf32>
    %cst_11 = arith.constant 0.000000e+00 : f32
    %43 = vector.broadcast %cst_11 : f32 to vector<8x256xf32>
    %c0_12 = arith.constant 0 : index
    %c0_13 = arith.constant 0 : index
    %44 = memref.load %arg4[%c0_12, %c0_13] : memref<8x8xf32, #tpu.memory_space<smem>>
    %45 = vector.broadcast %44 : f32 to vector<8x256xf32>
    %46 = arith.mulf %14, %45 : vector<8x256xf32>
    %c1_14 = arith.constant 1 : index
    %c0_15 = arith.constant 0 : index
    %47 = memref.load %arg4[%c1_14, %c0_15] : memref<8x8xf32, #tpu.memory_space<smem>>
    %48 = vector.broadcast %47 : f32 to vector<8x256xf32>
    %49 = arith.mulf %18, %48 : vector<8x256xf32>
    %50 = arith.addf %46, %49 : vector<8x256xf32>
    %c2 = arith.constant 2 : index
    %c0_16 = arith.constant 0 : index
    %51 = memref.load %arg4[%c2, %c0_16] : memref<8x8xf32, #tpu.memory_space<smem>>
    %52 = vector.broadcast %51 : f32 to vector<8x256xf32>
    %53 = arith.mulf %22, %52 : vector<8x256xf32>
    %54 = arith.addf %50, %53 : vector<8x256xf32>
    %c3 = arith.constant 3 : index
    %c0_17 = arith.constant 0 : index
    %55 = memref.load %arg4[%c3, %c0_17] : memref<8x8xf32, #tpu.memory_space<smem>>
    %56 = vector.broadcast %55 : f32 to vector<8x256xf32>
    %57 = arith.mulf %26, %56 : vector<8x256xf32>
    %58 = arith.addf %54, %57 : vector<8x256xf32>
    %c4 = arith.constant 4 : index
    %c0_18 = arith.constant 0 : index
    %59 = memref.load %arg4[%c4, %c0_18] : memref<8x8xf32, #tpu.memory_space<smem>>
    %60 = vector.broadcast %59 : f32 to vector<8x256xf32>
    %61 = arith.mulf %30, %60 : vector<8x256xf32>
    %62 = arith.addf %58, %61 : vector<8x256xf32>
    %c5 = arith.constant 5 : index
    %c0_19 = arith.constant 0 : index
    %63 = memref.load %arg4[%c5, %c0_19] : memref<8x8xf32, #tpu.memory_space<smem>>
    %64 = vector.broadcast %63 : f32 to vector<8x256xf32>
    %65 = arith.mulf %34, %64 : vector<8x256xf32>
    %66 = arith.addf %62, %65 : vector<8x256xf32>
    %c6 = arith.constant 6 : index
    %c0_20 = arith.constant 0 : index
    %67 = memref.load %arg4[%c6, %c0_20] : memref<8x8xf32, #tpu.memory_space<smem>>
    %68 = vector.broadcast %67 : f32 to vector<8x256xf32>
    %69 = arith.mulf %38, %68 : vector<8x256xf32>
    %70 = arith.addf %66, %69 : vector<8x256xf32>
    %c7 = arith.constant 7 : index
    %c0_21 = arith.constant 0 : index
    %71 = memref.load %arg4[%c7, %c0_21] : memref<8x8xf32, #tpu.memory_space<smem>>
    %72 = vector.broadcast %71 : f32 to vector<8x256xf32>
    %73 = arith.mulf %42, %72 : vector<8x256xf32>
    %74 = arith.addf %70, %73 : vector<8x256xf32>
    %75 = arith.mulf %2, %14 : vector<8x256xf32>
    %cst_22 = arith.constant dense<0.000000e+00> : vector<8x256xf32>
    %76 = tpu.matmul %75, %3, %cst_22 {dimension_numbers = #tpu.dot_dimension_numbers<[1], [0], [0], [1], [0, 0, 1, 1], [], []>, precision = #tpu.contract_precision<fp32>} : vector<8x256xf32>, vector<256x256xf32>, vector<8x256xf32> -> vector<8x256xf32>
    %77 = arith.mulf %74, %76 : vector<8x256xf32>
    %78 = arith.addf %43, %77 : vector<8x256xf32>
    %c0_23 = arith.constant 0 : index
    %c1_24 = arith.constant 1 : index
    %79 = memref.load %arg4[%c0_23, %c1_24] : memref<8x8xf32, #tpu.memory_space<smem>>
    %80 = vector.broadcast %79 : f32 to vector<8x256xf32>
    %81 = arith.mulf %14, %80 : vector<8x256xf32>
    %c1_25 = arith.constant 1 : index
    %c1_26 = arith.constant 1 : index
    %82 = memref.load %arg4[%c1_25, %c1_26] : memref<8x8xf32, #tpu.memory_space<smem>>
    %83 = vector.broadcast %82 : f32 to vector<8x256xf32>
    %84 = arith.mulf %18, %83 : vector<8x256xf32>
    %85 = arith.addf %81, %84 : vector<8x256xf32>
    %c2_27 = arith.constant 2 : index
    %c1_28 = arith.constant 1 : index
    %86 = memref.load %arg4[%c2_27, %c1_28] : memref<8x8xf32, #tpu.memory_space<smem>>
    %87 = vector.broadcast %86 : f32 to vector<8x256xf32>
    %88 = arith.mulf %22, %87 : vector<8x256xf32>
    %89 = arith.addf %85, %88 : vector<8x256xf32>
    %c3_29 = arith.constant 3 : index
    %c1_30 = arith.constant 1 : index
    %90 = memref.load %arg4[%c3_29, %c1_30] : memref<8x8xf32, #tpu.memory_space<smem>>
    %91 = vector.broadcast %90 : f32 to vector<8x256xf32>
    %92 = arith.mulf %26, %91 : vector<8x256xf32>
    %93 = arith.addf %89, %92 : vector<8x256xf32>
    %c4_31 = arith.constant 4 : index
    %c1_32 = arith.constant 1 : index
    %94 = memref.load %arg4[%c4_31, %c1_32] : memref<8x8xf32, #tpu.memory_space<smem>>
    %95 = vector.broadcast %94 : f32 to vector<8x256xf32>
    %96 = arith.mulf %30, %95 : vector<8x256xf32>
    %97 = arith.addf %93, %96 : vector<8x256xf32>
    %c5_33 = arith.constant 5 : index
    %c1_34 = arith.constant 1 : index
    %98 = memref.load %arg4[%c5_33, %c1_34] : memref<8x8xf32, #tpu.memory_space<smem>>
    %99 = vector.broadcast %98 : f32 to vector<8x256xf32>
    %100 = arith.mulf %34, %99 : vector<8x256xf32>
    %101 = arith.addf %97, %100 : vector<8x256xf32>
    %c6_35 = arith.constant 6 : index
    %c1_36 = arith.constant 1 : index
    %102 = memref.load %arg4[%c6_35, %c1_36] : memref<8x8xf32, #tpu.memory_space<smem>>
    %103 = vector.broadcast %102 : f32 to vector<8x256xf32>
    %104 = arith.mulf %38, %103 : vector<8x256xf32>
    %105 = arith.addf %101, %104 : vector<8x256xf32>
    %c7_37 = arith.constant 7 : index
    %c1_38 = arith.constant 1 : index
    %106 = memref.load %arg4[%c7_37, %c1_38] : memref<8x8xf32, #tpu.memory_space<smem>>
    %107 = vector.broadcast %106 : f32 to vector<8x256xf32>
    %108 = arith.mulf %42, %107 : vector<8x256xf32>
    %109 = arith.addf %105, %108 : vector<8x256xf32>
    %110 = arith.mulf %2, %18 : vector<8x256xf32>
    %cst_39 = arith.constant dense<0.000000e+00> : vector<8x256xf32>
    %111 = tpu.matmul %110, %3, %cst_39 {dimension_numbers = #tpu.dot_dimension_numbers<[1], [0], [0], [1], [0, 0, 1, 1], [], []>, precision = #tpu.contract_precision<fp32>} : vector<8x256xf32>, vector<256x256xf32>, vector<8x256xf32> -> vector<8x256xf32>
    %112 = arith.mulf %109, %111 : vector<8x256xf32>
    %113 = arith.addf %78, %112 : vector<8x256xf32>
    %c0_40 = arith.constant 0 : index
    %c2_41 = arith.constant 2 : index
    %114 = memref.load %arg4[%c0_40, %c2_41] : memref<8x8xf32, #tpu.memory_space<smem>>
    %115 = vector.broadcast %114 : f32 to vector<8x256xf32>
    %116 = arith.mulf %14, %115 : vector<8x256xf32>
    %c1_42 = arith.constant 1 : index
    %c2_43 = arith.constant 2 : index
    %117 = memref.load %arg4[%c1_42, %c2_43] : memref<8x8xf32, #tpu.memory_space<smem>>
    %118 = vector.broadcast %117 : f32 to vector<8x256xf32>
    %119 = arith.mulf %18, %118 : vector<8x256xf32>
    %120 = arith.addf %116, %119 : vector<8x256xf32>
    %c2_44 = arith.constant 2 : index
    %c2_45 = arith.constant 2 : index
    %121 = memref.load %arg4[%c2_44, %c2_45] : memref<8x8xf32, #tpu.memory_space<smem>>
    %122 = vector.broadcast %121 : f32 to vector<8x256xf32>
    %123 = arith.mulf %22, %122 : vector<8x256xf32>
    %124 = arith.addf %120, %123 : vector<8x256xf32>
    %c3_46 = arith.constant 3 : index
    %c2_47 = arith.constant 2 : index
    %125 = memref.load %arg4[%c3_46, %c2_47] : memref<8x8xf32, #tpu.memory_space<smem>>
    %126 = vector.broadcast %125 : f32 to vector<8x256xf32>
    %127 = arith.mulf %26, %126 : vector<8x256xf32>
    %128 = arith.addf %124, %127 : vector<8x256xf32>
    %c4_48 = arith.constant 4 : index
    %c2_49 = arith.constant 2 : index
    %129 = memref.load %arg4[%c4_48, %c2_49] : memref<8x8xf32, #tpu.memory_space<smem>>
    %130 = vector.broadcast %129 : f32 to vector<8x256xf32>
    %131 = arith.mulf %30, %130 : vector<8x256xf32>
    %132 = arith.addf %128, %131 : vector<8x256xf32>
    %c5_50 = arith.constant 5 : index
    %c2_51 = arith.constant 2 : index
    %133 = memref.load %arg4[%c5_50, %c2_51] : memref<8x8xf32, #tpu.memory_space<smem>>
    %134 = vector.broadcast %133 : f32 to vector<8x256xf32>
    %135 = arith.mulf %34, %134 : vector<8x256xf32>
    %136 = arith.addf %132, %135 : vector<8x256xf32>
    %c6_52 = arith.constant 6 : index
    %c2_53 = arith.constant 2 : index
    %137 = memref.load %arg4[%c6_52, %c2_53] : memref<8x8xf32, #tpu.memory_space<smem>>
    %138 = vector.broadcast %137 : f32 to vector<8x256xf32>
    %139 = arith.mulf %38, %138 : vector<8x256xf32>
    %140 = arith.addf %136, %139 : vector<8x256xf32>
    %c7_54 = arith.constant 7 : index
    %c2_55 = arith.constant 2 : index
    %141 = memref.load %arg4[%c7_54, %c2_55] : memref<8x8xf32, #tpu.memory_space<smem>>
    %142 = vector.broadcast %141 : f32 to vector<8x256xf32>
    %143 = arith.mulf %42, %142 : vector<8x256xf32>
    %144 = arith.addf %140, %143 : vector<8x256xf32>
    %145 = arith.mulf %2, %22 : vector<8x256xf32>
    %cst_56 = arith.constant dense<0.000000e+00> : vector<8x256xf32>
    %146 = tpu.matmul %145, %3, %cst_56 {dimension_numbers = #tpu.dot_dimension_numbers<[1], [0], [0], [1], [0, 0, 1, 1], [], []>, precision = #tpu.contract_precision<fp32>} : vector<8x256xf32>, vector<256x256xf32>, vector<8x256xf32> -> vector<8x256xf32>
    %147 = arith.mulf %144, %146 : vector<8x256xf32>
    %148 = arith.addf %113, %147 : vector<8x256xf32>
    %c0_57 = arith.constant 0 : index
    %c3_58 = arith.constant 3 : index
    %149 = memref.load %arg4[%c0_57, %c3_58] : memref<8x8xf32, #tpu.memory_space<smem>>
    %150 = vector.broadcast %149 : f32 to vector<8x256xf32>
    %151 = arith.mulf %14, %150 : vector<8x256xf32>
    %c1_59 = arith.constant 1 : index
    %c3_60 = arith.constant 3 : index
    %152 = memref.load %arg4[%c1_59, %c3_60] : memref<8x8xf32, #tpu.memory_space<smem>>
    %153 = vector.broadcast %152 : f32 to vector<8x256xf32>
    %154 = arith.mulf %18, %153 : vector<8x256xf32>
    %155 = arith.addf %151, %154 : vector<8x256xf32>
    %c2_61 = arith.constant 2 : index
    %c3_62 = arith.constant 3 : index
    %156 = memref.load %arg4[%c2_61, %c3_62] : memref<8x8xf32, #tpu.memory_space<smem>>
    %157 = vector.broadcast %156 : f32 to vector<8x256xf32>
    %158 = arith.mulf %22, %157 : vector<8x256xf32>
    %159 = arith.addf %155, %158 : vector<8x256xf32>
    %c3_63 = arith.constant 3 : index
    %c3_64 = arith.constant 3 : index
    %160 = memref.load %arg4[%c3_63, %c3_64] : memref<8x8xf32, #tpu.memory_space<smem>>
    %161 = vector.broadcast %160 : f32 to vector<8x256xf32>
    %162 = arith.mulf %26, %161 : vector<8x256xf32>
    %163 = arith.addf %159, %162 : vector<8x256xf32>
    %c4_65 = arith.constant 4 : index
    %c3_66 = arith.constant 3 : index
    %164 = memref.load %arg4[%c4_65, %c3_66] : memref<8x8xf32, #tpu.memory_space<smem>>
    %165 = vector.broadcast %164 : f32 to vector<8x256xf32>
    %166 = arith.mulf %30, %165 : vector<8x256xf32>
    %167 = arith.addf %163, %166 : vector<8x256xf32>
    %c5_67 = arith.constant 5 : index
    %c3_68 = arith.constant 3 : index
    %168 = memref.load %arg4[%c5_67, %c3_68] : memref<8x8xf32, #tpu.memory_space<smem>>
    %169 = vector.broadcast %168 : f32 to vector<8x256xf32>
    %170 = arith.mulf %34, %169 : vector<8x256xf32>
    %171 = arith.addf %167, %170 : vector<8x256xf32>
    %c6_69 = arith.constant 6 : index
    %c3_70 = arith.constant 3 : index
    %172 = memref.load %arg4[%c6_69, %c3_70] : memref<8x8xf32, #tpu.memory_space<smem>>
    %173 = vector.broadcast %172 : f32 to vector<8x256xf32>
    %174 = arith.mulf %38, %173 : vector<8x256xf32>
    %175 = arith.addf %171, %174 : vector<8x256xf32>
    %c7_71 = arith.constant 7 : index
    %c3_72 = arith.constant 3 : index
    %176 = memref.load %arg4[%c7_71, %c3_72] : memref<8x8xf32, #tpu.memory_space<smem>>
    %177 = vector.broadcast %176 : f32 to vector<8x256xf32>
    %178 = arith.mulf %42, %177 : vector<8x256xf32>
    %179 = arith.addf %175, %178 : vector<8x256xf32>
    %180 = arith.mulf %2, %26 : vector<8x256xf32>
    %cst_73 = arith.constant dense<0.000000e+00> : vector<8x256xf32>
    %181 = tpu.matmul %180, %3, %cst_73 {dimension_numbers = #tpu.dot_dimension_numbers<[1], [0], [0], [1], [0, 0, 1, 1], [], []>, precision = #tpu.contract_precision<fp32>} : vector<8x256xf32>, vector<256x256xf32>, vector<8x256xf32> -> vector<8x256xf32>
    %182 = arith.mulf %179, %181 : vector<8x256xf32>
    %183 = arith.addf %148, %182 : vector<8x256xf32>
    %c0_74 = arith.constant 0 : index
    %c4_75 = arith.constant 4 : index
    %184 = memref.load %arg4[%c0_74, %c4_75] : memref<8x8xf32, #tpu.memory_space<smem>>
    %185 = vector.broadcast %184 : f32 to vector<8x256xf32>
    %186 = arith.mulf %14, %185 : vector<8x256xf32>
    %c1_76 = arith.constant 1 : index
    %c4_77 = arith.constant 4 : index
    %187 = memref.load %arg4[%c1_76, %c4_77] : memref<8x8xf32, #tpu.memory_space<smem>>
    %188 = vector.broadcast %187 : f32 to vector<8x256xf32>
    %189 = arith.mulf %18, %188 : vector<8x256xf32>
    %190 = arith.addf %186, %189 : vector<8x256xf32>
    %c2_78 = arith.constant 2 : index
    %c4_79 = arith.constant 4 : index
    %191 = memref.load %arg4[%c2_78, %c4_79] : memref<8x8xf32, #tpu.memory_space<smem>>
    %192 = vector.broadcast %191 : f32 to vector<8x256xf32>
    %193 = arith.mulf %22, %192 : vector<8x256xf32>
    %194 = arith.addf %190, %193 : vector<8x256xf32>
    %c3_80 = arith.constant 3 : index
    %c4_81 = arith.constant 4 : index
    %195 = memref.load %arg4[%c3_80, %c4_81] : memref<8x8xf32, #tpu.memory_space<smem>>
    %196 = vector.broadcast %195 : f32 to vector<8x256xf32>
    %197 = arith.mulf %26, %196 : vector<8x256xf32>
    %198 = arith.addf %194, %197 : vector<8x256xf32>
    %c4_82 = arith.constant 4 : index
    %c4_83 = arith.constant 4 : index
    %199 = memref.load %arg4[%c4_82, %c4_83] : memref<8x8xf32, #tpu.memory_space<smem>>
    %200 = vector.broadcast %199 : f32 to vector<8x256xf32>
    %201 = arith.mulf %30, %200 : vector<8x256xf32>
    %202 = arith.addf %198, %201 : vector<8x256xf32>
    %c5_84 = arith.constant 5 : index
    %c4_85 = arith.constant 4 : index
    %203 = memref.load %arg4[%c5_84, %c4_85] : memref<8x8xf32, #tpu.memory_space<smem>>
    %204 = vector.broadcast %203 : f32 to vector<8x256xf32>
    %205 = arith.mulf %34, %204 : vector<8x256xf32>
    %206 = arith.addf %202, %205 : vector<8x256xf32>
    %c6_86 = arith.constant 6 : index
    %c4_87 = arith.constant 4 : index
    %207 = memref.load %arg4[%c6_86, %c4_87] : memref<8x8xf32, #tpu.memory_space<smem>>
    %208 = vector.broadcast %207 : f32 to vector<8x256xf32>
    %209 = arith.mulf %38, %208 : vector<8x256xf32>
    %210 = arith.addf %206, %209 : vector<8x256xf32>
    %c7_88 = arith.constant 7 : index
    %c4_89 = arith.constant 4 : index
    %211 = memref.load %arg4[%c7_88, %c4_89] : memref<8x8xf32, #tpu.memory_space<smem>>
    %212 = vector.broadcast %211 : f32 to vector<8x256xf32>
    %213 = arith.mulf %42, %212 : vector<8x256xf32>
    %214 = arith.addf %210, %213 : vector<8x256xf32>
    %215 = arith.mulf %2, %30 : vector<8x256xf32>
    %cst_90 = arith.constant dense<0.000000e+00> : vector<8x256xf32>
    %216 = tpu.matmul %215, %3, %cst_90 {dimension_numbers = #tpu.dot_dimension_numbers<[1], [0], [0], [1], [0, 0, 1, 1], [], []>, precision = #tpu.contract_precision<fp32>} : vector<8x256xf32>, vector<256x256xf32>, vector<8x256xf32> -> vector<8x256xf32>
    %217 = arith.mulf %214, %216 : vector<8x256xf32>
    %218 = arith.addf %183, %217 : vector<8x256xf32>
    %c0_91 = arith.constant 0 : index
    %c5_92 = arith.constant 5 : index
    %219 = memref.load %arg4[%c0_91, %c5_92] : memref<8x8xf32, #tpu.memory_space<smem>>
    %220 = vector.broadcast %219 : f32 to vector<8x256xf32>
    %221 = arith.mulf %14, %220 : vector<8x256xf32>
    %c1_93 = arith.constant 1 : index
    %c5_94 = arith.constant 5 : index
    %222 = memref.load %arg4[%c1_93, %c5_94] : memref<8x8xf32, #tpu.memory_space<smem>>
    %223 = vector.broadcast %222 : f32 to vector<8x256xf32>
    %224 = arith.mulf %18, %223 : vector<8x256xf32>
    %225 = arith.addf %221, %224 : vector<8x256xf32>
    %c2_95 = arith.constant 2 : index
    %c5_96 = arith.constant 5 : index
    %226 = memref.load %arg4[%c2_95, %c5_96] : memref<8x8xf32, #tpu.memory_space<smem>>
    %227 = vector.broadcast %226 : f32 to vector<8x256xf32>
    %228 = arith.mulf %22, %227 : vector<8x256xf32>
    %229 = arith.addf %225, %228 : vector<8x256xf32>
    %c3_97 = arith.constant 3 : index
    %c5_98 = arith.constant 5 : index
    %230 = memref.load %arg4[%c3_97, %c5_98] : memref<8x8xf32, #tpu.memory_space<smem>>
    %231 = vector.broadcast %230 : f32 to vector<8x256xf32>
    %232 = arith.mulf %26, %231 : vector<8x256xf32>
    %233 = arith.addf %229, %232 : vector<8x256xf32>
    %c4_99 = arith.constant 4 : index
    %c5_100 = arith.constant 5 : index
    %234 = memref.load %arg4[%c4_99, %c5_100] : memref<8x8xf32, #tpu.memory_space<smem>>
    %235 = vector.broadcast %234 : f32 to vector<8x256xf32>
    %236 = arith.mulf %30, %235 : vector<8x256xf32>
    %237 = arith.addf %233, %236 : vector<8x256xf32>
    %c5_101 = arith.constant 5 : index
    %c5_102 = arith.constant 5 : index
    %238 = memref.load %arg4[%c5_101, %c5_102] : memref<8x8xf32, #tpu.memory_space<smem>>
    %239 = vector.broadcast %238 : f32 to vector<8x256xf32>
    %240 = arith.mulf %34, %239 : vector<8x256xf32>
    %241 = arith.addf %237, %240 : vector<8x256xf32>
    %c6_103 = arith.constant 6 : index
    %c5_104 = arith.constant 5 : index
    %242 = memref.load %arg4[%c6_103, %c5_104] : memref<8x8xf32, #tpu.memory_space<smem>>
    %243 = vector.broadcast %242 : f32 to vector<8x256xf32>
    %244 = arith.mulf %38, %243 : vector<8x256xf32>
    %245 = arith.addf %241, %244 : vector<8x256xf32>
    %c7_105 = arith.constant 7 : index
    %c5_106 = arith.constant 5 : index
    %246 = memref.load %arg4[%c7_105, %c5_106] : memref<8x8xf32, #tpu.memory_space<smem>>
    %247 = vector.broadcast %246 : f32 to vector<8x256xf32>
    %248 = arith.mulf %42, %247 : vector<8x256xf32>
    %249 = arith.addf %245, %248 : vector<8x256xf32>
    %250 = arith.mulf %2, %34 : vector<8x256xf32>
    %cst_107 = arith.constant dense<0.000000e+00> : vector<8x256xf32>
    %251 = tpu.matmul %250, %3, %cst_107 {dimension_numbers = #tpu.dot_dimension_numbers<[1], [0], [0], [1], [0, 0, 1, 1], [], []>, precision = #tpu.contract_precision<fp32>} : vector<8x256xf32>, vector<256x256xf32>, vector<8x256xf32> -> vector<8x256xf32>
    %252 = arith.mulf %249, %251 : vector<8x256xf32>
    %253 = arith.addf %218, %252 : vector<8x256xf32>
    %c0_108 = arith.constant 0 : index
    %c6_109 = arith.constant 6 : index
    %254 = memref.load %arg4[%c0_108, %c6_109] : memref<8x8xf32, #tpu.memory_space<smem>>
    %255 = vector.broadcast %254 : f32 to vector<8x256xf32>
    %256 = arith.mulf %14, %255 : vector<8x256xf32>
    %c1_110 = arith.constant 1 : index
    %c6_111 = arith.constant 6 : index
    %257 = memref.load %arg4[%c1_110, %c6_111] : memref<8x8xf32, #tpu.memory_space<smem>>
    %258 = vector.broadcast %257 : f32 to vector<8x256xf32>
    %259 = arith.mulf %18, %258 : vector<8x256xf32>
    %260 = arith.addf %256, %259 : vector<8x256xf32>
    %c2_112 = arith.constant 2 : index
    %c6_113 = arith.constant 6 : index
    %261 = memref.load %arg4[%c2_112, %c6_113] : memref<8x8xf32, #tpu.memory_space<smem>>
    %262 = vector.broadcast %261 : f32 to vector<8x256xf32>
    %263 = arith.mulf %22, %262 : vector<8x256xf32>
    %264 = arith.addf %260, %263 : vector<8x256xf32>
    %c3_114 = arith.constant 3 : index
    %c6_115 = arith.constant 6 : index
    %265 = memref.load %arg4[%c3_114, %c6_115] : memref<8x8xf32, #tpu.memory_space<smem>>
    %266 = vector.broadcast %265 : f32 to vector<8x256xf32>
    %267 = arith.mulf %26, %266 : vector<8x256xf32>
    %268 = arith.addf %264, %267 : vector<8x256xf32>
    %c4_116 = arith.constant 4 : index
    %c6_117 = arith.constant 6 : index
    %269 = memref.load %arg4[%c4_116, %c6_117] : memref<8x8xf32, #tpu.memory_space<smem>>
    %270 = vector.broadcast %269 : f32 to vector<8x256xf32>
    %271 = arith.mulf %30, %270 : vector<8x256xf32>
    %272 = arith.addf %268, %271 : vector<8x256xf32>
    %c5_118 = arith.constant 5 : index
    %c6_119 = arith.constant 6 : index
    %273 = memref.load %arg4[%c5_118, %c6_119] : memref<8x8xf32, #tpu.memory_space<smem>>
    %274 = vector.broadcast %273 : f32 to vector<8x256xf32>
    %275 = arith.mulf %34, %274 : vector<8x256xf32>
    %276 = arith.addf %272, %275 : vector<8x256xf32>
    %c6_120 = arith.constant 6 : index
    %c6_121 = arith.constant 6 : index
    %277 = memref.load %arg4[%c6_120, %c6_121] : memref<8x8xf32, #tpu.memory_space<smem>>
    %278 = vector.broadcast %277 : f32 to vector<8x256xf32>
    %279 = arith.mulf %38, %278 : vector<8x256xf32>
    %280 = arith.addf %276, %279 : vector<8x256xf32>
    %c7_122 = arith.constant 7 : index
    %c6_123 = arith.constant 6 : index
    %281 = memref.load %arg4[%c7_122, %c6_123] : memref<8x8xf32, #tpu.memory_space<smem>>
    %282 = vector.broadcast %281 : f32 to vector<8x256xf32>
    %283 = arith.mulf %42, %282 : vector<8x256xf32>
    %284 = arith.addf %280, %283 : vector<8x256xf32>
    %285 = arith.mulf %2, %38 : vector<8x256xf32>
    %cst_124 = arith.constant dense<0.000000e+00> : vector<8x256xf32>
    %286 = tpu.matmul %285, %3, %cst_124 {dimension_numbers = #tpu.dot_dimension_numbers<[1], [0], [0], [1], [0, 0, 1, 1], [], []>, precision = #tpu.contract_precision<fp32>} : vector<8x256xf32>, vector<256x256xf32>, vector<8x256xf32> -> vector<8x256xf32>
    %287 = arith.mulf %284, %286 : vector<8x256xf32>
    %288 = arith.addf %253, %287 : vector<8x256xf32>
    %c0_125 = arith.constant 0 : index
    %c7_126 = arith.constant 7 : index
    %289 = memref.load %arg4[%c0_125, %c7_126] : memref<8x8xf32, #tpu.memory_space<smem>>
    %290 = vector.broadcast %289 : f32 to vector<8x256xf32>
    %291 = arith.mulf %14, %290 : vector<8x256xf32>
    %c1_127 = arith.constant 1 : index
    %c7_128 = arith.constant 7 : index
    %292 = memref.load %arg4[%c1_127, %c7_128] : memref<8x8xf32, #tpu.memory_space<smem>>
    %293 = vector.broadcast %292 : f32 to vector<8x256xf32>
    %294 = arith.mulf %18, %293 : vector<8x256xf32>
    %295 = arith.addf %291, %294 : vector<8x256xf32>
    %c2_129 = arith.constant 2 : index
    %c7_130 = arith.constant 7 : index
    %296 = memref.load %arg4[%c2_129, %c7_130] : memref<8x8xf32, #tpu.memory_space<smem>>
    %297 = vector.broadcast %296 : f32 to vector<8x256xf32>
    %298 = arith.mulf %22, %297 : vector<8x256xf32>
    %299 = arith.addf %295, %298 : vector<8x256xf32>
    %c3_131 = arith.constant 3 : index
    %c7_132 = arith.constant 7 : index
    %300 = memref.load %arg4[%c3_131, %c7_132] : memref<8x8xf32, #tpu.memory_space<smem>>
    %301 = vector.broadcast %300 : f32 to vector<8x256xf32>
    %302 = arith.mulf %26, %301 : vector<8x256xf32>
    %303 = arith.addf %299, %302 : vector<8x256xf32>
    %c4_133 = arith.constant 4 : index
    %c7_134 = arith.constant 7 : index
    %304 = memref.load %arg4[%c4_133, %c7_134] : memref<8x8xf32, #tpu.memory_space<smem>>
    %305 = vector.broadcast %304 : f32 to vector<8x256xf32>
    %306 = arith.mulf %30, %305 : vector<8x256xf32>
    %307 = arith.addf %303, %306 : vector<8x256xf32>
    %c5_135 = arith.constant 5 : index
    %c7_136 = arith.constant 7 : index
    %308 = memref.load %arg4[%c5_135, %c7_136] : memref<8x8xf32, #tpu.memory_space<smem>>
    %309 = vector.broadcast %308 : f32 to vector<8x256xf32>
    %310 = arith.mulf %34, %309 : vector<8x256xf32>
    %311 = arith.addf %307, %310 : vector<8x256xf32>
    %c6_137 = arith.constant 6 : index
    %c7_138 = arith.constant 7 : index
    %312 = memref.load %arg4[%c6_137, %c7_138] : memref<8x8xf32, #tpu.memory_space<smem>>
    %313 = vector.broadcast %312 : f32 to vector<8x256xf32>
    %314 = arith.mulf %38, %313 : vector<8x256xf32>
    %315 = arith.addf %311, %314 : vector<8x256xf32>
    %c7_139 = arith.constant 7 : index
    %c7_140 = arith.constant 7 : index
    %316 = memref.load %arg4[%c7_139, %c7_140] : memref<8x8xf32, #tpu.memory_space<smem>>
    %317 = vector.broadcast %316 : f32 to vector<8x256xf32>
    %318 = arith.mulf %42, %317 : vector<8x256xf32>
    %319 = arith.addf %315, %318 : vector<8x256xf32>
    %320 = arith.mulf %2, %42 : vector<8x256xf32>
    %cst_141 = arith.constant dense<0.000000e+00> : vector<8x256xf32>
    %321 = tpu.matmul %320, %3, %cst_141 {dimension_numbers = #tpu.dot_dimension_numbers<[1], [0], [0], [1], [0, 0, 1, 1], [], []>, precision = #tpu.contract_precision<fp32>} : vector<8x256xf32>, vector<256x256xf32>, vector<8x256xf32> -> vector<8x256xf32>
    %322 = arith.mulf %319, %321 : vector<8x256xf32>
    %323 = arith.addf %288, %322 : vector<8x256xf32>
    %c0_142 = arith.constant 0 : index
    %c0_143 = arith.constant 0 : index
    %324 = vector.load %arg5[%c0_142, %c0_143] : memref<8x256xf32, #tpu.memory_space<vmem>>, vector<8x256xf32>
    tpu.vector_store %arg5[%c0_142, %c0_143], %323 {strides = array<i32>} : memref<8x256xf32, #tpu.memory_space<vmem>>, vector<8x256xf32>,
    return
  }
  func.func @transform_0(%arg0: i32) -> i32 {
    %c0_i32 = arith.constant 0 : i32
    %c0_i32_0 = arith.constant 0 : i32
    return %c0_i32 : i32
  }
  func.func @transform_1(%arg0: i32) -> (i32, i32) {
    %c0_i32 = arith.constant 0 : i32
    %c0_i32_0 = arith.constant 0 : i32
    return %arg0, %c0_i32 : i32, i32
  }
  func.func @transform_2(%arg0: i32) -> (i32, i32) {
    %c0_i32 = arith.constant 0 : i32
    %c0_i32_0 = arith.constant 0 : i32
    %c0_i32_1 = arith.constant 0 : i32
    return %c0_i32, %c0_i32_0 : i32, i32
  }
  func.func @transform_3(%arg0: i32) -> (i32, i32) {
    %c0_i32 = arith.constant 0 : i32
    %c0_i32_0 = arith.constant 0 : i32
    %c0_i32_1 = arith.constant 0 : i32
    return %c0_i32, %c0_i32_0 : i32, i32
  }
  func.func @transform_4(%arg0: i32) -> (i32, i32) {
    %c0_i32 = arith.constant 0 : i32
    %c0_i32_0 = arith.constant 0 : i32
    return %arg0, %c0_i32 : i32, i32
  }
}

</mosaic_0001>

<bundles_post_ra>
// kernel: tpu_custom_call.1
= control target key start
LH: loop header
LB: loop body
LE: loop exit
PB: predicated region body
PF: predicated region fallthrough
CT: control target
= control target key end

     0   :  { %9 = vsyncpa [#allocation5], 0  ;;  %s18544_s0 = inlined_call_operand.hbm [shape: f32[2], index: 0, kind: input, shape index: {}]   ;;  %s18545_s1 = inlined_call_operand.hbm [shape: f32[16,256], index: 1, kind: input, shape index: {}]   ;;  %s18546_s2 = inlined_call_operand.hbm [shape: f32[256,256], index: 2, kind: input, shape index: {}]   ;;  %s18547_s3 = inlined_call_operand.vmem [shape: f32[8,8], index: 3, kind: input, shape index: {}]   ;;  %s18548_s4 = inlined_call_operand.hbm [shape: f32[16,256], index: 4, kind: output, shape index: {}]  }
   0x1   :  { %10 = vsyncpa [#allocation3], 0 }
   0x2   :  { %12 = vsyncpa [#allocation3 + $0x1], 0 }
   0x3   :  { %13 = vsyncpa [#allocation9], 0 }
   0x4   :  { %14 = vsyncpa [#allocation6], 0 }
   0x5   :  { %15 = vsyncpa [#allocation4], 0 }
   0x6   :  { %17 = vsyncpa [#allocation4 + $0x1], 0  ;;  %s14736_s15 = smov 0   ;;  %s14738_s16 = smov 0  }
   0x7   :  { %s14740_s17 = smov 0   ;;  %s14742_s18 = smov 0  }
   0x8 LB: > { %s14757_s19 = sadd.s32 4294967295, %s14701_s18   ;;  %s11193_s20 = sadd.s32 4294967294, %s14701_s18   ;;  %s14701_s18 = sphi %s14742_s18, %s20247_s18   ;;  %s14697_s17 = sphi %s14740_s17, %s20246_s17   ;;  %s14693_s16 = sphi %s14738_s16, %s20245_s16   ;;  %s14689_s15 = sphi %s14736_s15, %s20244_s15  }
   0x9   : > { %p64_p0 = scmp.ne.s32.totalorder %s14693_s16, %s14689_s15  ;;  %p18549_p1 = scmp.eq.s32.totalorder %s14757_s19, 0 }
   0xa   : > { %p136_p3 = scmp.eq.s32.totalorder %s11193_s20, 1  ;;  %p11194_p5 = scmp.ge.s32.totalorder %s14701_s18, 1 }
   0xb   : > { %p14766_p4 = por %p18549_p1, %p64_p0  ;;  %p143_p7 = scmp.lt.s32.totalorder %s14701_s18, 3 }
   0xc   : > { %p14771_p6 = por %p136_p3, %p64_p0  ;;  %s14703_s24 = smov [#allocation8]  }
   0xd   : > { %s19278_s21 = scalar_select %p14766_p4, 1, 0 }
   0xe   : > { %s19279_s22 = scalar_select %p14771_p6, 1, 0 }
   0xf   : > { %p14776_p8 = pnand %p11194_p5, %p143_p7  ;;  %s164_s25 = sshll.u32 %s14703_s24, 4  ;;  %s14783_s25 = int_to_ptr.vmem [resolvable:$true] %s164_s25 }
  0x10   : > { %s178_s29 = sshll.u32 %s18547_s3, 4  ;;  %s14537_s6 = scalar_lea.hbm %s18544_s0, 16  ;;  %s14794_s29 = int_to_ptr.vmem [resolvable:$true] %s178_s29 }
  0x11   : > { %p14463_p10 = pneg %p14776_p8  ;;  %p14538_p12 = scmp.ne.s32.totalorder %s18544_s0, %s14537_s6 }
  0x12   : > { %p14544_p5 = scmp.lt.u32.totalorder %s14537_s6, %s18544_s0 }
  0x13   : > { %p14787_p11 = pnand %p14463_p10, %p18549_p1 }
  0x15   : > { %p14539_p13 = pneg %p14787_p11 }
  0x17   : > { %p14540_p0 = pnand %p14539_p13, %p14538_p12 }
  0x19   : > { %p14541_p3 = pneg %p14540_p0 }
  0x1b   : > { %p14546_p7 = pnand %p14544_p5, %p14541_p3 }
  0x1d   : > { %14549 = shalt.err (!%p14546_p7)
}
  0x1e   : > { %s14704_s11 = smov [#allocation2]   ;;  %s14550_s24 = scalar_lea.hbm %s18546_s2, 8192 }
  0x1f   : > { %14466 = dma.hbm_to_smem (!%p14787_p11), %s18544_s0, 16, %s14704_s11, [#allocation5]  }
  0x20   : > { %p14551_p10 = scmp.ne.s32.totalorder %s18546_s2, %s14550_s24  ;;  %p14557_p3 = scmp.lt.u32.totalorder %s14550_s24, %s18546_s2 }
  0x22   : > { %p14553_p12 = pnand %p14551_p10, %p14539_p13 }
  0x24   : > { %p14554_p0 = pneg %p14553_p12 }
  0x26   : > { %p14559_p5 = pnand %p14557_p3, %p14554_p0 }
  0x28   : > { %14562 = shalt.err (!%p14559_p5)
}
  0x29   : > { %s14563_s6 = scalar_lea.vmem %s14783_s25, 8192  ;;  %p14571_p2 = scmp.lt.s32.totalorder %s14783_s25, %s14783_s25 }
  0x2a   : > { %p14564_p7 = scmp.ne.s32.totalorder %s14783_s25, %s14563_s6  ;;  %p14572_p10 = scmp.lt.s32.totalorder %s14563_s6, %s14563_s6 }
  0x2c   : > { %p14566_p9 = pnand %p14564_p7, %p14539_p13  ;;  %p14573_p12 = por %p14572_p10, %p14571_p2 }
  0x2e   : > { %p14567_p1 = pneg %p14566_p9 }
  0x30   : > { %p14574_p6 = pnand %p14573_p12, %p14567_p1 }
  0x32   : > { %14577 = shalt.err (!%p14574_p6)
}
  0x33   : > { %s14705_s7 = smov 256   ;;  %s14706_s8 = smov 16  }
  0x34   : > { %14469 = dma.hbm_to_vmem [thread:$0]  (!%p14787_p11), %s18546_s2, 8192, %s14783_s25, [#allocation9], %s14705_s7, %s14705_s7, %s14706_s8  }
  0x35   : > { %s14578_s11 = scalar_lea.vmem %s14794_s29, 128  ;;  %p14586_p6 = scmp.lt.s32.totalorder %s14794_s29, %s14794_s29 }
  0x36   : > { %p14579_p9 = scmp.ne.s32.totalorder %s14794_s29, %s14578_s11  ;;  %p14587_p0 = scmp.lt.s32.totalorder %s14578_s11, %s14578_s11 }
  0x38   : > { %p14581_p2 = pnand %p14579_p9, %p14539_p13  ;;  %p14588_p3 = por %p14587_p0, %p14586_p6 }
  0x3a   : > { %p14582_p1 = pneg %p14581_p2 }
  0x3c   : > { %p14589_p5 = pnand %p14588_p3, %p14582_p1 }
  0x3e   : > { %14592 = shalt.err (!%p14589_p5)
}
  0x3f   : > { %s14707_s12 = smov [#allocation10]   ;;  %s14851_s25 = sadd.s32 1, %s14701_s18  }
  0x40   : > { %14472 = dma.vmem_to_smem (!%p14787_p11), %s14794_s29, 128, %s14707_s12, [#allocation6]  }
  0x41   : > { %s48_s13 = ssub.s32 %s14701_s18, %s14851_s25  ;;  %s51_s14 = sadd.s32 1, %s14697_s17 }
  0x42   : > { %p49_p13 = scmp.eq.s32.totalorder %s48_s13, 0  ;;  %p58_p7 = scmp.ne.s32.totalorder %s14697_s17, %s14693_s16 }
  0x43   : > { %p59_p10 = scmp.eq.s32.totalorder %s14701_s18, 0  ;;  %p14484_p12 = scmp.lt.s32.totalorder %s14701_s18, 2 }
  0x44   : > { %s14861_s26 = scalar_select %p49_p13, %s14697_s17, %s51_s14  }
  0x45   : > { %p60_p9 = por %p59_p10, %p58_p7  ;;  %p19282_p2 = scmp.eq.s32.totalorder %s14757_s19, 1 }
  0x46   : > { %s189_s24 = sand.u32 1, %s14697_s17   ;;  %s11293_s27 = sshll.u32 %s14701_s18, 8 }
  0x47   : > { %p14865_p1 = por %p19282_p2, %p58_p7  ;;  %s11199_s29 = sshll.u32 %s189_s24, 4 }
  0x48   : > { %s14874_s5 = scalar_lea.hbm %s18545_s1, %s11293_s27  ;;  %s193_s6 = scalar_lea.vmem [#allocation7], %s11199_s29 }
  0x49   : > { %s19283_s20 = scalar_select %p14865_p1, 1, 0 }
  0x4a   : > { %s201_s7 = sshll.u32 %s193_s6, 4  ;;  %p14876_p11 = pnand %p14484_p12, %p60_p9  ;;  %s14880_s7 = int_to_ptr.vmem [resolvable:$true] %s201_s7 }
  0x4b   : > { %s190_s9 = scalar_lea.sflag [#allocation3], %s189_s24  ;;  %s14593_s10 = scalar_lea.hbm %s14874_s5, 256 }
  0x4c   : > { %p14594_p6 = scmp.ne.s32.totalorder %s14874_s5, %s14593_s10  ;;  %p14595_p0 = pneg %p14876_p11 }
  0x4d   : > { %s14598_s13 = scalar_lea.hbm %s18545_s1, 512  ;;  %p14599_p13 = scmp.lt.u32.totalorder %s14874_s5, %s18545_s1 }
  0x4e   : > { %p14596_p3 = pnand %p14595_p0, %p14594_p6  ;;  %p14600_p7 = scmp.lt.u32.totalorder %s14598_s13, %s14593_s10 }
  0x4f   : > { %p14602_p12 = scmp.lt.u32.totalorder %s14593_s10, %s14874_s5 }
  0x50   : > { %p14597_p5 = pneg %p14596_p3  ;;  %p14601_p10 = por %p14600_p7, %p14599_p13 }
  0x52   : > { %p14603_p9 = por %p14602_p12, %p14601_p10 }
  0x54   : > { %p14604_p2 = pnand %p14603_p9, %p14597_p5 }
  0x56   : > { %14607 = shalt.err (!%p14604_p2)
}
  0x57   : > { %s14608_s24 = scalar_lea.vmem %s14880_s7, 256  ;;  %s14708_s29 = smov [#allocation7]  }
  0x58   : > { %p14609_p6 = scmp.ne.s32.totalorder %s14880_s7, %s14608_s24  ;;  %s14613_s28 = sshll.u32 %s14708_s29, 4  ;;  %s14614_s28 = int_to_ptr.vmem [resolvable:$false] %s14613_s28 }
  0x59   : > { %s14615_s30 = scalar_lea.vmem %s14614_s28, 512  ;;  %p14616_p4 = scmp.lt.s32.totalorder %s14880_s7, %s14614_s28 }
  0x5a   : > { %p14611_p3 = pnand %p14609_p6, %p14595_p0  ;;  %p14617_p13 = scmp.lt.s32.totalorder %s14615_s30, %s14608_s24 }
  0x5c   : > { %p14612_p1 = pneg %p14611_p3  ;;  %p14618_p7 = por %p14617_p13, %p14616_p4 }
  0x5e   : > { %p14619_p10 = pnand %p14618_p7, %p14612_p1 }
  0x60   : > { %14622 = shalt.err (!%p14619_p10)
}
  0x61   : > { %14476 = dma.hbm_to_vmem [thread:$0]  (!%p14876_p11), %s14874_s5, 256, %s14880_s7, %s190_s9  }
  0x62   : > { %210 = sbr.rel (%p14776_p8) target bundleno = 1911 (0x777), region = 36 }
  0x69   : > { %p19285_p0 = scmp.eq.s32.totalorder %s14757_s19, 0 }
  0x6b   : > { %14668 = dma.done.wait (%p19285_p0), [#allocation5], 16   ;;  %p19286_p5 = pmov %p19285_p0 }
  0x6c   : > { %s14914_s6 = sand.u32 1, %s14693_s16   ;;  %p19287_p4 = scmp.ne.s32.totalorder %s19278_s21, 0 }
  0x6d   : > { %14670 = vsyncadd (%p19286_p5), [#allocation5], 4294967280  ;;  %s11204_s8 = sshll.u32 %s14914_s6, 4  ;;  %s217_s10 = scalar_lea.sflag [#allocation3], %s14914_s6 }
  0x6e   : > { %s14920_s5 = scalar_lea.vmem [#allocation7], %s11204_s8 }
  0x6f   : > { %14672 = dma.done.wait (%p19287_p4), %s217_s10, 256  }
  0x70   : > { %14674 = vsyncadd (%p19287_p4), %s217_s10, 4294967040  ;;  %p19288_p8 = pmov %p19285_p0 }
  0x71   : > { %p19289_p1 = pmov %p19285_p0 }
  0x72   : > { %14676 = dma.done.wait (%p19288_p8), [#allocation9], 8192  }
  0x73   : > { %14678 = vsyncadd (%p19289_p1), [#allocation9], 4294959104  ;;  %p19290_p11 = pmov %p19285_p0 }
  0x74   : > { %p19291_p12 = pmov %p19285_p0 }
  0x75   : > { %14680 = dma.done.wait (%p19290_p11), [#allocation6], 128  }
  0x76   : > { %14682 = vsyncadd (%p19291_p12), [#allocation6], 4294967168 }
  0x77   : > { %233 = sfence }
  0x78   : > { %v14934_v0 = vld [vmem:[#allocation8 + $0x8] sm:$0xff]  ;;  %v14936_v1 = vld [vmem:[#allocation8 + $0x18] sm:$0xff]  ;;  %v14938_v2 = vld [vmem:[#allocation8] sm:$0xff]  ;;  %s15281_s21 = sld [smem:[#allocation2 + $0x1]]  ;;  %s15311_s23 = sld [smem:[#allocation2]] }
  0x79   : > { %v18573_v3 = vand.u32 4294901760, %v14934_v0  ;;  %v18572_v4 = vand.u32 4294901760, %v14936_v1  ;;  %v14942_v5 = vld [vmem:[#allocation8 + $0x10] sm:$0xff]  ;;  %v18571_v6 = vand.u32 4294901760, %v14938_v2  ;;  %v14945_v7 = vld [vmem:[#allocation8 + $0x28] sm:$0xff]  ;;  %v14947_v8 = vld [vmem:[#allocation8 + $0x38] sm:$0xff] }
  0x7a   : > { %v18566_v9 = vand.u32 4294901760, %v14942_v5  ;;  %v18565_v10 = vand.u32 4294901760, %v14945_v7  ;;  %v18564_v11 = vand.u32 4294901760, %v14947_v8  ;;  %v14952_v12 = vld [vmem:[#allocation8 + $0x20] sm:$0xff]  ;;  %v14954_v13 = vld [vmem:[#allocation8 + $0x30] sm:$0xff]  ;;  %v14956_v14 = vld [vmem:[#allocation8 + $0x48] sm:$0xff] }
  0x7b   : > { %v14962_v15 = vpack.c.bf16 %v18572_v4, %v18573_v3  ;;  %v18559_v16 = vand.u32 4294901760, %v14952_v12  ;;  %v18558_v17 = vand.u32 4294901760, %v14954_v13  ;;  %v14966_v18 = vld [vmem:[#allocation8 + $0x58] sm:$0xff]  ;;  %v18557_v19 = vand.u32 4294901760, %v14956_v14  ;;  %v14969_v20 = vld [vmem:[#allocation8 + $0x40] sm:$0xff]  ;;  %v14971_v21 = vld [vmem:[#allocation8 + $0x50] sm:$0xff] }
  0x7c   : > { %v14977_v22 = vpack.c.bf16 %v18566_v9, %v18571_v6  ;;  %v14983_v23 = vpack.c.bf16 %v18564_v11, %v18565_v10  ;;  %v18556_v24 = vand.u32 4294901760, %v14966_v18  ;;  %v14986_v25 = vld [vmem:[#allocation8 + $0x68] sm:$0xff]  ;;  %v14988_v26 = vld [vmem:[#allocation8 + $0x78] sm:$0xff]  ;;  %v18555_v27 = vand.u32 4294901760, %v14969_v20  ;;  %v15004_v32 = vld [vmem:[#allocation8 + $0x60] sm:$0xff]  ;;  %s17021_s7 = sld [smem:[#allocation10]] }
  0x7d   : > { %19292 = vst [vmem:[#allocation17_spill] sm:$0xff] %v14962_v15  ;;  %11296 = vmatprep.subr.bf16.mxu0 %v14962_v15  ;;  %11680 = vmatprep.subr.bf16.mxu1 %v14962_v15  ;;  %v14999_v28 = vpack.c.bf16 %v18558_v17, %v18559_v16  ;;  %v18554_v29 = vand.u32 4294901760, %v14971_v21  ;;  %v18553_v30 = vand.u32 4294901760, %v14986_v25  ;;  %v18552_v31 = vand.u32 4294901760, %v14988_v26  ;;  %v15006_v33 = vld [vmem:[#allocation8 + $0x70] sm:$0xff]  ;;  %v15016_v35 = vld [vmem:[#allocation8 + $0x88] sm:$0xff] }
  0x7e   : > { %19293 = vst [vmem:[#allocation18_spill] sm:$0xff] %v14977_v22  ;;  %19294 = vst [vmem:[#allocation19_spill] sm:$0xff] %v14983_v23  ;;  %11298 = vmatpush1.bf16.msra.mxu0 %v14977_v22  ;;  %11682 = vmatpush1.bf16.msra.mxu1 %v14977_v22  ;;  %v15014_v34 = vpack.c.bf16 %v18556_v24, %v18557_v19  ;;  %v15018_v36 = vld [vmem:[#allocation8 + $0x98] sm:$0xff]  ;;  %v15020_v37 = vld [vmem:[#allocation8 + $0x80] sm:$0xff]  ;;  %v18563_v41 = vand.u32 4294901760, %v15004_v32  ;;  %v18560_v42 = vand.u32 4294901760, %v15006_v33 }
  0x7f   : > { %19295 = vst [vmem:[#allocation20_spill] sm:$0xff] %v14999_v28  ;;  %11300 = vmatprep.subr.bf16.mxu0 %v14983_v23  ;;  %11684 = vmatprep.subr.bf16.mxu1 %v14983_v23  ;;  %v15022_v38 = vld [vmem:[#allocation8 + $0x90] sm:$0xff]  ;;  %v15024_v39 = vld [vmem:[#allocation8 + $0xa8] sm:$0xff]  ;;  %v15026_v40 = vld [vmem:[#allocation8 + $0xb8] sm:$0xff]  ;;  %v15040_v45 = vpack.c.bf16 %v18554_v29, %v18555_v27  ;;  %v15046_v46 = vpack.c.bf16 %v18552_v31, %v18553_v30  ;;  %v18562_v47 = vand.u32 4294901760, %v15016_v35  ;;  %v18561_v48 = vand.u32 4294901760, %v15018_v36 }
  0x80   : > { %19296 = vst [vmem:[#allocation21_spill] sm:$0xff] %v15014_v34  ;;  %v15030_v43 = vld [vmem:[#allocation8 + $0xa0] sm:$0xff]  ;;  %v15032_v44 = vld [vmem:[#allocation8 + $0xb0] sm:$0xff]  ;;  %v15050_v49 = vld [vmem:[#allocation8 + $0xc8] sm:$0xff]  ;;  %v18568_v51 = vand.u32 4294901760, %v15020_v37  ;;  %v18567_v52 = vand.u32 4294901760, %v15022_v38  ;;  %v15086_v27 = vpack.c.bf16 %v18560_v42, %v18563_v41 }
  0x81   : > { %19297 = vst [vmem:[#allocation22_spill] sm:$0xff] %v15040_v45  ;;  %19298 = vst [vmem:[#allocation23_spill] sm:$0xff] %v15046_v46  ;;  %v15052_v50 = vld [vmem:[#allocation8 + $0xd8] sm:$0xff]  ;;  %v18570_v53 = vand.u32 4294901760, %v15024_v39  ;;  %v18569_v54 = vand.u32 4294901760, %v15026_v40  ;;  %v15060_v55 = vld [vmem:[#allocation8 + $0xc0] sm:$0xff]  ;;  %v15092_v24 = vpack.c.bf16 %v18561_v48, %v18562_v47 }
  0x82   : > { %11302 = vmatpush1.bf16.msra.mxu0 %v14999_v28  ;;  %11686 = vmatpush1.bf16.msra.mxu1 %v14999_v28  ;;  %v15062_v56 = vld [vmem:[#allocation8 + $0xd0] sm:$0xff]  ;;  %v18575_v57 = vand.u32 4294901760, %v15030_v43  ;;  %v18574_v58 = vand.u32 4294901760, %v15032_v44  ;;  %v15066_v59 = vld [vmem:[#allocation8 + $0xe8] sm:$0xff]  ;;  %v15068_v60 = vld [vmem:[#allocation8 + $0xf8] sm:$0xff]  ;;  %v18579_v62 = vand.u32 4294901760, %v15050_v49  ;;  %v15106_v42 = vpack.c.bf16 %v18567_v52, %v18568_v51 }
  0x83   : > { %11304 = vmatprep.subr.bf16.mxu0 %v15014_v34  ;;  %11688 = vmatprep.subr.bf16.mxu1 %v15014_v34  ;;  %19299 = vst [vmem:[#allocation24_spill] sm:$0xff] %v15066_v59  ;;  %19300 = vst [vmem:[#allocation25_spill] sm:$0xff] %v15068_v60  ;;  %v15070_v61 = vld [vmem:[#allocation8 + $0xe0] sm:$0xff]  ;;  %v18578_v63 = vand.u32 4294901760, %v15052_v50  ;;  %v15074_v31 = vld [vmem:[#allocation8 + $0xf0] sm:$0xff]  ;;  %v15112_v48 = vpack.c.bf16 %v18569_v54, %v18570_v53  ;;  %s17023_s9 = sld [smem:[#allocation10 + $0x80]] }
  0x84   : > { %19301 = vst [vmem:[#allocation26_spill] sm:$0xff] %v15070_v61  ;;  %v15076_v30 = vld [vmem:[#allocation8 + $0x108] sm:$0xff]  ;;  %v15078_v29 = vld [vmem:[#allocation8 + $0x118] sm:$0xff]  ;;  %19304 = vst [vmem:[#allocation29_spill] sm:$0xff] %v15086_v27  ;;  %v15126_v52 = vpack.c.bf16 %v18574_v58, %v18575_v57  ;;  %v19332_v22 = vand.u32 4294901760, %v15070_v61  ;;  %s17027_s11 = sld [smem:[#allocation10 + $0x1]] }
  0x85   : > { %19302 = vst [vmem:[#allocation27_spill] sm:$0xff] %v15076_v30  ;;  %19303 = vst [vmem:[#allocation28_spill] sm:$0xff] %v15078_v29  ;;  %v15094_v19 = vld [vmem:[#allocation8 + $0x100] sm:$0xff]  ;;  %v15096_v17 = vld [vmem:[#allocation8 + $0x110] sm:$0xff]  ;;  %v15141_v41 = vpack.c.bf16 %v18578_v63, %v18579_v62  ;;  %v19329_v63 = vand.u32 4294901760, %v15066_v59  ;;  %v19330_v62 = vand.u32 4294901760, %v15068_v60 }
  0x86   : > { %11306 = vmatpush1.bf16.msra.mxu0 %v15040_v45  ;;  %11690 = vmatpush1.bf16.msra.mxu1 %v15040_v45  ;;  %19305 = vst [vmem:[#allocation30_spill] sm:$0xff] %v15092_v24  ;;  %19306 = vst [vmem:[#allocation31_spill] sm:$0xff] %v15094_v19  ;;  %v15098_v16 = vld [vmem:[#allocation8 + $0x128] sm:$0xff]  ;;  %v15116_v11 = vld [vmem:[#allocation8 + $0x138] sm:$0xff]  ;;  %v19326_v45 = vand.u32 4294901760, %v15060_v55  ;;  %v19335_v15 = vand.u32 4294901760, %v15076_v30 }
  0x87   : > { %19307 = vst [vmem:[#allocation32_spill] sm:$0xff] %v15096_v17  ;;  %19308 = vst [vmem:[#allocation33_spill] sm:$0xff] %v15098_v16  ;;  %11308 = vmatprep.subr.bf16.mxu0 %v15046_v46  ;;  %11692 = vmatprep.subr.bf16.mxu1 %v15046_v46  ;;  %v15118_v10 = vld [vmem:[#allocation8 + $0x120] sm:$0xff]  ;;  %v15120_v9 = vld [vmem:[#allocation8 + $0x130] sm:$0xff]  ;;  %v15186_v57 = vpack.c.bf16 %v19330_v62, %v19329_v63  ;;  %v19336_v62 = vand.u32 4294901760, %v15078_v29  ;;  %v19338_v34 = vand.u32 4294901760, %v15094_v19 }
  0x88   : > { %19309 = vst [vmem:[#allocation34_spill] sm:$0xff] %v15106_v42  ;;  %19310 = vst [vmem:[#allocation35_spill] sm:$0xff] %v15112_v48  ;;  %v15131_v6 = vld [vmem:[#allocation8 + $0x148] sm:$0xff]  ;;  %v15133_v4 = vld [vmem:[#allocation8 + $0x158] sm:$0xff]  ;;  %v19339_v28 = vand.u32 4294901760, %v15096_v17  ;;  %s17029_s12 = sld [smem:[#allocation10 + $0x81]] }
  0x89   : > { %19311 = vst [vmem:[#allocation36_spill] sm:$0xff] %v15116_v11  ;;  %19312 = vst [vmem:[#allocation37_spill] sm:$0xff] %v15118_v10  ;;  %v15135_v3 = vld [vmem:[#allocation8 + $0x140] sm:$0xff]  ;;  %v15146_v51 = vld [vmem:[#allocation8 + $0x150] sm:$0xff]  ;;  %v15202_v63 = vpack.c.bf16 %v19336_v62, %v19335_v15  ;;  %v19344_v15 = vand.u32 4294901760, %v15116_v11  ;;  %v19346_v62 = vand.u32 4294901760, %v15118_v10 }
  0x8a   : > { %19313 = vst [vmem:[#allocation38_spill] sm:$0xff] %v15120_v9  ;;  %19314 = vst [vmem:[#allocation39_spill] sm:$0xff] %v15126_v52  ;;  %v15148_v53 = vld [vmem:[#allocation8 + $0x168] sm:$0xff]  ;;  %v15150_v47 = vld [vmem:[#allocation8 + $0x178] sm:$0xff]  ;;  %11310 = vmatpush1.bf16.msra.mxu0 %v15086_v27  ;;  %11694 = vmatpush1.bf16.msra.mxu1 %v15086_v27  ;;  %v19327_v27 = vand.u32 4294901760, %v15062_v56  ;;  %v15208_v60 = vpack.c.bf16 %v19339_v28, %v19338_v34  ;;  %v19347_v28 = vand.u32 4294901760, %v15120_v9 }
  0x8b   : > { %19315 = vst [vmem:[#allocation40_spill] sm:$0xff] %v15131_v6  ;;  %19316 = vst [vmem:[#allocation41_spill] sm:$0xff] %v15133_v4  ;;  %v15158_v58 = vld [vmem:[#allocation8 + $0x160] sm:$0xff]  ;;  %v15160_v54 = vld [vmem:[#allocation8 + $0x170] sm:$0xff]  ;;  %11312 = vmatprep.subr.bf16.mxu0 %v15092_v24  ;;  %11696 = vmatprep.subr.bf16.mxu1 %v15092_v24  ;;  %v19351_v11 = vand.u32 4294901760, %v15133_v4  ;;  %v19354_v9 = vand.u32 4294901760, %v15146_v51 }
  0x8c   : > { %19317 = vst [vmem:[#allocation42_spill] sm:$0xff] %v15135_v3  ;;  %19318 = vst [vmem:[#allocation43_spill] sm:$0xff] %v15141_v41  ;;  %v15172_v23 = vld [vmem:[#allocation8 + $0x188] sm:$0xff]  ;;  %v15174_v24 = vld [vmem:[#allocation8 + $0x198] sm:$0xff]  ;;  %v15180_v46 = vpack.c.bf16 %v19327_v27, %v19326_v45  ;;  %v19333_v27 = vand.u32 4294901760, %v15074_v31  ;;  %v15229_v34 = vpack.c.bf16 %v19347_v28, %v19346_v62  ;;  %v19356_v28 = vand.u32 4294901760, %v15148_v53 }
  0x8d   : > { %19319 = vst [vmem:[#allocation44_spill] sm:$0xff] %v15146_v51  ;;  %19320 = vst [vmem:[#allocation45_spill] sm:$0xff] %v15148_v53  ;;  %v15210_v59 = vld [vmem:[#allocation8 + $0x180] sm:$0xff]  ;;  %v15215_v61 = vld [vmem:[%s14920_s5 + $0x8] sm:$0xff]  ;;  %v19357_v19 = vand.u32 4294901760, %v15150_v47  ;;  %v19360_v4 = vand.u32 4294901760, %v15158_v58 }
  0x8e   : > { %19321 = vst [vmem:[#allocation46_spill] sm:$0xff] %v15150_v47  ;;  %19322 = vst [vmem:[#allocation47_spill] sm:$0xff] %v15158_v58  ;;  %11314 = vmatpush1.bf16.msra.mxu0 %v15106_v42  ;;  %11698 = vmatpush1.bf16.msra.mxu1 %v15106_v42  ;;  %v15196_v45 = vpack.c.bf16 %v19333_v27, %v19332_v22  ;;  %v15212_v42 = vld [vmem:[#allocation8 + $0x190] sm:$0xff]  ;;  %v19343_v22 = vand.u32 4294901760, %v15098_v16  ;;  %v15233_v29 = vld [vmem:[#allocation8 + $0x1a8] sm:$0xff]  ;;  %s17033_s13 = sld [smem:[#allocation10 + $0x100]] }
  0x8f   : > { %19323 = vst [vmem:[#allocation48_spill] sm:$0xff] %v15160_v54  ;;  %19324 = vst [vmem:[#allocation49_spill] sm:$0xff] %v15172_v23  ;;  %11316 = vmatprep.subr.bf16.mxu0 %v15112_v48  ;;  %11700 = vmatprep.subr.bf16.mxu1 %v15112_v48  ;;  %v15236_v30 = vld [vmem:[%s14920_s5] sm:$0xff]  ;;  %v19350_v48 = vand.u32 4294901760, %v15131_v6  ;;  %v15254_v17 = vpack.c.bf16 %v19357_v19, %v19356_v28  ;;  %v15256_v10 = vld [vmem:[#allocation8 + $0x1b8] sm:$0xff]  ;;  %v19365_v19 = vand.u32 4294901760, %v14934_v0 }
  0x90   : > { %19325 = vst [vmem:[#allocation50_spill] sm:$0xff] %v15174_v24  ;;  %19328 = vst [vmem:[#allocation51_spill] sm:$0xff] %v15180_v46  ;;  %v15223_v27 = vpack.c.bf16 %v19344_v15, %v19343_v22  ;;  %v19353_v15 = vand.u32 4294901760, %v15135_v3  ;;  %v324_v6 = vmul.f32 1.442695, %v15215_v61  ;;  %v15269_v53 = vld [vmem:[#allocation8 + $0x1b0] sm:$0xff] }
  0x91   : > { %19331 = vst [vmem:[#allocation52_spill] sm:$0xff] %v15186_v57  ;;  %19334 = vst [vmem:[#allocation53_spill] sm:$0xff] %v15196_v45  ;;  %v15242_v22 = vpack.c.bf16 %v19351_v11, %v19350_v48  ;;  %v19361_v11 = vand.u32 4294901760, %v15160_v54  ;;  %v15274_v28 = vsub.f32 %v14934_v0, %v19365_v19  ;;  %v322_v54 = vmul.f32 1.442695, %v15236_v30  ;;  %v15309_v47 = vld [vmem:[#allocation8 + $0x1d8] sm:$0xff] }
  0x92   : > { %19337 = vst [vmem:[#allocation54_spill] sm:$0xff] %v15202_v63  ;;  %19340 = vst [vmem:[#allocation55_spill] sm:$0xff] %v15208_v60  ;;  %v15248_v62 = vpack.c.bf16 %v19354_v9, %v19353_v15  ;;  %v15267_v15 = vld [vmem:[#allocation8 + $0x1a0] sm:$0xff]  ;;  %11318 = vmatpush1.bf16.msra.mxu0 %v15126_v52  ;;  %11702 = vmatpush1.bf16.msra.mxu1 %v15126_v52  ;;  %14527 = vpow2.f32 %v324_v6  ;;  %v19368_v9 = vand.u32 4294901760, %v14936_v1  ;;  %v19370_v0 = vand.u32 4294901760, %v15172_v23  ;;  %s17035_s14 = sld [smem:[#allocation10 + $0x101]] }
  0x93   : > { %19341 = vst [vmem:[#allocation56_spill] sm:$0xff] %v15210_v59  ;;  %19342 = vst [vmem:[#allocation57_spill] sm:$0xff] %v15212_v42  ;;  %v15263_v48 = vpack.c.bf16 %v19361_v11, %v19360_v4  ;;  %v15279_v11 = vld [vmem:[#allocation8 + $0x1c8] sm:$0xff]  ;;  %11320 = vmatprep.subr.bf16.mxu0 %v15141_v41  ;;  %11704 = vmatprep.subr.bf16.mxu1 %v15141_v41  ;;  %v19371_v19 = vand.u32 4294901760, %v15174_v24  ;;  %v19373_v6 = vand.u32 4294901760, %v14938_v2  ;;  %14529 = vpow2.f32 %v322_v54  ;;  %v15325_v41 = vld [vmem:[#allocation8 + $0x1c0] sm:$0xff] }
  0x94   : > { %19345 = vst [vmem:[#allocation58_spill] sm:$0xff] %v15223_v27  ;;  %19348 = vst [vmem:[#allocation59_spill] sm:$0xff] %v15229_v34  ;;  %v15286_v51 = vsub.f32 %v14936_v1, %v19368_v9  ;;  %v19375_v1 = vand.u32 4294901760, %v14942_v5  ;;  %v19382_v54 = vand.u32 4294901760, %v14952_v12  ;;  %v19384_v52 = vand.u32 4294901760, %v14954_v13  ;;  %s17043_s27 = sld [smem:[#allocation10 + $0x180]] }
  0x95   : > { %19349 = vst [vmem:[#allocation60_spill] sm:$0xff] %v15233_v29  ;;  %19352 = vst [vmem:[#allocation61_spill] sm:$0xff] %v15242_v22  ;;  %v15295_v4 = vpack.c.bf16 %v19371_v19, %v19370_v0  ;;  %v15301_v58 = vsub.f32 %v14938_v2, %v19373_v6  ;;  %v19378_v0 = vand.u32 4294901760, %v14945_v7  ;;  %v19380_v2 = vand.u32 4294901760, %v14947_v8  ;;  %s17045_s24 = sld [smem:[#allocation10 + $0x181]]  ;;  %s17056_s29 = sld [smem:[#allocation10 + $0x200]] }
  0x96   : > { %19355 = vst [vmem:[#allocation62_spill] sm:$0xff] %v15248_v62  ;;  %19358 = vst [vmem:[#allocation63_spill] sm:$0xff] %v15254_v17  ;;  %v15306_v9 = vsub.f32 %v14942_v5, %v19375_v1  ;;  %v15331_v24 = vsub.f32 %v14952_v12, %v19382_v54  ;;  %11322 = vmatpush1.bf16.msra.mxu0 %v15180_v46  ;;  %11706 = vmatpush1.bf16.msra.mxu1 %v15180_v46  ;;  %v19386_v12 = vand.u32 4294901760, %v15210_v59  ;;  %v15365_v59 = vld [vmem:[#allocation8 + $0x1f8] sm:$0xff]  ;;  %s17061_s28 = sld [smem:[#allocation10 + $0x201]]  ;;  %s17073_s30 = sld [smem:[#allocation10 + $0x280]] }
  0x97   : > { %19359 = vst [vmem:[#allocation64_spill] sm:$0xff] %v15256_v10  ;;  %19362 = vst [vmem:[#allocation65_spill] sm:$0xff] %v15263_v48  ;;  %v15316_v19 = vsub.f32 %v14945_v7, %v19378_v0  ;;  %v15321_v6 = vsub.f32 %v14947_v8, %v19380_v2  ;;  %v15335_v7 = vld [vmem:[#allocation8 + $0x1d0] sm:$0xff]  ;;  %v15337_v8 = vld [vmem:[#allocation8 + $0x1e8] sm:$0xff]  ;;  %v15345_v5 = vsub.f32 %v14954_v13, %v19384_v52  ;;  %11324 = vmatprep.subr.bf16.mxu0 %v15186_v57  ;;  %s17078_s10 = sld [smem:[#allocation10 + $0x281]]  ;;  %p20241_p2 = scmp.ne.s32.totalorder %s19283_s20, 0 }
  0x98   : > { %19363 = vst [vmem:[#allocation66_spill] sm:$0xff] %v15267_v15  ;;  %19364 = vst [vmem:[#allocation67_spill] sm:$0xff] %v15269_v53  ;;  %11708 = vmatprep.subr.bf16.mxu1 %v15186_v57  ;;  %v19387_v54 = vand.u32 4294901760, %v15212_v42  ;;  %v19389_v13 = vand.u32 4294901760, %v15233_v29  ;;  %v19390_v52 = vand.u32 4294901760, %v15256_v10  ;;  %v19392_v0 = vand.u32 4294901760, %v15267_v15 }
  0x99   : > { %19366 = vst [vmem:[#allocation68_spill] sm:$0xff] %v15274_v28  ;;  %19367 = vst [vmem:[#allocation69_spill] sm:$0xff] %v15279_v11  ;;  %v19393_v1 = vand.u32 4294901760, %v15269_v53  ;;  %v15382_v57 = vld [vmem:[#allocation8 + $0x1e0] sm:$0xff]  ;;  %v19397_v10 = vand.u32 4294901760, %v15301_v58  ;;  %v19400_v53 = vand.u32 4294901760, %v15309_v47  ;;  %v329_v29 = vstv %s15311_s23 }
  0x9a   : > { %19369 = vst [vmem:[#allocation70_spill] sm:$0xff] %v15286_v51  ;;  %19372 = vst [vmem:[#allocation71_spill] sm:$0xff] %v15295_v4  ;;  %v15353_v46 = vpack.c.bf16 %v19387_v54, %v19386_v12  ;;  %v15362_v23 = vpack.c.bf16 %v19390_v52, %v19389_v13  ;;  %v19395_v13 = vand.u32 4294901760, %v15274_v28  ;;  %11326 = vmatpush1.bf16.msra.mxu0 %v15196_v45  ;;  %11710 = vmatpush1.bf16.msra.mxu1 %v15196_v45  ;;  %v15384_v54 = vld [vmem:[#allocation8 + $0x1f0] sm:$0xff]  ;;  %s17097_s23 = sld [smem:[#allocation10 + $0x301]] }
  0x9b   : > { %19374 = vst [vmem:[#allocation72_spill] sm:$0xff] %v15301_v58  ;;  %19376 = vst [vmem:[#allocation73_spill] sm:$0xff] %v15306_v9  ;;  %v15373_v42 = vpack.c.bf16 %v19393_v1, %v19392_v0  ;;  %v326_v12 = vstv %s15281_s21  ;;  %v19396_v1 = vand.u32 4294901760, %v15286_v51  ;;  %v586_v2 = vsub.f32 %v15301_v58, %v19397_v10  ;;  %11328 = vmatprep.subr.bf16.mxu0 %v15202_v63  ;;  %s17092_s21 = sld [smem:[#allocation10 + $0x300]] }
  0x9c   : > { %19377 = vst [vmem:[#allocation74_spill] sm:$0xff] %v15309_v47  ;;  %19379 = vst [vmem:[#allocation75_spill] sm:$0xff] %v15316_v19  ;;  %v580_v52 = vsub.f32 %v15274_v28, %v19395_v13  ;;  %v19398_v13 = vand.u32 4294901760, %v15306_v9  ;;  %11712 = vmatprep.subr.bf16.mxu1 %v15202_v63  ;;  %v19399_v45 = vand.u32 4294901760, %v15279_v11  ;;  %v19403_v58 = vand.u32 4294901760, %v15321_v6 }
  0x9d   : > { %19381 = vst [vmem:[#allocation76_spill] sm:$0xff] %v15321_v6  ;;  %19383 = vst [vmem:[#allocation77_spill] sm:$0xff] %v15331_v24  ;;  %v592_v0 = vsub.f32 %v15286_v51, %v19396_v1  ;;  %v19402_v51 = vand.u32 4294901760, %v15316_v19  ;;  %v19404_v63 = vand.u32 4294901760, %v15331_v24  ;;  %v19405_v47 = vand.u32 4294901760, %v15345_v5 }
  0x9e   : > { %19385 = vst [vmem:[#allocation78_spill] sm:$0xff] %v15345_v5  ;;  %19388 = vst [vmem:[#allocation79_spill] sm:$0xff] %v15353_v46  ;;  %v598_v28 = vsub.f32 %v15306_v9, %v19398_v13  ;;  %v15402_v15 = vpack.c.bf16 %v19400_v53, %v19399_v45  ;;  %v616_v13 = vsub.f32 %v15321_v6, %v19403_v58  ;;  %v14528_v9 = vpop.eup %14527  ;;  %v19406_v45 = vand.u32 4294901760, %v14956_v14 }
  0x9f   : > { %19391 = vst [vmem:[#allocation80_spill] sm:$0xff] %v15362_v23  ;;  %19394 = vst [vmem:[#allocation81_spill] sm:$0xff] %v15373_v42  ;;  %v604_v10 = vsub.f32 %v15316_v19, %v19402_v51  ;;  %v610_v11 = vsub.f32 %v15331_v24, %v19404_v63  ;;  %v622_v53 = vsub.f32 %v15345_v5, %v19405_v47  ;;  %v581_v6 = vand.u32 4294901760, %v580_v52  ;;  %v14530_v3 = vpop.eup %14529 }
  0xa0   : > { %19401 = vst [vmem:[#allocation82_spill] sm:$0xff] %v15402_v15  ;;  %v15421_v1 = vsub.f32 %v14956_v14, %v19406_v45  ;;  %v328_v58 = vmul.f32 %v14528_v9, %v326_v12  ;;  %11330 = vmatpush1.bf16.msra.mxu0 %v15208_v60  ;;  %11714 = vmatpush1.bf16.msra.mxu1 %v15208_v60  ;;  %v593_v63 = vand.u32 4294901760, %v592_v0  ;;  %v587_v24 = vand.u32 4294901760, %v586_v2 }
  0xa1   : > { %v599_v16 = vand.u32 4294901760, %v598_v28  ;;  %v19408_v47 = vand.u32 4294901760, %v14966_v18  ;;  %11332 = vmatprep.subr.bf16.mxu0 %v15223_v27  ;;  %11716 = vmatprep.subr.bf16.mxu1 %v15223_v27  ;;  %v327_v9 = vmul.f32 %v14530_v3, %v326_v12  ;;  %v605_v52 = vand.u32 4294901760, %v604_v10 }
  0xa2   : > { %19407 = vst [vmem:[#allocation83_spill] sm:$0xff] %v15421_v1  ;;  %v331_v14 = vsub.f32 %v328_v58, %v329_v29  ;;  %v617_v45 = vand.u32 4294901760, %v616_v13  ;;  %v611_v19 = vand.u32 4294901760, %v610_v11  ;;  %v623_v51 = vand.u32 4294901760, %v622_v53 }
  0xa3   : > { %v15430_v5 = vsub.f32 %v14966_v18, %v19408_v47  ;;  %v18691_v60 = vand.u32 4294901760, %v15421_v1  ;;  %v19410_v2 = vand.u32 4294901760, %v14969_v20  ;;  %v19412_v18 = vand.u32 4294901760, %v15325_v41 }
  0xa4   : > { %v19413_v0 = vand.u32 4294901760, %v15335_v7  ;;  %v333_v27 = vand.u32 2147483647, %v331_v14  ;;  %v330_v58 = vsub.f32 %v327_v9, %v329_v29  ;;  %v19415_v3 = vand.u32 4294901760, %v14971_v21  ;;  %11334 = vmatpush1.bf16.msra.mxu0 %v15229_v34  ;;  %11718 = vmatpush1.bf16.msra.mxu1 %v15229_v34 }
  0xa5   : > { %19409 = vst [vmem:[#allocation84_spill] sm:$0xff] %v15430_v5  ;;  %v15438_v28 = vsub.f32 %v14969_v20, %v19410_v2  ;;  %v19417_v20 = vand.u32 4294901760, %v15337_v8  ;;  %v19418_v12 = vand.u32 4294901760, %v15365_v59  ;;  %v19420_v13 = vand.u32 4294901760, %v15382_v57  ;;  %11336 = vmatprep.subr.bf16.mxu0 %v15242_v22  ;;  %11720 = vmatprep.subr.bf16.mxu1 %v15242_v22 }
  0xa6   : > { %v15444_v47 = vpack.c.bf16 %v19413_v0, %v19412_v18  ;;  %v15449_v11 = vsub.f32 %v14971_v21, %v19415_v3  ;;  %v19421_v53 = vand.u32 4294901760, %v15384_v54  ;;  %v15465_v14 = vpack.c.bf16 %v593_v63, %v581_v6 }
  0xa7   : > { %19411 = vst [vmem:[#allocation85_spill] sm:$0xff] %v15438_v28  ;;  %v15457_v10 = vpack.c.bf16 %v19418_v12, %v19417_v20  ;;  %v18690_v21 = vand.u32 4294901760, %v15430_v5  ;;  %v15470_v9 = vfloor.f32 %v333_v27  ;;  %v332_v2 = vand.u32 2147483647, %v330_v58 }
  0xa8   : > { %19414 = vst [vmem:[#allocation86_spill] sm:$0xff] %v15444_v47  ;;  %19416 = vst [vmem:[#allocation87_spill] sm:$0xff] %v15449_v11  ;;  %v15463_v29 = vpack.c.bf16 %v19421_v53, %v19420_v13  ;;  %v15472_v18 = vpack.c.bf16 %v599_v16, %v587_v24  ;;  %v15474_v0 = vpack.c.bf16 %v617_v45, %v605_v52  ;;  %v18694_v63 = vand.u32 4294901760, %v15438_v28 }
  0xa9   : > { %19419 = vst [vmem:[#allocation88_spill] sm:$0xff] %v15457_v10  ;;  %19423 = vst [vmem:[#allocation90_spill] sm:$0xff] %v15465_v14  ;;  %v15476_v3 = vpack.c.bf16 %v623_v51, %v611_v19  ;;  %v628_v6 = vsub.f32 %v15421_v1, %v18691_v60  ;;  %v19428_v20 = vand.u32 4294901760, %v14986_v25  ;;  %vm337_vm0 = vcmp.eq.f32.partialorder %v15470_v9, 0.0  ;;  %11338 = vmatpush1.bf16.msra.mxu0 %v15248_v62 }
  0xaa   : > { %19422 = vst [vmem:[#allocation89_spill] sm:$0xff] %v15463_v29  ;;  %19424 = vst [vmem:[#allocation91_spill] sm:$0xff] %v15470_v9  ;;  %vm343_vm1 = vcmp.eq.f32.partialorder %v15470_v9, 1.0  ;;  %v15489_v16 = vfloor.f32 %v332_v2  ;;  %v18701_v24 = vand.u32 4294901760, %v15449_v11  ;;  %11722 = vmatpush1.bf16.msra.mxu1 %v15248_v62  ;;  %v18692_v27 = vmov 0.0   ;;  %11340 = vmatprep.subr.bf16.mxu0 %v15254_v17 }
  0xab   : > { %19425 = vst [vmem:[#allocation92_spill] sm:$0xff] %v15472_v18  ;;  %19426 = vst [vmem:[#allocation93_spill] sm:$0xff] %v15474_v0  ;;  %v15485_v12 = vsub.f32 %v14986_v25, %v19428_v20  ;;  %v15495_v19 = vsel %vm337_vm0, 1.0, %v18692_v27  ;;  %v15498_v51 = vsel %vm343_vm1, 1.0, %v18692_v27  ;;  %v640_v25 = vsub.f32 %v15430_v5, %v18690_v21  ;;  %11724 = vmatprep.subr.bf16.mxu1 %v15254_v17 }
  0xac   : > { %19427 = vst [vmem:[#allocation94_spill] sm:$0xff] %v15476_v3  ;;  %19430 = vst [vmem:[#allocation96_spill] sm:$0xff] %v15489_v16  ;;  %v19433_v52 = vand.u32 4294901760, %v14988_v26  ;;  %v431_v58 = vmul.f32 %v15495_v19, %v15215_v61  ;;  %v1767_v13 = vmul.f32 %v15498_v51, %v15215_v61  ;;  %vm336_vm2 = vcmp.eq.f32.partialorder %v15489_v16, 0.0 }
  0xad   : > { %19429 = vst [vmem:[#allocation95_spill] sm:$0xff] %v15485_v12  ;;  %19431 = vst [vmem:[#allocation97_spill] sm:$0xff] %v15495_v19  ;;  %vm342_vm3 = vcmp.eq.f32.partialorder %v15489_v16, 1.0  ;;  %v15517_v53 = vsel %vm336_vm2, 1.0, %v18692_v27  ;;  %v15525_v2 = vsub.f32 %v15438_v28, %v18694_v63  ;;  %v19437_v20 = vand.u32 4294901760, %v15004_v32  ;;  %11342 = vmatpush1.bf16.msra.mxu0 %v15263_v48 }
  0xae   : > { %19432 = vst [vmem:[#allocation98_spill] sm:$0xff] %v15498_v51  ;;  %v15506_v45 = vsub.f32 %v14988_v26, %v19433_v52  ;;  %19435 = vst [vmem:[#allocation100_spill] sm:$0xff] %v15517_v53  ;;  %v15520_v26 = vsel %vm342_vm3, 1.0, %v18692_v27  ;;  %v15532_v61 = vand.u32 4294901760, %v431_v58  ;;  %v15534_v21 = vand.u32 4294901760, %v1767_v13  ;;  %11726 = vmatpush1.bf16.msra.mxu1 %v15263_v48  ;;  %11344 = vmatprep.subr.bf16.mxu0 %v15295_v4 }
  0xaf   : > { %19436 = vst [vmem:[#allocation101_spill] sm:$0xff] %v15520_v26  ;;  %v15530_v52 = vsub.f32 %v15004_v32, %v19437_v20  ;;  %v430_v60 = vmul.f32 %v15517_v53, %v15236_v30  ;;  %v1766_v27 = vmul.f32 %v15520_v26, %v15236_v30  ;;  %v15545_v63 = vsub.f32 %v15449_v11, %v18701_v24 }
  0xb0   : > { %19434 = vst [vmem:[#allocation99_spill] sm:$0xff] %v15506_v45  ;;  %19439 = vst [vmem:[#allocation103_spill] sm:$0xff] %v15532_v61  ;;  %v19441_v51 = vand.u32 4294901760, %v15006_v33  ;;  %11728 = vmatprep.subr.bf16.mxu1 %v15295_v4  ;;  %v15557_v30 = vsub.f32 %v431_v58, %v15532_v61  ;;  %v15560_v26 = vsub.f32 %v1767_v13, %v15534_v21  ;;  %v629_v20 = vand.u32 4294901760, %v628_v6 }
  0xb1   : > { %19438 = vst [vmem:[#allocation102_spill] sm:$0xff] %v15530_v52  ;;  %19440 = vst [vmem:[#allocation104_spill] sm:$0xff] %v15534_v21  ;;  %v15562_v24 = vand.u32 4294901760, %v430_v60  ;;  %v15564_v32 = vand.u32 4294901760, %v1766_v27  ;;  %v641_v53 = vand.u32 4294901760, %v640_v25  ;;  %11346 = vmatpush1.bf16.msra.mxu0 %v15353_v46  ;;  %v647_v6 = vand.u32 4294901760, %v15545_v63 }
  0xb2   : > { %v15552_v19 = vsub.f32 %v15006_v33, %v19441_v51  ;;  %19443 = vst [vmem:[#allocation106_spill] sm:$0xff] %v15557_v30  ;;  %19444 = vst [vmem:[#allocation107_spill] sm:$0xff] %v15560_v26  ;;  %v18716_v51 = vand.u32 4294901760, %v15557_v30  ;;  %11730 = vmatpush1.bf16.msra.mxu1 %v15353_v46  ;;  %v19449_v25 = vand.u32 4294901760, %v15485_v12  ;;  %v19450_v33 = vand.u32 4294901760, %v15016_v35  ;;  %11348 = vmatprep.subr.bf16.mxu0 %v15362_v23 }
  0xb3   : > { %19445 = vst [vmem:[#allocation108_spill] sm:$0xff] %v15562_v24  ;;  %19446 = vst [vmem:[#allocation109_spill] sm:$0xff] %v15564_v32  ;;  %v15571_v58 = vsub.f32 %v430_v60, %v15562_v24  ;;  %v15574_v13 = vsub.f32 %v1766_v27, %v15564_v32  ;;  %v19451_v60 = vand.u32 4294901760, %v15018_v36  ;;  %11732 = vmatprep.subr.bf16.mxu1 %v15362_v23  ;;  %v19455_v23 = vand.u32 4294901760, %v15020_v37 }
  0xb4   : > { %19442 = vst [vmem:[#allocation105_spill] sm:$0xff] %v15552_v19  ;;  %v15582_v16 = vsub.f32 %v15485_v12, %v19449_v25  ;;  %v15587_v9 = vsub.f32 %v15016_v35, %v19450_v33  ;;  %v563_v63 = vsub.f32 %v15557_v30, %v18716_v51  ;;  %v19452_v25 = vand.u32 4294901760, %v15560_v26 }
  0xb5   : > { %19447 = vst [vmem:[#allocation110_spill] sm:$0xff] %v15571_v58  ;;  %19448 = vst [vmem:[#allocation111_spill] sm:$0xff] %v15574_v13  ;;  %v15592_v27 = vsub.f32 %v15018_v36, %v19451_v60  ;;  %v19453_v35 = vand.u32 4294901760, %v15506_v45  ;;  %v15607_v60 = vpack.c.bf16 %v641_v53, %v629_v20  ;;  %v15612_v48 = vsub.f32 %v15020_v37, %v19455_v23 }
  0xb6   : > { %v1899_v46 = vsub.f32 %v15560_v26, %v19452_v25  ;;  %v19456_v51 = vand.u32 4294901760, %v15022_v38  ;;  %v564_v25 = vand.u32 4294901760, %v563_v63  ;;  %v19457_v4 = vand.u32 4294901760, %v15530_v52  ;;  %11350 = vmatpush1.bf16.msra.mxu0 %v15373_v42  ;;  %11734 = vmatpush1.bf16.msra.mxu1 %v15373_v42  ;;  %v19541_v26 = vld [vmem:[#allocation44_spill] sm:$0xff] }
  0xb7   : > { %v664_v33 = vsub.f32 %v15506_v45, %v19453_v35  ;;  %19454 = vst [vmem:[#allocation112_spill] sm:$0xff] %v15607_v60  ;;  %v19458_v53 = vand.u32 4294901760, %v15024_v39  ;;  %11352 = vmatprep.subr.bf16.mxu0 %v15402_v15  ;;  %11736 = vmatprep.subr.bf16.mxu1 %v15402_v15  ;;  %v19461_v37 = vand.u32 4294901760, %v15030_v43  ;;  %v19467_v35 = vand.u32 4294901760, %v15587_v9 }
  0xb8   : > { %v15617_v17 = vsub.f32 %v15022_v38, %v19456_v51  ;;  %v1900_v62 = vand.u32 4294901760, %v1899_v46  ;;  %v658_v36 = vsub.f32 %v15530_v52, %v19457_v4  ;;  %v19459_v46 = vand.u32 4294901760, %v15026_v40  ;;  %565 = vmatprep.mubr.f32.mxu0 %v564_v25 }
  0xb9   : > { %v15630_v38 = vsub.f32 %v15024_v39, %v19458_v53  ;;  %v653_v4 = vand.u32 4294901760, %v15582_v16  ;;  %v19460_v51 = vand.u32 4294901760, %v15552_v19  ;;  %v15646_v39 = vsub.f32 %v15030_v43, %v19461_v37 }
  0xba   : > { %v15635_v20 = vsub.f32 %v15026_v40, %v19459_v46  ;;  %v19462_v53 = vand.u32 4294901760, %v15032_v44  ;;  %1901 = vmatprep.mubr.f32.mxu1 %v1900_v62  ;;  %v19463_v46 = vand.u32 4294901760, %v15571_v58  ;;  %v19464_v43 = vand.u32 4294901760, %v15574_v13  ;;  %11354 = vmatpush1.bf16.msra.mxu0 %v15444_v47 }
  0xbb   : > { %v670_v63 = vsub.f32 %v15552_v19, %v19460_v51  ;;  %v19466_v25 = vand.u32 4294901760, %v15052_v50  ;;  %11738 = vmatpush1.bf16.msra.mxu1 %v15444_v47  ;;  %v19468_v15 = vand.u32 4294901760, %v15592_v27  ;;  %11356 = vmatprep.subr.bf16.mxu0 %v15457_v10  ;;  %v19470_v47 = vand.u32 4294901760, %v15612_v48 }
  0xbc   : > { %v15651_v40 = vsub.f32 %v15032_v44, %v19462_v53  ;;  %v569_v16 = vsub.f32 %v15571_v58, %v19463_v46  ;;  %v1905_v37 = vsub.f32 %v15574_v13, %v19464_v43  ;;  %v19465_v44 = vand.u32 4294901760, %v15050_v49  ;;  %11740 = vmatprep.subr.bf16.mxu1 %v15457_v10  ;;  %v19483_v13 = vld [vmem:[#allocation24_spill] sm:$0xff] }
  0xbd   : > { %v15671_v53 = vsub.f32 %v15052_v50, %v19466_v25  ;;  %v665_v46 = vand.u32 4294901760, %v664_v33  ;;  %v676_v43 = vsub.f32 %v15587_v9, %v19467_v35  ;;  %v688_v51 = vsub.f32 %v15592_v27, %v19468_v15 }
  0xbe   : > { %v15666_v62 = vsub.f32 %v15050_v49, %v19465_v44  ;;  %v659_v50 = vand.u32 4294901760, %v658_v36  ;;  %v671_v44 = vand.u32 4294901760, %v670_v63  ;;  %v19469_v33 = vand.u32 4294901760, %v15060_v55  ;;  %11358 = vmatpush1.bf16.msra.mxu0 %v15463_v29 }
  0xbf   : > { %v570_v35 = vand.u32 4294901760, %v569_v16  ;;  %v682_v15 = vsub.f32 %v15612_v48, %v19470_v47  ;;  %v19471_v49 = vand.u32 4294901760, %v15617_v17  ;;  %v19472_v10 = vand.u32 4294901760, %v15630_v38  ;;  %11742 = vmatpush1.bf16.msra.mxu1 %v15463_v29  ;;  %11360 = vmatprep.subr.bf16.mxu0 %v15465_v14 }
  0xc0   : > { %v15688_v23 = vsub.f32 %v15060_v55, %v19469_v33  ;;  %v1906_v63 = vand.u32 4294901760, %v1905_v37  ;;  %v19473_v25 = vand.u32 4294901760, %v15635_v20  ;;  %v19474_v47 = vand.u32 4294901760, %v15525_v2  ;;  %11744 = vmatprep.subr.bf16.mxu1 %v15465_v14 }
  0xc1   : > { %v694_v42 = vsub.f32 %v15617_v17, %v19471_v49  ;;  %v700_v36 = vsub.f32 %v15630_v38, %v19472_v10  ;;  %v677_v33 = vand.u32 4294901760, %v676_v43  ;;  %v689_v34 = vand.u32 4294901760, %v688_v51  ;;  %571 = vmatmul.mubr.f32.vlgmr.msra.gmra.mrb[0].mxu0 %v570_v35 }
  0xc2   : > { %v712_v22 = vsub.f32 %v15635_v20, %v19473_v25  ;;  %v15708_v49 = vpack.c.bf16 %v647_v6, %v19474_v47  ;;  %v19476_v10 = vand.u32 4294901760, %v15646_v39  ;;  %v15715_v25 = vpack.c.bf16 %v665_v46, %v653_v4  ;;  %1907 = vmatmul.mubr.f32.vlgmr.msra.gmra.mrb[0].mxu1 %v1906_v63  ;;  %11362 = vmatpush1.bf16.msra.mxu0 %v15472_v18 }
  0xc3   : > { %v19478_v16 = vand.u32 4294901760, %v15651_v40  ;;  %v19479_v6 = vand.u32 4294901760, %v15062_v56  ;;  %v15726_v43 = vpack.c.bf16 %v671_v44, %v659_v50  ;;  %v683_v47 = vand.u32 4294901760, %v682_v15  ;;  %11746 = vmatpush1.bf16.msra.mxu1 %v15472_v18  ;;  %v19486_v50 = vld [vmem:[#allocation25_spill] sm:$0xff]  ;;  %v19488_v15 = vld [vmem:[#allocation26_spill] sm:$0xff]  ;;  %11364 = vmatprep.subr.bf16.mxu0 %v15474_v0 }
  0xc4   : > { %19475 = vst [vmem:[#allocation113_spill] sm:$0xff] %v15708_v49  ;;  %v706_v37 = vsub.f32 %v15646_v39, %v19476_v10  ;;  %19477 = vst [vmem:[#allocation114_spill] sm:$0xff] %v15715_v25  ;;  %v695_v10 = vand.u32 4294901760, %v694_v42  ;;  %v701_v29 = vand.u32 4294901760, %v700_v36  ;;  %v713_v4 = vand.u32 4294901760, %v712_v22  ;;  %11748 = vmatprep.subr.bf16.mxu1 %v15474_v0  ;;  %962 = vmatprep.mubr.f32.mxu0 %v15532_v61  ;;  %v19516_v0 = vld [vmem:[#allocation37_spill] sm:$0xff] }
  0xc5   : > { %v718_v55 = vsub.f32 %v15651_v40, %v19478_v16  ;;  %v15724_v51 = vsub.f32 %v15062_v56, %v19479_v6  ;;  %19480 = vst [vmem:[#allocation115_spill] sm:$0xff] %v15726_v43  ;;  %v19481_v46 = vand.u32 4294901760, %v15666_v62  ;;  %v19482_v16 = vand.u32 4294901760, %v15671_v53  ;;  %2298 = vmatprep.mubr.f32.mxu1 %v15534_v21  ;;  %v19519_v18 = vld [vmem:[#allocation38_spill] sm:$0xff] }
  0xc6   : > { %v19484_v58 = vand.u32 4294901760, %v19483_v13  ;;  %v15741_v42 = vpack.c.bf16 %v689_v34, %v677_v33  ;;  %v707_v22 = vand.u32 4294901760, %v706_v37  ;;  %v19487_v44 = vand.u32 4294901760, %v19486_v50  ;;  %11366 = vmatpush1.bf16.msra.mxu0 %v15476_v3  ;;  %v19503_v33 = vld [vmem:[#allocation32_spill] sm:$0xff] }
  0xc7   : > { %v724_v14 = vsub.f32 %v15666_v62, %v19481_v46  ;;  %v736_v2 = vsub.f32 %v15671_v53, %v19482_v16  ;;  %v19489_v36 = vand.u32 4294901760, %v19488_v15  ;;  %v19491_v37 = vand.u32 4294901760, %v15074_v31  ;;  %v19493_v16 = vld [vmem:[#allocation27_spill] sm:$0xff]  ;;  %11750 = vmatpush1.bf16.msra.mxu1 %v15476_v3  ;;  %11368 = vmatprep.subr.bf16.mxu0 %v15607_v60 }
  0xc8   : > { %v15737_v56 = vsub.f32 %v19483_v13, %v19484_v58  ;;  %19485 = vst [vmem:[#allocation24_spill] sm:$0xff] %v15741_v42  ;;  %v15746_v35 = vsub.f32 %v19486_v50, %v19487_v44  ;;  %v719_v58 = vand.u32 4294901760, %v718_v55  ;;  %v19490_v13 = vand.u32 4294901760, %v15688_v23  ;;  %v19496_v55 = vld [vmem:[#allocation28_spill] sm:$0xff]  ;;  %11752 = vmatprep.subr.bf16.mxu1 %v15607_v60 }
  0xc9   : > { %v15751_v63 = vsub.f32 %v19488_v15, %v19489_v36  ;;  %v15764_v6 = vsub.f32 %v15074_v31, %v19491_v37  ;;  %v15766_v46 = vpack.c.bf16 %v695_v10, %v683_v47  ;;  %v19494_v50 = vand.u32 4294901760, %v19493_v16  ;;  %v19511_v60 = vld [vmem:[#allocation36_spill] sm:$0xff] }
  0xca   : > { %v15758_v34 = vsub.f32 %v15688_v23, %v19490_v13  ;;  %v19497_v15 = vand.u32 4294901760, %v19496_v55  ;;  %v15780_v13 = vpack.c.bf16 %v713_v4, %v701_v29  ;;  %v725_v31 = vand.u32 4294901760, %v724_v14  ;;  %11370 = vmatpush1.bf16.msra.mxu0 %v15708_v49 }
  0xcb   : > { %19492 = vst [vmem:[#allocation25_spill] sm:$0xff] %v15766_v46  ;;  %v15771_v44 = vsub.f32 %v19493_v16, %v19494_v50  ;;  %v737_v37 = vand.u32 4294901760, %v736_v2  ;;  %v19500_v50 = vld [vmem:[#allocation31_spill] sm:$0xff]  ;;  %v19504_v29 = vand.u32 4294901760, %v19503_v33  ;;  %v15799_v2 = vpack.c.bf16 %v719_v58, %v707_v22  ;;  %11754 = vmatpush1.bf16.msra.mxu1 %v15708_v49  ;;  %11372 = vmatprep.subr.bf16.mxu0 %v15715_v25 }
  0xcc   : > { %v15776_v36 = vsub.f32 %v19496_v55, %v19497_v15  ;;  %19499 = vst [vmem:[#allocation28_spill] sm:$0xff] %v15780_v13  ;;  %v19501_v55 = vand.u32 4294901760, %v19500_v50  ;;  %v731_v4 = vand.u32 4294901760, %v15758_v34  ;;  %v19507_v16 = vand.u32 4294901760, %v15724_v51  ;;  %11756 = vmatprep.subr.bf16.mxu1 %v15715_v25 }
  0xcd   : > { %19495 = vst [vmem:[#allocation26_spill] sm:$0xff] %v15771_v44  ;;  %v15795_v14 = vsub.f32 %v19503_v33, %v19504_v29  ;;  %19506 = vst [vmem:[#allocation116_spill] sm:$0xff] %v15799_v2  ;;  %v19508_v33 = vld [vmem:[#allocation33_spill] sm:$0xff]  ;;  %v19512_v22 = vand.u32 4294901760, %v19511_v60  ;;  %v15818_v34 = vpack.c.bf16 %v737_v37, %v725_v31  ;;  %v19520_v21 = vand.u32 4294901760, %v19519_v18 }
  0xce   : > { %19498 = vst [vmem:[#allocation27_spill] sm:$0xff] %v15776_v36  ;;  %v15790_v15 = vsub.f32 %v19500_v50, %v19501_v55  ;;  %v742_v10 = vsub.f32 %v15724_v51, %v19507_v16  ;;  %v19509_v29 = vand.u32 4294901760, %v19508_v33  ;;  %v19515_v16 = vand.u32 4294901760, %v15737_v56  ;;  %11374 = vmatpush1.bf16.msra.mxu0 %v15726_v43 }
  0xcf   : > { %19505 = vst [vmem:[#allocation32_spill] sm:$0xff] %v15795_v14  ;;  %v15816_v58 = vsub.f32 %v19511_v60, %v19512_v22  ;;  %19514 = vst [vmem:[#allocation117_spill] sm:$0xff] %v15818_v34  ;;  %v19517_v55 = vand.u32 4294901760, %v19516_v0  ;;  %v19522_v60 = vand.u32 4294901760, %v15746_v35  ;;  %v19523_v37 = vand.u32 4294901760, %v15751_v63  ;;  %11758 = vmatpush1.bf16.msra.mxu1 %v15726_v43  ;;  %11376 = vmatprep.subr.bf16.mxu0 %v15741_v42  ;;  %v19545_v43 = vld [vmem:[#allocation45_spill] sm:$0xff] }
  0xd0   : > { %19502 = vst [vmem:[#allocation31_spill] sm:$0xff] %v15790_v15  ;;  %v15811_v3 = vsub.f32 %v19508_v33, %v19509_v29  ;;  %v748_v50 = vsub.f32 %v15737_v56, %v19515_v16  ;;  %v15831_v33 = vsub.f32 %v19519_v18, %v19520_v21  ;;  %v19524_v21 = vand.u32 4294901760, %v15764_v6  ;;  %v19530_v16 = vld [vmem:[#allocation41_spill] sm:$0xff]  ;;  %11760 = vmatprep.subr.bf16.mxu1 %v15741_v42 }
  0xd1   : > { %19513 = vst [vmem:[#allocation36_spill] sm:$0xff] %v15816_v58  ;;  %v15826_v47 = vsub.f32 %v19516_v0, %v19517_v55  ;;  %v760_v31 = vsub.f32 %v15746_v35, %v19522_v60  ;;  %v754_v29 = vsub.f32 %v15751_v63, %v19523_v37  ;;  %v19525_v60 = vld [vmem:[#allocation40_spill] sm:$0xff]  ;;  %v743_v0 = vand.u32 4294901760, %v742_v10 }
  0xd2   : > { %19510 = vst [vmem:[#allocation33_spill] sm:$0xff] %v15811_v3  ;;  %19521 = vst [vmem:[#allocation38_spill] sm:$0xff] %v15831_v33  ;;  %v766_v18 = vsub.f32 %v15764_v6, %v19524_v21  ;;  %v19526_v49 = vand.u32 4294901760, %v19525_v60  ;;  %v19528_v55 = vand.u32 4294901760, %v15771_v44  ;;  %v19529_v25 = vand.u32 4294901760, %v15776_v36  ;;  %11378 = vmatpush1.bf16.msra.mxu0 %v15766_v46 }
  0xd3   : > { %19518 = vst [vmem:[#allocation37_spill] sm:$0xff] %v15826_v47  ;;  %v749_v52 = vand.u32 4294901760, %v748_v50  ;;  %v19531_v45 = vand.u32 4294901760, %v19530_v16  ;;  %v19536_v50 = vand.u32 4294901760, %v15790_v15  ;;  %v19537_v21 = vand.u32 4294901760, %v15795_v14  ;;  %11762 = vmatpush1.bf16.msra.mxu1 %v15766_v46  ;;  %11380 = vmatprep.subr.bf16.mxu0 %v15780_v13 }
  0xd4   : > { %v15853_v37 = vsub.f32 %v19525_v60, %v19526_v49  ;;  %v772_v61 = vsub.f32 %v15771_v44, %v19528_v55  ;;  %v784_v19 = vsub.f32 %v15776_v36, %v19529_v25  ;;  %v19533_v49 = vld [vmem:[#allocation42_spill] sm:$0xff]  ;;  %v761_v25 = vand.u32 4294901760, %v760_v31  ;;  %11764 = vmatprep.subr.bf16.mxu1 %v15780_v13 }
  0xd5   : > { %v15866_v12 = vsub.f32 %v19530_v16, %v19531_v45  ;;  %v19534_v10 = vand.u32 4294901760, %v19533_v49  ;;  %v755_v55 = vand.u32 4294901760, %v754_v29  ;;  %v778_v22 = vsub.f32 %v15790_v15, %v19536_v50 }
  0xd6   : > { %19527 = vst [vmem:[#allocation40_spill] sm:$0xff] %v15853_v37  ;;  %v790_v45 = vsub.f32 %v15795_v14, %v19537_v21  ;;  %v767_v16 = vand.u32 4294901760, %v766_v18  ;;  %v19539_v31 = vand.u32 4294901760, %v15816_v58  ;;  %v773_v50 = vand.u32 4294901760, %v772_v61  ;;  %11382 = vmatpush1.bf16.msra.mxu0 %v15799_v2 }
  0xd7   : > { %19532 = vst [vmem:[#allocation41_spill] sm:$0xff] %v15866_v12  ;;  %v15871_v60 = vsub.f32 %v19533_v49, %v19534_v10  ;;  %v19538_v49 = vand.u32 4294901760, %v15811_v3  ;;  %v785_v11 = vand.u32 4294901760, %v784_v19  ;;  %v19540_v28 = vand.u32 4294901760, %v15826_v47  ;;  %11766 = vmatpush1.bf16.msra.mxu1 %v15799_v2  ;;  %11384 = vmatprep.subr.bf16.mxu0 %v15818_v34 }
  0xd8   : > { %v808_v29 = vsub.f32 %v15816_v58, %v19539_v31  ;;  %v19542_v30 = vand.u32 4294901760, %v19541_v26  ;;  %v19544_v42 = vand.u32 4294901760, %v15831_v33  ;;  %v19546_v61 = vand.u32 4294901760, %v19545_v43  ;;  %11768 = vmatprep.subr.bf16.mxu1 %v15818_v34  ;;  %v19572_v34 = vld [vmem:[#allocation56_spill] sm:$0xff] }
  0xd9   : > { %19535 = vst [vmem:[#allocation42_spill] sm:$0xff] %v15871_v60  ;;  %v796_v10 = vsub.f32 %v15811_v3, %v19538_v49  ;;  %v802_v21 = vsub.f32 %v15826_v47, %v19540_v28  ;;  %v15910_v28 = vpack.c.bf16 %v743_v0, %v731_v4  ;;  %v791_v1 = vand.u32 4294901760, %v790_v45 }
  0xda   : > { %v15896_v18 = vsub.f32 %v19541_v26, %v19542_v30  ;;  %v814_v49 = vsub.f32 %v15831_v33, %v19544_v42  ;;  %v15906_v19 = vsub.f32 %v19545_v43, %v19546_v61  ;;  %v15912_v26 = vpack.c.bf16 %v761_v25, %v749_v52  ;;  %v19551_v61 = vld [vmem:[#allocation46_spill] sm:$0xff] }
  0xdb   : > { %19548 = vst [vmem:[#allocation118_spill] sm:$0xff] %v15910_v28  ;;  %v779_v30 = vand.u32 4294901760, %v778_v22  ;;  %v797_v42 = vand.u32 4294901760, %v796_v10  ;;  %v809_v31 = vand.u32 4294901760, %v808_v29  ;;  %v19550_v5 = vand.u32 4294901760, %v15853_v37  ;;  %11386 = vmatpush1.bf16.msra.mxu0 %v15910_v28  ;;  %11770 = vmatpush1.bf16.msra.mxu1 %v15910_v28 }
  0xdc   : > { %19543 = vst [vmem:[#allocation44_spill] sm:$0xff] %v15896_v18  ;;  %19547 = vst [vmem:[#allocation45_spill] sm:$0xff] %v15906_v19  ;;  %v19552_v32 = vand.u32 4294901760, %v19551_v61  ;;  %v15924_v4 = vpack.c.bf16 %v767_v16, %v755_v55  ;;  %v15926_v52 = vpack.c.bf16 %v785_v11, %v773_v50  ;;  %v803_v0 = vand.u32 4294901760, %v802_v21  ;;  %v19562_v50 = vld [vmem:[#allocation48_spill] sm:$0xff]  ;;  %11388 = vmatprep.subr.bf16.mxu0 %v15912_v26 }
  0xdd   : > { %19549 = vst [vmem:[#allocation119_spill] sm:$0xff] %v15912_v26  ;;  %v820_v43 = vsub.f32 %v15853_v37, %v19550_v5  ;;  %v18793_v22 = vand.u32 4294901760, %v15896_v18  ;;  %v815_v25 = vand.u32 4294901760, %v814_v49  ;;  %v19556_v45 = vand.u32 4294901760, %v15866_v12  ;;  %11772 = vmatprep.subr.bf16.mxu1 %v15912_v26 }
  0xde   : > { %v15922_v46 = vsub.f32 %v19551_v61, %v19552_v32  ;;  %19554 = vst [vmem:[#allocation120_spill] sm:$0xff] %v15924_v4  ;;  %19555 = vst [vmem:[#allocation121_spill] sm:$0xff] %v15926_v52  ;;  %v19557_v29 = vand.u32 4294901760, %v15871_v60  ;;  %v15938_v11 = vpack.c.bf16 %v791_v1, %v779_v30  ;;  %v19559_v32 = vld [vmem:[#allocation47_spill] sm:$0xff]  ;;  %v19563_v21 = vand.u32 4294901760, %v19562_v50  ;;  %v19566_v30 = vld [vmem:[#allocation49_spill] sm:$0xff] }
  0xdf   : > { %v832_v10 = vsub.f32 %v15866_v12, %v19556_v45  ;;  %v19560_v55 = vand.u32 4294901760, %v19559_v32  ;;  %v15952_v61 = vpack.c.bf16 %v809_v31, %v797_v42  ;;  %v821_v45 = vand.u32 4294901760, %v820_v43  ;;  %v19575_v43 = vld [vmem:[#allocation57_spill] sm:$0xff]  ;;  %11390 = vmatpush1.bf16.msra.mxu0 %v15924_v4  ;;  %11774 = vmatpush1.bf16.msra.mxu1 %v15924_v4 }
  0xe0   : > { %19553 = vst [vmem:[#allocation46_spill] sm:$0xff] %v15922_v46  ;;  %v826_v5 = vsub.f32 %v15871_v60, %v19557_v29  ;;  %19558 = vst [vmem:[#allocation122_spill] sm:$0xff] %v15938_v11  ;;  %v15948_v49 = vsub.f32 %v19562_v50, %v19563_v21  ;;  %v19567_v29 = vand.u32 4294901760, %v19566_v30  ;;  %v19573_v31 = vand.u32 4294901760, %v19572_v34  ;;  %11392 = vmatprep.subr.bf16.mxu0 %v15926_v52 }
  0xe1   : > { %v15943_v16 = vsub.f32 %v19559_v32, %v19560_v55  ;;  %19565 = vst [vmem:[#allocation123_spill] sm:$0xff] %v15952_v61  ;;  %v838_v32 = vsub.f32 %v15896_v18, %v18793_v22  ;;  %v19569_v55 = vld [vmem:[#allocation50_spill] sm:$0xff]  ;;  %v19576_v1 = vand.u32 4294901760, %v19575_v43  ;;  %v19579_v22 = vand.u32 4294901760, %v15906_v19  ;;  %11776 = vmatprep.subr.bf16.mxu1 %v15926_v52 }
  0xe2   : > { %19564 = vst [vmem:[#allocation48_spill] sm:$0xff] %v15948_v49  ;;  %v15958_v13 = vsub.f32 %v19566_v30, %v19567_v29  ;;  %v19570_v50 = vand.u32 4294901760, %v19569_v55  ;;  %v15971_v42 = vsub.f32 %v19572_v34, %v19573_v31  ;;  %v15978_v30 = vpack.c.bf16 %v815_v25, %v803_v0  ;;  %v19583_v25 = vld [vmem:[#allocation64_spill] sm:$0xff] }
  0xe3   : > { %19561 = vst [vmem:[#allocation47_spill] sm:$0xff] %v15943_v16  ;;  %v15976_v2 = vsub.f32 %v19575_v43, %v19576_v1  ;;  %v833_v29 = vand.u32 4294901760, %v832_v10  ;;  %v827_v24 = vand.u32 4294901760, %v826_v5  ;;  %v15983_v18 = vsub.f32 %v15906_v19, %v19579_v22  ;;  %11394 = vmatpush1.bf16.msra.mxu0 %v15938_v11  ;;  %11778 = vmatpush1.bf16.msra.mxu1 %v15938_v11 }
  0xe4   : > { %19568 = vst [vmem:[#allocation49_spill] sm:$0xff] %v15958_v13  ;;  %v15966_v21 = vsub.f32 %v19569_v55, %v19570_v50  ;;  %19574 = vst [vmem:[#allocation56_spill] sm:$0xff] %v15971_v42  ;;  %v19580_v50 = vld [vmem:[#allocation60_spill] sm:$0xff]  ;;  %v19584_v10 = vand.u32 4294901760, %v19583_v25  ;;  %v19586_v22 = vand.u32 4294901760, %v15922_v46  ;;  %v19587_v55 = vld [vmem:[#allocation66_spill] sm:$0xff]  ;;  %11396 = vmatprep.subr.bf16.mxu0 %v15952_v61  ;;  %11780 = vmatprep.subr.bf16.mxu1 %v15952_v61 }
  0xe5   : > { %19577 = vst [vmem:[#allocation57_spill] sm:$0xff] %v15976_v2  ;;  %19578 = vst [vmem:[#allocation124_spill] sm:$0xff] %v15978_v30  ;;  %v19581_v1 = vand.u32 4294901760, %v19580_v50  ;;  %v19588_v34 = vand.u32 4294901760, %v19587_v55 }
  0xe6   : > { %19571 = vst [vmem:[#allocation50_spill] sm:$0xff] %v15966_v21  ;;  %v15997_v5 = vsub.f32 %v19583_v25, %v19584_v10  ;;  %v856_v31 = vsub.f32 %v15922_v46, %v19586_v22  ;;  %v839_v10 = vand.u32 4294901760, %v838_v32  ;;  %v18812_v19 = vand.u32 4294901760, %v15966_v21 }
  0xe7   : > { %v15992_v0 = vsub.f32 %v19580_v50, %v19581_v1  ;;  %v16008_v50 = vsub.f32 %v19587_v55, %v19588_v34  ;;  %v19590_v1 = vld [vmem:[#allocation67_spill] sm:$0xff]  ;;  %v16018_v22 = vpack.c.bf16 %v833_v29, %v821_v45  ;;  %v19594_v34 = vld [vmem:[#allocation69_spill] sm:$0xff]  ;;  %v19597_v29 = vld [vmem:[#allocation74_spill] sm:$0xff]  ;;  %v19602_v45 = vand.u32 4294901760, %v15958_v13  ;;  %11398 = vmatpush1.bf16.msra.mxu0 %v15978_v30  ;;  %11782 = vmatpush1.bf16.msra.mxu1 %v15978_v30 }
  0xe8   : > { %19585 = vst [vmem:[#allocation64_spill] sm:$0xff] %v15997_v5  ;;  %v19591_v28 = vand.u32 4294901760, %v19590_v1  ;;  %v19595_v55 = vand.u32 4294901760, %v19594_v34  ;;  %v16048_v26 = vpack.c.bf16 %v839_v10, %v827_v24  ;;  %v19612_v10 = vand.u32 4294901760, %v15335_v7 }
  0xe9   : > { %19582 = vst [vmem:[#allocation60_spill] sm:$0xff] %v15992_v0  ;;  %19589 = vst [vmem:[#allocation66_spill] sm:$0xff] %v16008_v50  ;;  %v868_v60 = vsub.f32 %v15958_v13, %v19602_v45  ;;  %v19607_v45 = vand.u32 4294901760, %v15997_v5  ;;  %11400 = vmatprep.subr.bf16.mxu0 %v16018_v22  ;;  %11784 = vmatprep.subr.bf16.mxu1 %v16018_v22 }
  0xea   : > { %v16013_v25 = vsub.f32 %v19590_v1, %v19591_v28  ;;  %19593 = vst [vmem:[#allocation125_spill] sm:$0xff] %v16018_v22  ;;  %v16025_v12 = vsub.f32 %v19594_v34, %v19595_v55  ;;  %v845_v28 = vand.u32 4294901760, %v15983_v18  ;;  %v19598_v1 = vand.u32 4294901760, %v19597_v29  ;;  %19603 = vst [vmem:[#allocation126_spill] sm:$0xff] %v16048_v26  ;;  %v19645_v22 = vld [vmem:[#allocation44_spill] sm:$0xff] }
  0xeb   : > { %v857_v34 = vand.u32 4294901760, %v856_v31  ;;  %v19600_v55 = vand.u32 4294901760, %v15943_v16  ;;  %v19601_v18 = vand.u32 4294901760, %v15948_v49  ;;  %v19604_v31 = vand.u32 4294901760, %v15971_v42  ;;  %11402 = vmatpush1.bf16.msra.mxu0 %v16048_v26  ;;  %11786 = vmatpush1.bf16.msra.mxu1 %v16048_v26  ;;  %v19644_v26 = vld [vmem:[#allocation42_spill] sm:$0xff] }
  0xec   : > { %19592 = vst [vmem:[#allocation67_spill] sm:$0xff] %v16013_v25  ;;  %19596 = vst [vmem:[#allocation69_spill] sm:$0xff] %v16025_v12  ;;  %v16035_v43 = vsub.f32 %v19597_v29, %v19598_v1  ;;  %v880_v29 = vsub.f32 %v15966_v21, %v18812_v19  ;;  %v904_v24 = vsub.f32 %v15997_v5, %v19607_v45  ;;  %v19608_v19 = vand.u32 4294901760, %v15325_v41 }
  0xed   : > { %v850_v46 = vsub.f32 %v15943_v16, %v19600_v55  ;;  %v862_v32 = vsub.f32 %v15948_v49, %v19601_v18  ;;  %v874_v1 = vsub.f32 %v15971_v42, %v19604_v31  ;;  %v19605_v55 = vand.u32 4294901760, %v15976_v2 }
  0xee   : > { %19599 = vst [vmem:[#allocation74_spill] sm:$0xff] %v16035_v43  ;;  %v19606_v18 = vand.u32 4294901760, %v15992_v0  ;;  %v16069_v21 = vsub.f32 %v15325_v41, %v19608_v19  ;;  %v19610_v31 = vand.u32 4294901760, %v16008_v50  ;;  %v16083_v5 = vsub.f32 %v15335_v7, %v19612_v10 }
  0xef   : > { %v886_v52 = vsub.f32 %v15976_v2, %v19605_v55  ;;  %v851_v41 = vand.u32 4294901760, %v850_v46  ;;  %v863_v19 = vand.u32 4294901760, %v862_v32  ;;  %v869_v11 = vand.u32 4294901760, %v868_v60 }
  0xf0   : > { %v892_v4 = vsub.f32 %v15992_v0, %v19606_v18  ;;  %19609 = vst [vmem:[#allocation127_spill] sm:$0xff] %v16069_v21  ;;  %v898_v55 = vsub.f32 %v16008_v50, %v19610_v31  ;;  %v19611_v18 = vand.u32 4294901760, %v16013_v25  ;;  %19613 = vst [vmem:[#allocation128_spill] sm:$0xff] %v16083_v5  ;;  %v19614_v31 = vand.u32 4294901760, %v15337_v8 }
  0xf1   : > { %v887_v45 = vand.u32 4294901760, %v886_v52  ;;  %v19616_v2 = vand.u32 4294901760, %v15365_v59  ;;  %v905_v42 = vand.u32 4294901760, %v904_v24  ;;  %v19618_v61 = vand.u32 4294901760, %v16025_v12 }
  0xf2   : > { %v910_v0 = vsub.f32 %v16013_v25, %v19611_v18  ;;  %v16090_v50 = vsub.f32 %v15337_v8, %v19614_v31  ;;  %v881_v18 = vand.u32 4294901760, %v880_v29  ;;  %v875_v25 = vand.u32 4294901760, %v874_v1 }
  0xf3   : > { %v16095_v7 = vsub.f32 %v15365_v59, %v19616_v2  ;;  %v893_v10 = vand.u32 4294901760, %v892_v4  ;;  %v16100_v46 = vsub.f32 %v16025_v12, %v19618_v61  ;;  %v18834_v60 = vand.u32 4294901760, %v16069_v21 }
  0xf4   : > { %19615 = vst [vmem:[#allocation129_spill] sm:$0xff] %v16090_v50  ;;  %v899_v8 = vand.u32 4294901760, %v898_v55  ;;  %v911_v52 = vand.u32 4294901760, %v910_v0  ;;  %v19619_v32 = vand.u32 4294901760, %v16035_v43  ;;  %v18833_v2 = vand.u32 4294901760, %v16083_v5 }
  0xf5   : > { %19617 = vst [vmem:[#allocation130_spill] sm:$0xff] %v16095_v7  ;;  %v16113_v4 = vpack.c.bf16 %v857_v34, %v845_v28  ;;  %v18832_v61 = vand.u32 4294901760, %v16090_v50  ;;  %v19621_v29 = vand.u32 4294901760, %v15382_v57  ;;  %v16121_v0 = vpack.c.bf16 %v863_v19, %v851_v41 }
  0xf6   : > { %v16108_v59 = vsub.f32 %v16035_v43, %v19619_v32  ;;  %v16123_v24 = vpack.c.bf16 %v881_v18, %v869_v11  ;;  %v18831_v55 = vand.u32 4294901760, %v16095_v7  ;;  %v16126_v31 = vpack.c.bf16 %v887_v45, %v875_v25 }
  0xf7   : > { %19620 = vst [vmem:[#allocation131_spill] sm:$0xff] %v16113_v4  ;;  %v16119_v1 = vsub.f32 %v15382_v57, %v19621_v29  ;;  %19623 = vst [vmem:[#allocation133_spill] sm:$0xff] %v16121_v0  ;;  %v16128_v32 = vpack.c.bf16 %v905_v42, %v893_v10  ;;  %v917_v28 = vand.u32 4294901760, %v16100_v46  ;;  %v922_v34 = vsub.f32 %v16069_v21, %v18834_v60 }
  0xf8   : > { %19624 = vst [vmem:[#allocation134_spill] sm:$0xff] %v16123_v24  ;;  %19625 = vst [vmem:[#allocation135_spill] sm:$0xff] %v16126_v31  ;;  %v16136_v57 = vpack.c.bf16 %v911_v52, %v899_v8  ;;  %v929_v11 = vand.u32 4294901760, %v16108_v59  ;;  %v934_v25 = vsub.f32 %v16083_v5, %v18833_v2  ;;  %v19628_v42 = vand.u32 4294901760, %v15384_v54  ;;  %11404 = vmatprep.subr.bf16.mxu0 %v16113_v4 }
  0xf9   : > { %19622 = vst [vmem:[#allocation132_spill] sm:$0xff] %v16119_v1  ;;  %19626 = vst [vmem:[#allocation136_spill] sm:$0xff] %v16128_v32  ;;  %11788 = vmatprep.subr.bf16.mxu1 %v16113_v4  ;;  %v940_v41 = vsub.f32 %v16090_v50, %v18832_v61  ;;  %v16155_v18 = vpack.c.bf16 %v15592_v27, %v15587_v9  ;;  %v16159_v10 = vpack.c.bf16 %v15617_v17, %v15612_v48 }
  0xfa   : > { %19627 = vst [vmem:[#allocation137_spill] sm:$0xff] %v16136_v57  ;;  %v16145_v45 = vsub.f32 %v15384_v54, %v19628_v42  ;;  %v952_v54 = vsub.f32 %v16095_v7, %v18831_v55  ;;  %v16166_v46 = vpack.c.bf16 %v15635_v20, %v15630_v38  ;;  %v16170_v8 = vpack.c.bf16 %v15651_v40, %v15646_v39 }
  0xfb   : > { %19630 = vst [vmem:[#allocation139_spill] sm:$0xff] %v16155_v18  ;;  %19631 = vst [vmem:[#allocation140_spill] sm:$0xff] %v16159_v10  ;;  %v16174_v52 = vpack.c.bf16 %v15671_v53, %v15666_v62  ;;  %v16178_v59 = vpack.c.bf16 %v15724_v51, %v15688_v23  ;;  %v16182_v29 = vpack.c.bf16 %v15746_v35, %v15737_v56  ;;  %11406 = vmatpush1.bf16.msra.mxu0 %v16121_v0 }
  0xfc   : > { %19629 = vst [vmem:[#allocation138_spill] sm:$0xff] %v16145_v45  ;;  %19632 = vst [vmem:[#allocation141_spill] sm:$0xff] %v16166_v46  ;;  %v16186_v42 = vpack.c.bf16 %v15764_v6, %v15751_v63  ;;  %v16190_v55 = vpack.c.bf16 %v15776_v36, %v15771_v44  ;;  %11790 = vmatpush1.bf16.msra.mxu1 %v16121_v0  ;;  %v16197_v2 = vpack.c.bf16 %v15795_v14, %v15790_v15  ;;  %v19642_v0 = vld [vmem:[#allocation41_spill] sm:$0xff]  ;;  %v19657_v36 = vld [vmem:[#allocation64_spill] sm:$0xff] }
  0xfd   : > { %19633 = vst [vmem:[#allocation142_spill] sm:$0xff] %v16170_v8  ;;  %19634 = vst [vmem:[#allocation143_spill] sm:$0xff] %v16174_v52  ;;  %v16201_v60 = vpack.c.bf16 %v15816_v58, %v15811_v3  ;;  %v16205_v19 = vpack.c.bf16 %v15831_v33, %v15826_v47  ;;  %11408 = vmatprep.subr.bf16.mxu0 %v16123_v24  ;;  %11792 = vmatprep.subr.bf16.mxu1 %v16123_v24  ;;  %v923_v4 = vand.u32 4294901760, %v922_v34  ;;  %v19647_v14 = vld [vmem:[#allocation45_spill] sm:$0xff]  ;;  %v19648_v58 = vld [vmem:[#allocation46_spill] sm:$0xff] }
  0xfe   : > { %19635 = vst [vmem:[#allocation144_spill] sm:$0xff] %v16178_v59  ;;  %19636 = vst [vmem:[#allocation145_spill] sm:$0xff] %v16182_v29  ;;  %v16211_v61 = vpack.c.bf16 %v19642_v0, %v15853_v37  ;;  %v16215_v30 = vpack.c.bf16 %v19645_v22, %v19644_v26  ;;  %v16219_v3 = vpack.c.bf16 %v19648_v58, %v19647_v14  ;;  %v19651_v47 = vld [vmem:[#allocation50_spill] sm:$0xff]  ;;  %v19653_v34 = vld [vmem:[#allocation56_spill] sm:$0xff] }
  0xff   : > { %19637 = vst [vmem:[#allocation146_spill] sm:$0xff] %v16186_v42  ;;  %19638 = vst [vmem:[#allocation147_spill] sm:$0xff] %v16190_v55  ;;  %v16223_v33 = vpack.c.bf16 %v15948_v49, %v15943_v16  ;;  %v16227_v24 = vpack.c.bf16 %v19651_v47, %v15958_v13  ;;  %v19654_v15 = vld [vmem:[#allocation57_spill] sm:$0xff]  ;;  %v19656_v37 = vld [vmem:[#allocation60_spill] sm:$0xff]  ;;  %v16243_v49 = vpack.c.bf16 %v16035_v43, %v16025_v12  ;;  %11410 = vmatpush1.bf16.msra.mxu0 %v16126_v31 }
 0x100   : > { %19639 = vst [vmem:[#allocation148_spill] sm:$0xff] %v16197_v2  ;;  %19640 = vst [vmem:[#allocation149_spill] sm:$0xff] %v16201_v60  ;;  %v16231_v0 = vpack.c.bf16 %v19654_v15, %v19653_v34  ;;  %v16235_v22 = vpack.c.bf16 %v19657_v36, %v19656_v37  ;;  %v19659_v26 = vld [vmem:[#allocation66_spill] sm:$0xff]  ;;  %v19660_v44 = vld [vmem:[#allocation67_spill] sm:$0xff]  ;;  %v16247_v47 = vpack.c.bf16 %v16083_v5, %v16069_v21  ;;  %11794 = vmatpush1.bf16.msra.mxu1 %v16126_v31 }
 0x101   : > { %19641 = vst [vmem:[#allocation150_spill] sm:$0xff] %v16205_v19  ;;  %19643 = vst [vmem:[#allocation151_spill] sm:$0xff] %v16211_v61  ;;  %v16239_v58 = vpack.c.bf16 %v19660_v44, %v19659_v26  ;;  %v16251_v15 = vpack.c.bf16 %v16095_v7, %v16090_v50  ;;  %v935_v36 = vand.u32 4294901760, %v934_v25  ;;  %v19665_v44 = vand.u32 4294901760, %v16119_v1  ;;  %11412 = vmatprep.subr.bf16.mxu0 %v16128_v32  ;;  %v19695_v21 = vld [vmem:[#allocation99_spill] sm:$0xff]  ;;  %v19697_v34 = vld [vmem:[#allocation102_spill] sm:$0xff] }
 0x102   : > { %19646 = vst [vmem:[#allocation152_spill] sm:$0xff] %v16215_v30  ;;  %19649 = vst [vmem:[#allocation45_spill] sm:$0xff] %v16219_v3  ;;  %v19666_v43 = vand.u32 4294901760, %v16145_v45  ;;  %v16263_v5 = vpack.c.bf16 %v16145_v45, %v16119_v1  ;;  %11796 = vmatprep.subr.bf16.mxu1 %v16128_v32  ;;  %v16267_v7 = vpack.c.bf16 %v929_v11, %v917_v28  ;;  %v941_v31 = vand.u32 4294901760, %v940_v41  ;;  %v19679_v41 = vld [vmem:[#allocation76_spill] sm:$0xff]  ;;  %v19689_v32 = vld [vmem:[#allocation106_spill] sm:$0xff] }
 0x103   : > { %19650 = vst [vmem:[#allocation153_spill] sm:$0xff] %v16223_v33  ;;  %19652 = vst [vmem:[#allocation154_spill] sm:$0xff] %v16227_v24  ;;  %v946_v26 = vsub.f32 %v16119_v1, %v19665_v44  ;;  %v953_v25 = vand.u32 4294901760, %v952_v54  ;;  %11414 = vmatpush1.bf16.msra.mxu0 %v16136_v57  ;;  %v16271_v44 = vpack.c.bf16 %v935_v36, %v923_v4  ;;  %v19672_v36 = vld [vmem:[#allocation68_spill] sm:$0xff]  ;;  %v19673_v4 = vld [vmem:[#allocation70_spill] sm:$0xff] }
 0x104   : > { %19655 = vst [vmem:[#allocation155_spill] sm:$0xff] %v16231_v0  ;;  %19658 = vst [vmem:[#allocation156_spill] sm:$0xff] %v16235_v22  ;;  %v958_v12 = vsub.f32 %v16145_v45, %v19666_v43  ;;  %11798 = vmatpush1.bf16.msra.mxu1 %v16136_v57  ;;  %11416 = vmatprep.subr.bf16.mxu0 %v16267_v7  ;;  %v19698_v13 = vld [vmem:[#allocation105_spill] sm:$0xff] }
 0x105   : > { %19661 = vst [vmem:[#allocation157_spill] sm:$0xff] %v16239_v58  ;;  %19662 = vst [vmem:[#allocation158_spill] sm:$0xff] %v16243_v49  ;;  %v947_v50 = vand.u32 4294901760, %v946_v26  ;;  %11800 = vmatprep.subr.bf16.mxu1 %v16267_v7  ;;  %v16275_v45 = vpack.c.bf16 %v953_v25, %v941_v31  ;;  %v16285_v26 = vpack.c.bf16 %v19673_v4, %v19672_v36  ;;  %v19676_v31 = vld [vmem:[#allocation73_spill] sm:$0xff]  ;;  %v19681_v25 = vld [vmem:[#allocation108_spill] sm:$0xff] }
 0x106   : > { %19663 = vst [vmem:[#allocation159_spill] sm:$0xff] %v16247_v47  ;;  %19664 = vst [vmem:[#allocation160_spill] sm:$0xff] %v16251_v15  ;;  %v959_v43 = vand.u32 4294901760, %v958_v12  ;;  %v19675_v12 = vld [vmem:[#allocation72_spill] sm:$0xff]  ;;  %v16331_v16 = vpack.c.bf16 %v19698_v13, %v19697_v34 }
 0x107   : > { %19667 = vst [vmem:[#allocation161_spill] sm:$0xff] %v16263_v5  ;;  %19668 = vst [vmem:[#allocation162_spill] sm:$0xff] %v16267_v7  ;;  %11418 = vmatpush1.bf16.msra.mxu0 %v16271_v44  ;;  %v16291_v11 = vpack.c.bf16 %v19676_v31, %v19675_v12  ;;  %v19687_v7 = vld [vmem:[#allocation84_spill] sm:$0xff] }
 0x108   : > { %19669 = vst [vmem:[#allocation163_spill] sm:$0xff] %v16271_v44  ;;  %19670 = vst [vmem:[#allocation164_spill] sm:$0xff] %v16275_v45  ;;  %11802 = vmatpush1.bf16.msra.mxu1 %v16271_v44  ;;  %v16279_v28 = vpack.c.bf16 %v959_v43, %v947_v50  ;;  %11420 = vmatprep.subr.bf16.mxu0 %v16275_v45  ;;  %v19678_v50 = vld [vmem:[#allocation75_spill] sm:$0xff]  ;;  %v19682_v43 = vld [vmem:[#allocation109_spill] sm:$0xff] }
 0x109   : > { %11804 = vmatprep.subr.bf16.mxu1 %v16275_v45  ;;  %19674 = vst [vmem:[#allocation68_spill] sm:$0xff] %v16285_v26  ;;  %19677 = vst [vmem:[#allocation70_spill] sm:$0xff] %v16291_v11  ;;  %v16297_v54 = vpack.c.bf16 %v19679_v41, %v19678_v50  ;;  %v19684_v45 = vld [vmem:[#allocation78_spill] sm:$0xff] }
 0x10a   : > { %19671 = vst [vmem:[#allocation165_spill] sm:$0xff] %v16279_v28  ;;  %19699 = vst [vmem:[#allocation78_spill] sm:$0xff] %v16331_v16 }
 0x10b   : > { %11422 = vmatpush1.bf16.msra.mxu0 %v16279_v28  ;;  %19680 = vst [vmem:[#allocation72_spill] sm:$0xff] %v16297_v54 }
 0x10c   : > { %11806 = vmatpush1.bf16.msra.mxu1 %v16279_v28  ;;  %11424 = vmatprep.subr.bf16.mxu0 %v16285_v26  ;;  %v19683_v28 = vld [vmem:[#allocation77_spill] sm:$0xff] }
 0x10d   : > { %11808 = vmatprep.subr.bf16.mxu1 %v16285_v26  ;;  %v16305_v44 = vpack.c.bf16 %v19684_v45, %v19683_v28  ;;  %v19686_v26 = vld [vmem:[#allocation83_spill] sm:$0xff] }
 0x10e   : > { %964 = vmatmul.mubr.f32.vlgmr.msra.gmra.mrb[0].mxu0 %v19681_v25  ;;  %v16311_v57 = vpack.c.bf16 %v19687_v7, %v19686_v26  ;;  %v19690_v25 = vld [vmem:[#allocation107_spill] sm:$0xff] }
 0x10f   : > { %2300 = vmatmul.mubr.f32.vlgmr.msra.gmra.mrb[0].mxu1 %v19682_v43  ;;  %11426 = vmatpush1.bf16.msra.mxu0 %v16291_v11  ;;  %19685 = vst [vmem:[#allocation73_spill] sm:$0xff] %v16305_v44  ;;  %v19692_v43 = vld [vmem:[#allocation87_spill] sm:$0xff] }
 0x110   : > { %11810 = vmatpush1.bf16.msra.mxu1 %v16291_v11  ;;  %11428 = vmatprep.subr.bf16.mxu0 %v16297_v54  ;;  %19688 = vst [vmem:[#allocation75_spill] sm:$0xff] %v16311_v57  ;;  %v19691_v11 = vld [vmem:[#allocation85_spill] sm:$0xff] }
 0x111   : > { %11812 = vmatprep.subr.bf16.mxu1 %v16297_v54  ;;  %1164 = vmatprep.mubr.f32.mxu0 %v19689_v32  ;;  %v16319_v1 = vpack.c.bf16 %v19692_v43, %v19691_v11  ;;  %v19694_v54 = vld [vmem:[#allocation95_spill] sm:$0xff] }
 0x112   : > { %2500 = vmatprep.mubr.f32.mxu1 %v19690_v25  ;;  %v16325_v37 = vpack.c.bf16 %v19695_v21, %v19694_v54 }
 0x113   : > { %11430 = vmatpush1.bf16.msra.mxu0 %v16305_v44  ;;  %19693 = vst [vmem:[#allocation76_spill] sm:$0xff] %v16319_v1 }
 0x114   : > { %11814 = vmatpush1.bf16.msra.mxu1 %v16305_v44  ;;  %11432 = vmatprep.subr.bf16.mxu0 %v16311_v57  ;;  %19696 = vst [vmem:[#allocation77_spill] sm:$0xff] %v16325_v37  ;;  %v19732_v44 = vld [vmem:[#allocation82_spill] sm:$0xff] }
 0x115   : > { %11816 = vmatprep.subr.bf16.mxu1 %v16311_v57  ;;  %v19731_v57 = vld [vmem:[#allocation81_spill] sm:$0xff] }
 0x117   : > { %11434 = vmatpush1.bf16.msra.mxu0 %v16319_v1 }
 0x118   : > { %11818 = vmatpush1.bf16.msra.mxu1 %v16319_v1  ;;  %11436 = vmatprep.subr.bf16.mxu0 %v16325_v37  ;;  %v19730_v1 = vld [vmem:[#allocation80_spill] sm:$0xff] }
 0x119   : > { %11820 = vmatprep.subr.bf16.mxu1 %v16325_v37  ;;  %v19729_v37 = vld [vmem:[#allocation79_spill] sm:$0xff] }
 0x11b   : > { %11438 = vmatpush1.bf16.msra.mxu0 %v16331_v16 }
 0x11c   : > { %11822 = vmatpush1.bf16.msra.mxu1 %v16331_v16  ;;  %11440 = vmatprep.subr.bf16.mxu0 %v16155_v18  ;;  %v19728_v16 = vld [vmem:[#allocation71_spill] sm:$0xff] }
 0x11d   : > { %11824 = vmatprep.subr.bf16.mxu1 %v16155_v18  ;;  %v19727_v18 = vld [vmem:[#allocation65_spill] sm:$0xff] }
 0x11f   : > { %11442 = vmatpush1.bf16.msra.mxu0 %v16159_v10 }
 0x120   : > { %11826 = vmatpush1.bf16.msra.mxu1 %v16159_v10  ;;  %11444 = vmatprep.subr.bf16.mxu0 %v16166_v46  ;;  %v19726_v10 = vld [vmem:[#allocation63_spill] sm:$0xff] }
 0x121   : > { %11828 = vmatprep.subr.bf16.mxu1 %v16166_v46  ;;  %v19725_v46 = vld [vmem:[#allocation62_spill] sm:$0xff] }
 0x123   : > { %11446 = vmatpush1.bf16.msra.mxu0 %v16170_v8 }
 0x124   : > { %11830 = vmatpush1.bf16.msra.mxu1 %v16170_v8  ;;  %11448 = vmatprep.subr.bf16.mxu0 %v16174_v52  ;;  %v19724_v8 = vld [vmem:[#allocation61_spill] sm:$0xff] }
 0x125   : > { %11832 = vmatprep.subr.bf16.mxu1 %v16174_v52  ;;  %v19723_v52 = vld [vmem:[#allocation59_spill] sm:$0xff] }
 0x127   : > { %11450 = vmatpush1.bf16.msra.mxu0 %v16178_v59 }
 0x128   : > { %11834 = vmatpush1.bf16.msra.mxu1 %v16178_v59  ;;  %11452 = vmatprep.subr.bf16.mxu0 %v16182_v29  ;;  %v19722_v59 = vld [vmem:[#allocation58_spill] sm:$0xff] }
 0x129   : > { %11836 = vmatprep.subr.bf16.mxu1 %v16182_v29  ;;  %v19721_v29 = vld [vmem:[#allocation55_spill] sm:$0xff] }
 0x12b   : > { %11454 = vmatpush1.bf16.msra.mxu0 %v16186_v42 }
 0x12c   : > { %11838 = vmatpush1.bf16.msra.mxu1 %v16186_v42  ;;  %11456 = vmatprep.subr.bf16.mxu0 %v16190_v55  ;;  %v19720_v42 = vld [vmem:[#allocation54_spill] sm:$0xff] }
 0x12d   : > { %11840 = vmatprep.subr.bf16.mxu1 %v16190_v55  ;;  %v19719_v55 = vld [vmem:[#allocation53_spill] sm:$0xff] }
 0x12f   : > { %11458 = vmatpush1.bf16.msra.mxu0 %v16197_v2 }
 0x130   : > { %11842 = vmatpush1.bf16.msra.mxu1 %v16197_v2  ;;  %11460 = vmatprep.subr.bf16.mxu0 %v16201_v60  ;;  %v19718_v2 = vld [vmem:[#allocation52_spill] sm:$0xff] }
 0x131   : > { %11844 = vmatprep.subr.bf16.mxu1 %v16201_v60  ;;  %v19717_v60 = vld [vmem:[#allocation51_spill] sm:$0xff] }
 0x133   : > { %11462 = vmatpush1.bf16.msra.mxu0 %v16205_v19 }
 0x134   : > { %11846 = vmatpush1.bf16.msra.mxu1 %v16205_v19  ;;  %11464 = vmatprep.subr.bf16.mxu0 %v16211_v61  ;;  %v19716_v19 = vld [vmem:[#allocation43_spill] sm:$0xff] }
 0x135   : > { %11848 = vmatprep.subr.bf16.mxu1 %v16211_v61  ;;  %v19715_v61 = vld [vmem:[#allocation39_spill] sm:$0xff] }
 0x137   : > { %11466 = vmatpush1.bf16.msra.mxu0 %v16215_v30 }
 0x138   : > { %11850 = vmatpush1.bf16.msra.mxu1 %v16215_v30  ;;  %11468 = vmatprep.subr.bf16.mxu0 %v16219_v3  ;;  %v19710_v30 = vld [vmem:[#allocation23_spill] sm:$0xff] }
 0x139   : > { %11852 = vmatprep.subr.bf16.mxu1 %v16219_v3  ;;  %v19709_v3 = vld [vmem:[#allocation22_spill] sm:$0xff] }
 0x13b   : > { %11470 = vmatpush1.bf16.msra.mxu0 %v16223_v33 }
 0x13c   : > { %11854 = vmatpush1.bf16.msra.mxu1 %v16223_v33  ;;  %11472 = vmatprep.subr.bf16.mxu0 %v16227_v24  ;;  %v19708_v33 = vld [vmem:[#allocation21_spill] sm:$0xff] }
 0x13d   : > { %11856 = vmatprep.subr.bf16.mxu1 %v16227_v24  ;;  %v19707_v24 = vld [vmem:[#allocation20_spill] sm:$0xff] }
 0x13f   : > { %11474 = vmatpush1.bf16.msra.mxu0 %v16231_v0 }
 0x140   : > { %11858 = vmatpush1.bf16.msra.mxu1 %v16231_v0  ;;  %11476 = vmatprep.subr.bf16.mxu0 %v16235_v22  ;;  %v19702_v0 = vld [vmem:[#allocation111_spill] sm:$0xff] }
 0x141   : > { %11860 = vmatprep.subr.bf16.mxu1 %v16235_v22  ;;  %v19700_v22 = vld [vmem:[#allocation17_spill] sm:$0xff] }
 0x143   : > { %11478 = vmatpush1.bf16.msra.mxu0 %v16239_v58 }
 0x144   : > { %11862 = vmatpush1.bf16.msra.mxu1 %v16239_v58  ;;  %11480 = vmatprep.subr.bf16.mxu0 %v16243_v49  ;;  %v19701_v58 = vld [vmem:[#allocation110_spill] sm:$0xff] }
 0x145   : > { %11864 = vmatprep.subr.bf16.mxu1 %v16243_v49  ;;  %v19703_v49 = vld [vmem:[#allocation18_spill] sm:$0xff] }
 0x147   : > { %11482 = vmatpush1.bf16.msra.mxu0 %v16247_v47 }
 0x148   : > { %11866 = vmatpush1.bf16.msra.mxu1 %v16247_v47  ;;  %11484 = vmatprep.subr.bf16.mxu0 %v16251_v15  ;;  %v19704_v47 = vld [vmem:[#allocation19_spill] sm:$0xff] }
 0x149   : > { %11868 = vmatprep.subr.bf16.mxu1 %v16251_v15  ;;  %v19705_v15 = vand.u32 4294901760, %v19689_v32  ;;  %v19713_v32 = vld [vmem:[#allocation34_spill] sm:$0xff] }
 0x14b   : > { %11486 = vmatpush1.bf16.msra.mxu0 %v16263_v5 }
 0x14c   : > { %11870 = vmatpush1.bf16.msra.mxu1 %v16263_v5  ;;  %11488 = vmatprep.subr.bf16.mxu0 %v19700_v22  ;;  %v19706_v5 = vand.u32 4294901760, %v19690_v25  ;;  %v19714_v25 = vld [vmem:[#allocation35_spill] sm:$0xff] }
 0x14d   : > { %11872 = vmatprep.subr.bf16.mxu1 %v19700_v22 }
 0x14e   : > { %1167 = vmatmul.mubr.f32.vlgmr.msra.gmra.mrb[0].mxu0 %v19701_v58 }
 0x14f   : > { %2503 = vmatmul.mubr.f32.vlgmr.msra.gmra.mrb[0].mxu1 %v19702_v0  ;;  %11490 = vmatpush1.bf16.msra.mxu0 %v19703_v49 }
 0x150   : > { %11874 = vmatpush1.bf16.msra.mxu1 %v19703_v49  ;;  %11492 = vmatprep.subr.bf16.mxu0 %v19704_v47 }
 0x151   : > { %11876 = vmatprep.subr.bf16.mxu1 %v19704_v47  ;;  %1304 = vmatprep.mubr.f32.mxu0 %v19705_v15  ;;  %v19711_v15 = vld [vmem:[#allocation29_spill] sm:$0xff] }
 0x152   : > { %2640 = vmatprep.mubr.f32.mxu1 %v19706_v5  ;;  %v19712_v5 = vld [vmem:[#allocation30_spill] sm:$0xff] }
 0x153   : > { %11494 = vmatpush1.bf16.msra.mxu0 %v19707_v24 }
 0x154   : > { %11878 = vmatpush1.bf16.msra.mxu1 %v19707_v24  ;;  %11496 = vmatprep.subr.bf16.mxu0 %v19708_v33 }
 0x155   : > { %11880 = vmatprep.subr.bf16.mxu1 %v19708_v33 }
 0x157   : > { %11498 = vmatpush1.bf16.msra.mxu0 %v19709_v3 }
 0x158   : > { %11882 = vmatpush1.bf16.msra.mxu1 %v19709_v3  ;;  %11500 = vmatprep.subr.bf16.mxu0 %v19710_v30 }
 0x159   : > { %11884 = vmatprep.subr.bf16.mxu1 %v19710_v30 }
 0x15b   : > { %11502 = vmatpush1.bf16.msra.mxu0 %v19711_v15 }
 0x15c   : > { %11886 = vmatpush1.bf16.msra.mxu1 %v19711_v15  ;;  %11504 = vmatprep.subr.bf16.mxu0 %v19712_v5 }
 0x15d   : > { %11888 = vmatprep.subr.bf16.mxu1 %v19712_v5 }
 0x15f   : > { %11506 = vmatpush1.bf16.msra.mxu0 %v19713_v32 }
 0x160   : > { %11890 = vmatpush1.bf16.msra.mxu1 %v19713_v32  ;;  %11508 = vmatprep.subr.bf16.mxu0 %v19714_v25 }
 0x161   : > { %11892 = vmatprep.subr.bf16.mxu1 %v19714_v25 }
 0x163   : > { %11510 = vmatpush1.bf16.msra.mxu0 %v19715_v61 }
 0x164   : > { %11894 = vmatpush1.bf16.msra.mxu1 %v19715_v61  ;;  %11512 = vmatprep.subr.bf16.mxu0 %v19716_v19 }
 0x165   : > { %11896 = vmatprep.subr.bf16.mxu1 %v19716_v19 }
 0x167   : > { %11514 = vmatpush1.bf16.msra.mxu0 %v19717_v60 }
 0x168   : > { %11898 = vmatpush1.bf16.msra.mxu1 %v19717_v60  ;;  %11516 = vmatprep.subr.bf16.mxu0 %v19718_v2 }
 0x169   : > { %11900 = vmatprep.subr.bf16.mxu1 %v19718_v2 }
 0x16b   : > { %11518 = vmatpush1.bf16.msra.mxu0 %v19719_v55 }
 0x16c   : > { %11902 = vmatpush1.bf16.msra.mxu1 %v19719_v55  ;;  %11520 = vmatprep.subr.bf16.mxu0 %v19720_v42 }
 0x16d   : > { %11904 = vmatprep.subr.bf16.mxu1 %v19720_v42 }
 0x16f   : > { %11522 = vmatpush1.bf16.msra.mxu0 %v19721_v29 }
 0x170   : > { %11906 = vmatpush1.bf16.msra.mxu1 %v19721_v29  ;;  %11524 = vmatprep.subr.bf16.mxu0 %v19722_v59 }
 0x171   : > { %11908 = vmatprep.subr.bf16.mxu1 %v19722_v59 }
 0x173   : > { %11526 = vmatpush1.bf16.msra.mxu0 %v19723_v52 }
 0x174   : > { %11910 = vmatpush1.bf16.msra.mxu1 %v19723_v52  ;;  %11528 = vmatprep.subr.bf16.mxu0 %v19724_v8 }
 0x175   : > { %11912 = vmatprep.subr.bf16.mxu1 %v19724_v8 }
 0x177   : > { %11530 = vmatpush1.bf16.msra.mxu0 %v19725_v46 }
 0x178   : > { %11914 = vmatpush1.bf16.msra.mxu1 %v19725_v46  ;;  %11532 = vmatprep.subr.bf16.mxu0 %v19726_v10  ;;  %v19738_v46 = vld [vmem:[#allocation89_spill] sm:$0xff] }
 0x179   : > { %11916 = vmatprep.subr.bf16.mxu1 %v19726_v10 }
 0x17b   : > { %11534 = vmatpush1.bf16.msra.mxu0 %v19727_v18 }
 0x17c   : > { %11918 = vmatpush1.bf16.msra.mxu1 %v19727_v18  ;;  %11536 = vmatprep.subr.bf16.mxu0 %v19728_v16  ;;  %v19733_v18 = vld [vmem:[#allocation86_spill] sm:$0xff] }
 0x17d   : > { %11920 = vmatprep.subr.bf16.mxu1 %v19728_v16  ;;  %v19734_v16 = vld [vmem:[#allocation88_spill] sm:$0xff] }
 0x17f   : > { %11538 = vmatpush1.bf16.msra.mxu0 %v19729_v37 }
 0x180   : > { %11922 = vmatpush1.bf16.msra.mxu1 %v19729_v37  ;;  %11540 = vmatprep.subr.bf16.mxu0 %v19730_v1  ;;  %v19735_v37 = vand.u32 4294901760, %v19672_v36  ;;  %v19742_v36 = vand.u32 4294901760, %v19678_v50  ;;  %v19754_v50 = vld [vmem:[#allocation104_spill] sm:$0xff] }
 0x181   : > { %11924 = vmatprep.subr.bf16.mxu1 %v19730_v1  ;;  %v19736_v1 = vand.u32 4294901760, %v19673_v4  ;;  %v19743_v4 = vand.u32 4294901760, %v19679_v41 }
 0x183   : > { %11542 = vmatpush1.bf16.msra.mxu0 %v19731_v57  ;;  %v16457_v10 = vpack.c.bf16 %v19736_v1, %v19735_v37  ;;  %v16473_v37 = vpack.c.bf16 %v19743_v4, %v19742_v36  ;;  %v19745_v1 = vand.u32 4294901760, %v19701_v58  ;;  %v19750_v58 = vand.u32 4294901760, %v19686_v26 }
 0x184   : > { %11926 = vmatpush1.bf16.msra.mxu1 %v19731_v57  ;;  %11544 = vmatprep.subr.bf16.mxu0 %v19732_v44  ;;  %v19740_v57 = vand.u32 4294901760, %v19676_v31  ;;  %v19751_v31 = vand.u32 4294901760, %v19687_v7  ;;  %v19758_v7 = vand.u32 4294901760, %v19694_v54  ;;  %v19759_v26 = vand.u32 4294901760, %v19695_v21 }
 0x185   : > { %11928 = vmatprep.subr.bf16.mxu1 %v19732_v44  ;;  %19737 = vst [vmem:[#allocation83_spill] sm:$0xff] %v16457_v10  ;;  %v19739_v44 = vand.u32 4294901760, %v19675_v12  ;;  %19744 = vst [vmem:[#allocation106_spill] sm:$0xff] %v16473_v37  ;;  %v19764_v54 = vand.u32 4294901760, %v15587_v9  ;;  %v19765_v21 = vand.u32 4294901760, %v15592_v27  ;;  %v19770_v9 = vand.u32 4294901760, %v15630_v38 }
 0x186   : > { %v16511_v36 = vpack.c.bf16 %v19759_v26, %v19758_v7  ;;  %v19771_v27 = vand.u32 4294901760, %v15635_v20  ;;  %v19776_v38 = vand.u32 4294901760, %v15666_v62  ;;  %v19777_v20 = vand.u32 4294901760, %v15671_v53  ;;  %v19788_v26 = vld [vmem:[#allocation26_spill] sm:$0xff] }
 0x187   : > { %11546 = vmatpush1.bf16.msra.mxu0 %v19733_v18  ;;  %v16465_v8 = vpack.c.bf16 %v19740_v57, %v19739_v44  ;;  %v19747_v57 = vand.u32 4294901760, %v19683_v28  ;;  %v19748_v44 = vand.u32 4294901760, %v19684_v45  ;;  %v19755_v45 = vand.u32 4294901760, %v19691_v11 }
 0x188   : > { %11930 = vmatpush1.bf16.msra.mxu1 %v19733_v18  ;;  %11548 = vmatprep.subr.bf16.mxu0 %v19734_v16  ;;  %v19756_v28 = vand.u32 4294901760, %v19692_v43  ;;  %19760 = vst [vmem:[#allocation95_spill] sm:$0xff] %v16511_v36  ;;  %v19761_v11 = vand.u32 4294901760, %v19697_v34  ;;  %v19762_v43 = vand.u32 4294901760, %v19698_v13  ;;  %v19767_v34 = vand.u32 4294901760, %v15612_v48 }
 0x189   : > { %11932 = vmatprep.subr.bf16.mxu1 %v19734_v16  ;;  %19741 = vst [vmem:[#allocation84_spill] sm:$0xff] %v16465_v8  ;;  %v16485_v12 = vpack.c.bf16 %v19748_v44, %v19747_v57  ;;  %v19768_v13 = vand.u32 4294901760, %v15617_v17  ;;  %v16543_v44 = vpack.c.bf16 %v19771_v27, %v19770_v9  ;;  %v19773_v48 = vand.u32 4294901760, %v15646_v39  ;;  %v19800_v27 = vld [vmem:[#allocation36_spill] sm:$0xff] }
 0x18a   : > { %v16503_v41 = vpack.c.bf16 %v19756_v28, %v19755_v45  ;;  %v16519_v4 = vpack.c.bf16 %v19762_v43, %v19761_v11  ;;  %v19774_v17 = vand.u32 4294901760, %v15651_v40  ;;  %v19779_v39 = vand.u32 4294901760, %v15688_v23  ;;  %v19790_v11 = vld [vmem:[#allocation27_spill] sm:$0xff] }
 0x18b   : > { %11550 = vmatpush1.bf16.msra.mxu0 %v19738_v46  ;;  %19749 = vst [vmem:[#allocation107_spill] sm:$0xff] %v16485_v12  ;;  %v16535_v57 = vpack.c.bf16 %v19768_v13, %v19767_v34  ;;  %19772 = vst [vmem:[#allocation17_spill] sm:$0xff] %v16543_v44  ;;  %v19780_v40 = vand.u32 4294901760, %v15724_v51  ;;  %v19782_v62 = vand.u32 4294901760, %v15737_v56  ;;  %v19783_v53 = vand.u32 4294901760, %v15746_v35  ;;  %v19798_v13 = vld [vmem:[#allocation33_spill] sm:$0xff] }
 0x18c   : > { %11934 = vmatpush1.bf16.msra.mxu1 %v19738_v46  ;;  %11552 = vmatprep.subr.bf16.mxu0 %v16457_v10  ;;  %v19746_v46 = vand.u32 4294901760, %v19702_v0  ;;  %v16493_v0 = vpack.c.bf16 %v19751_v31, %v19750_v58  ;;  %19757 = vst [vmem:[#allocation87_spill] sm:$0xff] %v16503_v41  ;;  %19763 = vst [vmem:[#allocation99_spill] sm:$0xff] %v16519_v4  ;;  %v16551_v58 = vpack.c.bf16 %v19774_v17, %v19773_v48 }
 0x18d   : > { %11936 = vmatprep.subr.bf16.mxu1 %v16457_v10  ;;  %19769 = vst [vmem:[#allocation105_spill] sm:$0xff] %v16535_v57  ;;  %v16559_v31 = vpack.c.bf16 %v19777_v20, %v19776_v38  ;;  %v16567_v45 = vpack.c.bf16 %v19780_v40, %v19779_v39  ;;  %v16575_v28 = vpack.c.bf16 %v19783_v53, %v19782_v62  ;;  %v19785_v23 = vand.u32 4294901760, %v15751_v63  ;;  %v19803_v38 = vld [vmem:[#allocation37_spill] sm:$0xff]  ;;  %v19805_v39 = vld [vmem:[#allocation38_spill] sm:$0xff]  ;;  %v19808_v53 = vld [vmem:[#allocation40_spill] sm:$0xff] }
 0x18e   : > { %1308 = vmatmul.mubr.f32.vlgmr.msra.gmra.mrb[0].mxu0 %v19745_v1  ;;  %19752 = vst [vmem:[#allocation85_spill] sm:$0xff] %v16493_v0  ;;  %v16527_v1 = vpack.c.bf16 %v19765_v21, %v19764_v54  ;;  %19775 = vst [vmem:[#allocation110_spill] sm:$0xff] %v16551_v58  ;;  %v19786_v51 = vand.u32 4294901760, %v15764_v6  ;;  %v19789_v56 = vand.u32 4294901760, %v19788_v26  ;;  %v19791_v35 = vand.u32 4294901760, %v19790_v11  ;;  %v19793_v54 = vld [vmem:[#allocation31_spill] sm:$0xff] }
 0x18f   : > { %2644 = vmatmul.mubr.f32.vlgmr.msra.gmra.mrb[0].mxu1 %v19746_v46  ;;  %11554 = vmatpush1.bf16.msra.mxu0 %v16465_v8  ;;  %v19753_v46 = vld [vmem:[#allocation103_spill] sm:$0xff]  ;;  %19778 = vst [vmem:[#allocation111_spill] sm:$0xff] %v16559_v31  ;;  %19781 = vst [vmem:[#allocation18_spill] sm:$0xff] %v16567_v45  ;;  %v19794_v63 = vand.u32 4294901760, %v19793_v54  ;;  %v19795_v21 = vld [vmem:[#allocation32_spill] sm:$0xff]  ;;  %v19799_v9 = vand.u32 4294901760, %v19798_v13  ;;  %v401_v10 = vstv %s17043_s27 }
 0x190   : > { %11938 = vmatpush1.bf16.msra.mxu1 %v16465_v8  ;;  %11556 = vmatprep.subr.bf16.mxu0 %v16473_v37  ;;  %19766 = vst [vmem:[#allocation102_spill] sm:$0xff] %v16527_v1  ;;  %19784 = vst [vmem:[#allocation19_spill] sm:$0xff] %v16575_v28  ;;  %v16583_v7 = vpack.c.bf16 %v19786_v51, %v19785_v23  ;;  %v16591_v43 = vpack.c.bf16 %v19791_v35, %v19789_v56  ;;  %v19796_v6 = vand.u32 4294901760, %v19795_v21  ;;  %v19810_v51 = vld [vmem:[#allocation41_spill] sm:$0xff]  ;;  %v19813_v11 = vld [vmem:[#allocation42_spill] sm:$0xff]  ;;  %s17601_s27 = sld [smem:[#allocation10 + $0x102]] }
 0x191   : > { %11940 = vmatprep.subr.bf16.mxu1 %v16473_v37  ;;  %1571 = vmatprep.mubr.f32.mxu0 %v19753_v46  ;;  %v19801_v48 = vand.u32 4294901760, %v19800_v27  ;;  %v19804_v20 = vand.u32 4294901760, %v19803_v38  ;;  %v19806_v40 = vand.u32 4294901760, %v19805_v39  ;;  %v19809_v23 = vand.u32 4294901760, %v19808_v53  ;;  %v19815_v54 = vld [vmem:[#allocation44_spill] sm:$0xff]  ;;  %v19819_v13 = vld [vmem:[#allocation46_spill] sm:$0xff] }
 0x192   : > { %2907 = vmatprep.mubr.f32.mxu1 %v19754_v50  ;;  %19787 = vst [vmem:[#allocation20_spill] sm:$0xff] %v16583_v7  ;;  %19792 = vst [vmem:[#allocation21_spill] sm:$0xff] %v16591_v43  ;;  %v16599_v34 = vpack.c.bf16 %v19796_v6, %v19794_v63  ;;  %v19811_v26 = vand.u32 4294901760, %v19810_v51  ;;  %v19814_v35 = vand.u32 4294901760, %v19813_v11  ;;  %v19816_v63 = vand.u32 4294901760, %v19815_v54  ;;  %v19827_v53 = vld [vmem:[#allocation49_spill] sm:$0xff] }
 0x193   : > { %11558 = vmatpush1.bf16.msra.mxu0 %v16485_v12  ;;  %v16607_v17 = vpack.c.bf16 %v19801_v48, %v19799_v9  ;;  %v16615_v62 = vpack.c.bf16 %v19806_v40, %v19804_v20  ;;  %v19818_v6 = vand.u32 4294901760, %v19647_v14  ;;  %v19820_v9 = vand.u32 4294901760, %v19819_v13  ;;  %v19822_v48 = vld [vmem:[#allocation47_spill] sm:$0xff]  ;;  %v19824_v20 = vld [vmem:[#allocation48_spill] sm:$0xff]  ;;  %v19834_v54 = vld [vmem:[#allocation57_spill] sm:$0xff] }
 0x194   : > { %11942 = vmatpush1.bf16.msra.mxu1 %v16485_v12  ;;  %11560 = vmatprep.subr.bf16.mxu0 %v16493_v0  ;;  %19797 = vst [vmem:[#allocation22_spill] sm:$0xff] %v16599_v34  ;;  %v16623_v56 = vpack.c.bf16 %v19811_v26, %v19809_v23  ;;  %v16631_v21 = vpack.c.bf16 %v19816_v63, %v19814_v35  ;;  %v19823_v38 = vand.u32 4294901760, %v19822_v48  ;;  %v19825_v39 = vand.u32 4294901760, %v19824_v20  ;;  %v19829_v23 = vld [vmem:[#allocation50_spill] sm:$0xff]  ;;  %v19832_v11 = vld [vmem:[#allocation56_spill] sm:$0xff]  ;;  %v19952_v12 = vld [vmem:[#allocation157_spill] sm:$0xff] }
 0x195   : > { %11944 = vmatprep.subr.bf16.mxu1 %v16493_v0  ;;  %19802 = vst [vmem:[#allocation23_spill] sm:$0xff] %v16607_v17  ;;  %19807 = vst [vmem:[#allocation29_spill] sm:$0xff] %v16615_v62  ;;  %v16639_v27 = vpack.c.bf16 %v19820_v9, %v19818_v6  ;;  %v19828_v14 = vand.u32 4294901760, %v19827_v53  ;;  %v19830_v51 = vand.u32 4294901760, %v19829_v23  ;;  %v19833_v35 = vand.u32 4294901760, %v19832_v11  ;;  %v19837_v13 = vld [vmem:[#allocation60_spill] sm:$0xff] }
 0x196   : > { %19812 = vst [vmem:[#allocation30_spill] sm:$0xff] %v16623_v56  ;;  %19817 = vst [vmem:[#allocation34_spill] sm:$0xff] %v16631_v21  ;;  %v16647_v40 = vpack.c.bf16 %v19825_v39, %v19823_v38  ;;  %v19835_v63 = vand.u32 4294901760, %v19834_v54  ;;  %v19838_v9 = vand.u32 4294901760, %v19837_v13  ;;  %v19839_v48 = vld [vmem:[#allocation64_spill] sm:$0xff]  ;;  %v19842_v39 = vld [vmem:[#allocation66_spill] sm:$0xff] }
 0x197   : > { %11562 = vmatpush1.bf16.msra.mxu0 %v16503_v41  ;;  %19821 = vst [vmem:[#allocation35_spill] sm:$0xff] %v16639_v27  ;;  %v16655_v26 = vpack.c.bf16 %v19830_v51, %v19828_v14  ;;  %v19840_v38 = vand.u32 4294901760, %v19839_v48  ;;  %v19843_v53 = vand.u32 4294901760, %v19842_v39  ;;  %v19844_v14 = vld [vmem:[#allocation67_spill] sm:$0xff]  ;;  %v19847_v11 = vld [vmem:[#allocation69_spill] sm:$0xff]  ;;  %v19849_v54 = vld [vmem:[#allocation74_spill] sm:$0xff] }
 0x198   : > { %11946 = vmatpush1.bf16.msra.mxu1 %v16503_v41  ;;  %11564 = vmatprep.subr.bf16.mxu0 %v16511_v36  ;;  %19826 = vst [vmem:[#allocation39_spill] sm:$0xff] %v16647_v40  ;;  %v16663_v6 = vpack.c.bf16 %v19835_v63, %v19833_v35  ;;  %v19845_v23 = vand.u32 4294901760, %v19844_v14  ;;  %v19848_v35 = vand.u32 4294901760, %v19847_v11  ;;  %v19850_v63 = vand.u32 4294901760, %v19849_v54  ;;  %v19857_v14 = vld [vmem:[#allocation129_spill] sm:$0xff]  ;;  %v19859_v11 = vld [vmem:[#allocation130_spill] sm:$0xff] }
 0x199   : > { %11948 = vmatprep.subr.bf16.mxu1 %v16511_v36  ;;  %19831 = vst [vmem:[#allocation43_spill] sm:$0xff] %v16655_v26  ;;  %v16671_v20 = vpack.c.bf16 %v19840_v38, %v19838_v9  ;;  %v19852_v9 = vld [vmem:[#allocation127_spill] sm:$0xff]  ;;  %v19854_v38 = vld [vmem:[#allocation128_spill] sm:$0xff]  ;;  %v19860_v54 = vand.u32 4294901760, %v19859_v11  ;;  %v1731_v41 = vstv %s17035_s14  ;;  %v19954_v8 = vld [vmem:[#allocation158_spill] sm:$0xff]  ;;  %s17597_s14 = sld [smem:[#allocation10 + $0x83]] }
 0x19a   : > { %19836 = vst [vmem:[#allocation51_spill] sm:$0xff] %v16663_v6  ;;  %v16679_v51 = vpack.c.bf16 %v19845_v23, %v19843_v53  ;;  %v16687_v13 = vpack.c.bf16 %v19850_v63, %v19848_v35  ;;  %v19853_v48 = vand.u32 4294901760, %v19852_v9  ;;  %v19855_v39 = vand.u32 4294901760, %v19854_v38  ;;  %v19862_v63 = vld [vmem:[#allocation132_spill] sm:$0xff] }
 0x19b   : > { %11566 = vmatpush1.bf16.msra.mxu0 %v16519_v4  ;;  %19841 = vst [vmem:[#allocation52_spill] sm:$0xff] %v16671_v20  ;;  %v19858_v23 = vand.u32 4294901760, %v19857_v14  ;;  %v19863_v9 = vand.u32 4294901760, %v19862_v63  ;;  %v19868_v14 = vld [vmem:[#allocation109_spill] sm:$0xff]  ;;  %v19875_v63 = vld [vmem:[#allocation63_spill] sm:$0xff] }
 0x19c   : > { %11950 = vmatpush1.bf16.msra.mxu1 %v16519_v4  ;;  %11568 = vmatprep.subr.bf16.mxu0 %v16527_v1  ;;  %19846 = vst [vmem:[#allocation53_spill] sm:$0xff] %v16679_v51  ;;  %19851 = vst [vmem:[#allocation54_spill] sm:$0xff] %v16687_v13  ;;  %v16695_v53 = vpack.c.bf16 %v19855_v39, %v19853_v48  ;;  %v19867_v39 = vld [vmem:[#allocation108_spill] sm:$0xff] }
 0x19d   : > { %11952 = vmatprep.subr.bf16.mxu1 %v16527_v1  ;;  %v16703_v35 = vpack.c.bf16 %v19860_v54, %v19858_v23  ;;  %v19874_v54 = vld [vmem:[#allocation62_spill] sm:$0xff]  ;;  %v395_v1 = vstv %s17033_s13  ;;  %s17595_s13 = sld [smem:[#allocation10 + $0x3]] }
 0x19e   : > { %19856 = vst [vmem:[#allocation55_spill] sm:$0xff] %v16695_v53 }
 0x19f   : > { %11570 = vmatpush1.bf16.msra.mxu0 %v16535_v57  ;;  %19861 = vst [vmem:[#allocation58_spill] sm:$0xff] %v16703_v35 }
 0x1a0   : > { %11954 = vmatpush1.bf16.msra.mxu1 %v16535_v57  ;;  %11572 = vmatprep.subr.bf16.mxu0 %v16543_v44 }
 0x1a1   : > { %11956 = vmatprep.subr.bf16.mxu1 %v16543_v44  ;;  %v19890_v44 = vld [vmem:[#allocation90_spill] sm:$0xff] }
 0x1a3   : > { %11574 = vmatpush1.bf16.msra.mxu0 %v16551_v58 }
 0x1a4   : > { %11958 = vmatpush1.bf16.msra.mxu1 %v16551_v58  ;;  %11576 = vmatprep.subr.bf16.mxu0 %v16559_v31 }
 0x1a5   : > { %11960 = vmatprep.subr.bf16.mxu1 %v16559_v31 }
 0x1a7   : > { %11578 = vmatpush1.bf16.msra.mxu0 %v16567_v45 }
 0x1a8   : > { %11962 = vmatpush1.bf16.msra.mxu1 %v16567_v45  ;;  %11580 = vmatprep.subr.bf16.mxu0 %v16575_v28 }
 0x1a9   : > { %11964 = vmatprep.subr.bf16.mxu1 %v16575_v28 }
 0x1ab   : > { %11582 = vmatpush1.bf16.msra.mxu0 %v16583_v7 }
 0x1ac   : > { %11966 = vmatpush1.bf16.msra.mxu1 %v16583_v7  ;;  %11584 = vmatprep.subr.bf16.mxu0 %v16591_v43 }
 0x1ad   : > { %11968 = vmatprep.subr.bf16.mxu1 %v16591_v43 }
 0x1af   : > { %11586 = vmatpush1.bf16.msra.mxu0 %v16599_v34 }
 0x1b0   : > { %11970 = vmatpush1.bf16.msra.mxu1 %v16599_v34  ;;  %11588 = vmatprep.subr.bf16.mxu0 %v16607_v17 }
 0x1b1   : > { %11972 = vmatprep.subr.bf16.mxu1 %v16607_v17  ;;  %v19884_v17 = vld [vmem:[#allocation89_spill] sm:$0xff] }
 0x1b3   : > { %11590 = vmatpush1.bf16.msra.mxu0 %v16615_v62 }
 0x1b4   : > { %11974 = vmatpush1.bf16.msra.mxu1 %v16615_v62  ;;  %11592 = vmatprep.subr.bf16.mxu0 %v16623_v56 }
 0x1b5   : > { %11976 = vmatprep.subr.bf16.mxu1 %v16623_v56 }
 0x1b7   : > { %11594 = vmatpush1.bf16.msra.mxu0 %v16631_v21 }
 0x1b8   : > { %11978 = vmatpush1.bf16.msra.mxu1 %v16631_v21  ;;  %11596 = vmatprep.subr.bf16.mxu0 %v16639_v27  ;;  %v19883_v21 = vld [vmem:[#allocation82_spill] sm:$0xff] }
 0x1b9   : > { %11980 = vmatprep.subr.bf16.mxu1 %v16639_v27  ;;  %v19882_v27 = vld [vmem:[#allocation81_spill] sm:$0xff] }
 0x1bb   : > { %11598 = vmatpush1.bf16.msra.mxu0 %v16647_v40 }
 0x1bc   : > { %11982 = vmatpush1.bf16.msra.mxu1 %v16647_v40  ;;  %11600 = vmatprep.subr.bf16.mxu0 %v16655_v26 }
 0x1bd   : > { %11984 = vmatprep.subr.bf16.mxu1 %v16655_v26  ;;  %v19881_v26 = vld [vmem:[#allocation80_spill] sm:$0xff] }
 0x1bf   : > { %11602 = vmatpush1.bf16.msra.mxu0 %v16663_v6 }
 0x1c0   : > { %11986 = vmatpush1.bf16.msra.mxu1 %v16663_v6  ;;  %11604 = vmatprep.subr.bf16.mxu0 %v16671_v20  ;;  %v19880_v6 = vld [vmem:[#allocation79_spill] sm:$0xff] }
 0x1c1   : > { %11988 = vmatprep.subr.bf16.mxu1 %v16671_v20 }
 0x1c3   : > { %11606 = vmatpush1.bf16.msra.mxu0 %v16679_v51 }
 0x1c4   : > { %11990 = vmatpush1.bf16.msra.mxu1 %v16679_v51  ;;  %11608 = vmatprep.subr.bf16.mxu0 %v16687_v13  ;;  %v19864_v51 = vld [vmem:[#allocation138_spill] sm:$0xff] }
 0x1c5   : > { %11992 = vmatprep.subr.bf16.mxu1 %v16687_v13  ;;  %v19865_v38 = vand.u32 4294901760, %v19864_v51  ;;  %v19871_v51 = vmov 0.0  }
 0x1c7   : > { %11610 = vmatpush1.bf16.msra.mxu0 %v16695_v53  ;;  %v16711_v48 = vpack.c.bf16 %v19865_v38, %v19863_v9  ;;  %v14531_v9 = vld [vmem:[%s14920_s5 + $0x8] sm:$0xff] }
 0x1c8   : > { %11994 = vmatpush1.bf16.msra.mxu1 %v16695_v53  ;;  %11612 = vmatprep.subr.bf16.mxu0 %v16703_v35  ;;  %v19877_v53 = vld [vmem:[#allocation71_spill] sm:$0xff] }
 0x1c9   : > { %19866 = vst [vmem:[#allocation59_spill] sm:$0xff] %v16711_v48  ;;  %11996 = vmatprep.subr.bf16.mxu1 %v16703_v35  ;;  %v19876_v35 = vld [vmem:[#allocation65_spill] sm:$0xff] }
 0x1cb   : > { %11614 = vmatpush1.bf16.msra.mxu0 %v16711_v48 }
 0x1cc   : > { %11998 = vmatpush1.bf16.msra.mxu1 %v16711_v48  ;;  %11616 = vmatprep.subr.bf16.mxu0 %v19700_v22 }
 0x1cd   : > { %12000 = vmatprep.subr.bf16.mxu1 %v19700_v22 }
 0x1ce   : > { %1573 = vmatmul.mubr.f32.vlgmr.msra.gmra.mrb[0].mxu0 %v19867_v39 }
 0x1cf   : > { %2909 = vmatmul.mubr.f32.vlgmr.msra.gmra.mrb[0].mxu1 %v19868_v14  ;;  %11618 = vmatpush1.bf16.msra.mxu0 %v19703_v49 }
 0x1d0   : > { %12002 = vmatpush1.bf16.msra.mxu1 %v19703_v49  ;;  %11620 = vmatprep.subr.bf16.mxu0 %v19704_v47 }
 0x1d1   : > { %12004 = vmatprep.subr.bf16.mxu1 %v19704_v47  ;;  %1708 = vmatprep.mubr.f32.mxu0 %v19753_v46  ;;  %v19869_v46 = vld [vmem:[#allocation91_spill] sm:$0xff] }
 0x1d2   : > { %3044 = vmatprep.mubr.f32.mxu1 %v19754_v50  ;;  %vm349_vm4 = vcmp.eq.f32.partialorder %v19869_v46, 2.0  ;;  %vm355_vm5 = vcmp.eq.f32.partialorder %v19869_v46, 3.0  ;;  %v19870_v50 = vld [vmem:[#allocation61_spill] sm:$0xff]  ;;  %vm361_vm9 = vcmp.eq.f32.partialorder %v19869_v46, 4.0  ;;  %vm367_vm11 = vcmp.eq.f32.partialorder %v19869_v46, 5.0 }
 0x1d3   : > { %11622 = vmatpush1.bf16.msra.mxu0 %v19707_v24  ;;  %v16766_v23 = vsel %vm349_vm4, 1.0, %v19871_v51  ;;  %v16769_v11 = vsel %vm355_vm5, 1.0, %v19871_v51  ;;  %vm373_vm13 = vcmp.eq.f32.partialorder %v19869_v46, 6.0  ;;  %vm379_vm15 = vcmp.eq.f32.partialorder %v19869_v46, 7.0 }
 0x1d4   : > { %12006 = vmatpush1.bf16.msra.mxu1 %v19707_v24  ;;  %11624 = vmatprep.subr.bf16.mxu0 %v19708_v33  ;;  %19872 = vst [vmem:[#allocation103_spill] sm:$0xff] %v16766_v23  ;;  %19873 = vst [vmem:[#allocation104_spill] sm:$0xff] %v16769_v11  ;;  %v3103_v38 = vmul.f32 %v14531_v9, %v16766_v23  ;;  %v4439_v48 = vmul.f32 %v14531_v9, %v16769_v11 }
 0x1d5   : > { %12008 = vmatprep.subr.bf16.mxu1 %v19708_v33 }
 0x1d6   : > { %v16782_v13 = vand.u32 4294901760, %v3103_v38  ;;  %v16784_v20 = vand.u32 4294901760, %v4439_v48 }
 0x1d7   : > { %11626 = vmatpush1.bf16.msra.mxu0 %v19709_v3 }
 0x1d8   : > { %12010 = vmatpush1.bf16.msra.mxu1 %v19709_v3  ;;  %11628 = vmatprep.subr.bf16.mxu0 %v19710_v30  ;;  %19878 = vst [vmem:[#allocation26_spill] sm:$0xff] %v16782_v13  ;;  %19879 = vst [vmem:[#allocation27_spill] sm:$0xff] %v16784_v20  ;;  %v16791_v9 = vsub.f32 %v3103_v38, %v16782_v13  ;;  %v16794_v40 = vsub.f32 %v4439_v48, %v16784_v20 }
 0x1d9   : > { %12012 = vmatprep.subr.bf16.mxu1 %v19710_v30 }
 0x1da   : > { %v18988_v56 = vand.u32 4294901760, %v16791_v9  ;;  %v18987_v62 = vand.u32 4294901760, %v16794_v40 }
 0x1db   : > { %11630 = vmatpush1.bf16.msra.mxu0 %v19711_v15 }
 0x1dc   : > { %12014 = vmatpush1.bf16.msra.mxu1 %v19711_v15  ;;  %11632 = vmatprep.subr.bf16.mxu0 %v19712_v5  ;;  %v3235_v48 = vsub.f32 %v16791_v9, %v18988_v56  ;;  %v4571_v38 = vsub.f32 %v16794_v40, %v18987_v62 }
 0x1dd   : > { %12016 = vmatprep.subr.bf16.mxu1 %v19712_v5 }
 0x1de   : > { %v3236_v34 = vand.u32 4294901760, %v3235_v48  ;;  %v4572_v43 = vand.u32 4294901760, %v4571_v38 }
 0x1df   : > { %11634 = vmatpush1.bf16.msra.mxu0 %v19713_v32 }
 0x1e0   : > { %12018 = vmatpush1.bf16.msra.mxu1 %v19713_v32  ;;  %11636 = vmatprep.subr.bf16.mxu0 %v19714_v25 }
 0x1e1   : > { %12020 = vmatprep.subr.bf16.mxu1 %v19714_v25 }
 0x1e3   : > { %11638 = vmatpush1.bf16.msra.mxu0 %v19715_v61 }
 0x1e4   : > { %12022 = vmatpush1.bf16.msra.mxu1 %v19715_v61  ;;  %11640 = vmatprep.subr.bf16.mxu0 %v19716_v19 }
 0x1e5   : > { %12024 = vmatprep.subr.bf16.mxu1 %v19716_v19 }
 0x1e7   : > { %11642 = vmatpush1.bf16.msra.mxu0 %v19717_v60 }
 0x1e8   : > { %12026 = vmatpush1.bf16.msra.mxu1 %v19717_v60  ;;  %11644 = vmatprep.subr.bf16.mxu0 %v19718_v2 }
 0x1e9   : > { %12028 = vmatprep.subr.bf16.mxu1 %v19718_v2 }
 0x1eb   : > { %11646 = vmatpush1.bf16.msra.mxu0 %v19719_v55 }
 0x1ec   : > { %12030 = vmatpush1.bf16.msra.mxu1 %v19719_v55  ;;  %11648 = vmatprep.subr.bf16.mxu0 %v19720_v42 }
 0x1ed   : > { %12032 = vmatprep.subr.bf16.mxu1 %v19720_v42 }
 0x1ef   : > { %11650 = vmatpush1.bf16.msra.mxu0 %v19721_v29 }
 0x1f0   : > { %12034 = vmatpush1.bf16.msra.mxu1 %v19721_v29  ;;  %11652 = vmatprep.subr.bf16.mxu0 %v19722_v59 }
 0x1f1   : > { %12036 = vmatprep.subr.bf16.mxu1 %v19722_v59 }
 0x1f3   : > { %11654 = vmatpush1.bf16.msra.mxu0 %v19723_v52 }
 0x1f4   : > { %12038 = vmatpush1.bf16.msra.mxu1 %v19723_v52  ;;  %11656 = vmatprep.subr.bf16.mxu0 %v19870_v50 }
 0x1f5   : > { %12040 = vmatprep.subr.bf16.mxu1 %v19870_v50 }
 0x1f7   : > { %11658 = vmatpush1.bf16.msra.mxu0 %v19874_v54 }
 0x1f8   : > { %12042 = vmatpush1.bf16.msra.mxu1 %v19874_v54  ;;  %11660 = vmatprep.subr.bf16.mxu0 %v19875_v63 }
 0x1f9   : > { %12044 = vmatprep.subr.bf16.mxu1 %v19875_v63 }
 0x1fb   : > { %11662 = vmatpush1.bf16.msra.mxu0 %v19876_v35 }
 0x1fc   : > { %12046 = vmatpush1.bf16.msra.mxu1 %v19876_v35  ;;  %11664 = vmatprep.subr.bf16.mxu0 %v19877_v53 }
 0x1fd   : > { %12048 = vmatprep.subr.bf16.mxu1 %v19877_v53 }
 0x1ff   : > { %11666 = vmatpush1.bf16.msra.mxu0 %v19880_v6 }
 0x200   : > { %12050 = vmatpush1.bf16.msra.mxu1 %v19880_v6  ;;  %11668 = vmatprep.subr.bf16.mxu0 %v19881_v26 }
 0x201   : > { %12052 = vmatprep.subr.bf16.mxu1 %v19881_v26 }
 0x203   : > { %11670 = vmatpush1.bf16.msra.mxu0 %v19882_v27 }
 0x204   : > { %12054 = vmatpush1.bf16.msra.mxu1 %v19882_v27  ;;  %11672 = vmatprep.subr.bf16.mxu0 %v19883_v21 }
 0x205   : > { %12056 = vmatprep.subr.bf16.mxu1 %v19883_v21 }
 0x207   : > { %11674 = vmatpush1.bf16.msra.mxu0 %v19733_v18 }
 0x208   : > { %12058 = vmatpush1.bf16.msra.mxu1 %v19733_v18  ;;  %11676 = vmatprep.subr.bf16.mxu0 %v19734_v16 }
 0x209   : > { %12060 = vmatprep.subr.bf16.mxu1 %v19734_v16 }
 0x20b   : > { %11678 = vmatpush1.bf16.msra.mxu0 %v19884_v17 }
 0x20c   : > { %12062 = vmatpush1.bf16.msra.mxu1 %v19884_v17  ;;  %12064 = vmatprep.subr.bf16.mxu0 %v19700_v22 }
 0x20d   : > { %12448 = vmatprep.subr.bf16.mxu1 %v19700_v22 }
 0x20e   : > { %1710 = vmatmul.mubr.f32.vlgmr.msra.gmra.mrb[0].mxu0 %v19867_v39 }
 0x20f   : > { %3046 = vmatmul.mubr.f32.vlgmr.msra.gmra.mrb[0].mxu1 %v19868_v14  ;;  %12066 = vmatpush1.bf16.msra.mxu0 %v19703_v49  ;;  %v14532_v14 = vld [vmem:[%s14920_s5] sm:$0xff] }
 0x210   : > { %12450 = vmatpush1.bf16.msra.mxu1 %v19703_v49  ;;  %12068 = vmatprep.subr.bf16.mxu0 %v19704_v47 }
 0x211   : > { %12452 = vmatprep.subr.bf16.mxu1 %v19704_v47  ;;  %3237 = vmatprep.mubr.f32.mxu0 %v3236_v34 }
 0x212   : > { %4573 = vmatprep.mubr.f32.mxu1 %v4572_v43  ;;  %v19885_v43 = vld [vmem:[#allocation96_spill] sm:$0xff] }
 0x213   : > { %12070 = vmatpush1.bf16.msra.mxu0 %v19707_v24  ;;  %vm348_vm6 = vcmp.eq.f32.partialorder %v19885_v43, 2.0  ;;  %vm354_vm7 = vcmp.eq.f32.partialorder %v19885_v43, 3.0  ;;  %vm360_vm8 = vcmp.eq.f32.partialorder %v19885_v43, 4.0  ;;  %vm366_vm10 = vcmp.eq.f32.partialorder %v19885_v43, 5.0 }
 0x214   : > { %12454 = vmatpush1.bf16.msra.mxu1 %v19707_v24  ;;  %12072 = vmatprep.subr.bf16.mxu0 %v19708_v33  ;;  %v16859_v34 = vsel %vm348_vm6, 1.0, %v19871_v51  ;;  %v16862_v39 = vsel %vm354_vm7, 1.0, %v19871_v51  ;;  %vm372_vm12 = vcmp.eq.f32.partialorder %v19885_v43, 6.0  ;;  %vm378_vm14 = vcmp.eq.f32.partialorder %v19885_v43, 7.0 }
 0x215   : > { %12456 = vmatprep.subr.bf16.mxu1 %v19708_v33  ;;  %19886 = vst [vmem:[#allocation31_spill] sm:$0xff] %v16859_v34  ;;  %19887 = vst [vmem:[#allocation32_spill] sm:$0xff] %v16862_v39  ;;  %v3102_v48 = vmul.f32 %v14532_v14, %v16859_v34  ;;  %v4438_v38 = vmul.f32 %v14532_v14, %v16862_v39  ;;  %v17160_v43 = vsel %vm378_vm14, 1.0, %v19871_v51 }
 0x217   : > { %12074 = vmatpush1.bf16.msra.mxu0 %v19709_v3  ;;  %v16873_v62 = vand.u32 4294901760, %v3102_v48  ;;  %v16875_v56 = vand.u32 4294901760, %v4438_v38 }
 0x218   : > { %12458 = vmatpush1.bf16.msra.mxu1 %v19709_v3  ;;  %12076 = vmatprep.subr.bf16.mxu0 %v19710_v30 }
 0x219   : > { %12460 = vmatprep.subr.bf16.mxu1 %v19710_v30  ;;  %19888 = vst [vmem:[#allocation33_spill] sm:$0xff] %v16873_v62  ;;  %19889 = vst [vmem:[#allocation36_spill] sm:$0xff] %v16875_v56  ;;  %v16882_v14 = vsub.f32 %v3102_v48, %v16873_v62  ;;  %v16885_v7 = vsub.f32 %v4438_v38, %v16875_v56 }
 0x21b   : > { %12078 = vmatpush1.bf16.msra.mxu0 %v19711_v15  ;;  %v19002_v28 = vand.u32 4294901760, %v16882_v14  ;;  %v19001_v45 = vand.u32 4294901760, %v16885_v7 }
 0x21c   : > { %12462 = vmatpush1.bf16.msra.mxu1 %v19711_v15  ;;  %12080 = vmatprep.subr.bf16.mxu0 %v19712_v5 }
 0x21d   : > { %12464 = vmatprep.subr.bf16.mxu1 %v19712_v5  ;;  %v3241_v48 = vsub.f32 %v16882_v14, %v19002_v28  ;;  %v4577_v38 = vsub.f32 %v16885_v7, %v19001_v45  ;;  %v19891_v45 = vld [vmem:[#allocation92_spill] sm:$0xff]  ;;  %v19892_v28 = vld [vmem:[#allocation93_spill] sm:$0xff] }
 0x21f   : > { %12082 = vmatpush1.bf16.msra.mxu0 %v19713_v32  ;;  %v3242_v31 = vand.u32 4294901760, %v3241_v48  ;;  %v4578_v58 = vand.u32 4294901760, %v4577_v38  ;;  %v19893_v48 = vld [vmem:[#allocation94_spill] sm:$0xff]  ;;  %v19894_v38 = vld [vmem:[#allocation112_spill] sm:$0xff] }
 0x220   : > { %12466 = vmatpush1.bf16.msra.mxu1 %v19713_v32  ;;  %12084 = vmatprep.subr.bf16.mxu0 %v19714_v25 }
 0x221   : > { %12468 = vmatprep.subr.bf16.mxu1 %v19714_v25 }
 0x223   : > { %12086 = vmatpush1.bf16.msra.mxu0 %v19715_v61 }
 0x224   : > { %12470 = vmatpush1.bf16.msra.mxu1 %v19715_v61  ;;  %12088 = vmatprep.subr.bf16.mxu0 %v19716_v19 }
 0x225   : > { %12472 = vmatprep.subr.bf16.mxu1 %v19716_v19 }
 0x227   : > { %12090 = vmatpush1.bf16.msra.mxu0 %v19717_v60 }
 0x228   : > { %12474 = vmatpush1.bf16.msra.mxu1 %v19717_v60  ;;  %12092 = vmatprep.subr.bf16.mxu0 %v19718_v2 }
 0x229   : > { %12476 = vmatprep.subr.bf16.mxu1 %v19718_v2 }
 0x22b   : > { %12094 = vmatpush1.bf16.msra.mxu0 %v19719_v55 }
 0x22c   : > { %12478 = vmatpush1.bf16.msra.mxu1 %v19719_v55  ;;  %12096 = vmatprep.subr.bf16.mxu0 %v19720_v42 }
 0x22d   : > { %12480 = vmatprep.subr.bf16.mxu1 %v19720_v42 }
 0x22f   : > { %12098 = vmatpush1.bf16.msra.mxu0 %v19721_v29 }
 0x230   : > { %12482 = vmatpush1.bf16.msra.mxu1 %v19721_v29  ;;  %12100 = vmatprep.subr.bf16.mxu0 %v19722_v59 }
 0x231   : > { %12484 = vmatprep.subr.bf16.mxu1 %v19722_v59 }
 0x233   : > { %12102 = vmatpush1.bf16.msra.mxu0 %v19723_v52 }
 0x234   : > { %12486 = vmatpush1.bf16.msra.mxu1 %v19723_v52  ;;  %12104 = vmatprep.subr.bf16.mxu0 %v19870_v50 }
 0x235   : > { %12488 = vmatprep.subr.bf16.mxu1 %v19870_v50 }
 0x237   : > { %12106 = vmatpush1.bf16.msra.mxu0 %v19874_v54 }
 0x238   : > { %12490 = vmatpush1.bf16.msra.mxu1 %v19874_v54  ;;  %12108 = vmatprep.subr.bf16.mxu0 %v19875_v63 }
 0x239   : > { %12492 = vmatprep.subr.bf16.mxu1 %v19875_v63 }
 0x23b   : > { %12110 = vmatpush1.bf16.msra.mxu0 %v19876_v35 }
 0x23c   : > { %12494 = vmatpush1.bf16.msra.mxu1 %v19876_v35  ;;  %12112 = vmatprep.subr.bf16.mxu0 %v19877_v53 }
 0x23d   : > { %12496 = vmatprep.subr.bf16.mxu1 %v19877_v53 }
 0x23f   : > { %12114 = vmatpush1.bf16.msra.mxu0 %v19880_v6 }
 0x240   : > { %12498 = vmatpush1.bf16.msra.mxu1 %v19880_v6  ;;  %12116 = vmatprep.subr.bf16.mxu0 %v19881_v26 }
 0x241   : > { %12500 = vmatprep.subr.bf16.mxu1 %v19881_v26 }
 0x243   : > { %12118 = vmatpush1.bf16.msra.mxu0 %v19882_v27 }
 0x244   : > { %12502 = vmatpush1.bf16.msra.mxu1 %v19882_v27  ;;  %12120 = vmatprep.subr.bf16.mxu0 %v19883_v21 }
 0x245   : > { %12504 = vmatprep.subr.bf16.mxu1 %v19883_v21 }
 0x247   : > { %12122 = vmatpush1.bf16.msra.mxu0 %v19733_v18 }
 0x248   : > { %12506 = vmatpush1.bf16.msra.mxu1 %v19733_v18  ;;  %12124 = vmatprep.subr.bf16.mxu0 %v19734_v16 }
 0x249   : > { %12508 = vmatprep.subr.bf16.mxu1 %v19734_v16 }
 0x24b   : > { %12126 = vmatpush1.bf16.msra.mxu0 %v19884_v17 }
 0x24c   : > { %12510 = vmatpush1.bf16.msra.mxu1 %v19884_v17  ;;  %12128 = vmatprep.subr.bf16.mxu0 %v19890_v44 }
 0x24d   : > { %12512 = vmatprep.subr.bf16.mxu1 %v19890_v44  ;;  %v1725_v44 = vstv %s17029_s12  ;;  %s11241_s12 = sld [smem:[#allocation10 + $0x82]] }
 0x24e   : > { %3243 = vmatmul.mubr.f32.vlgmr.msra.gmra.mrb[2].mxu0 %v3242_v31  ;;  %v19896_v31 = vld [vmem:[#allocation114_spill] sm:$0xff] }
 0x24f   : > { %4579 = vmatmul.mubr.f32.vlgmr.msra.gmra.mrb[2].mxu1 %v4578_v58  ;;  %12130 = vmatpush1.bf16.msra.mxu0 %v19891_v45  ;;  %v19895_v58 = vld [vmem:[#allocation113_spill] sm:$0xff] }
 0x250   : > { %12514 = vmatpush1.bf16.msra.mxu1 %v19891_v45  ;;  %12132 = vmatprep.subr.bf16.mxu0 %v19892_v28  ;;  %v19898_v45 = vld [vmem:[#allocation24_spill] sm:$0xff] }
 0x251   : > { %12516 = vmatprep.subr.bf16.mxu1 %v19892_v28  ;;  %3634 = vmatprep.mubr.f32.mxu0 %v16782_v13  ;;  %v19897_v28 = vld [vmem:[#allocation115_spill] sm:$0xff] }
 0x252   : > { %4970 = vmatprep.mubr.f32.mxu1 %v16784_v20 }
 0x253   : > { %12134 = vmatpush1.bf16.msra.mxu0 %v19893_v48 }
 0x254   : > { %12518 = vmatpush1.bf16.msra.mxu1 %v19893_v48  ;;  %12136 = vmatprep.subr.bf16.mxu0 %v19894_v38  ;;  %v19899_v48 = vld [vmem:[#allocation25_spill] sm:$0xff] }
 0x255   : > { %12520 = vmatprep.subr.bf16.mxu1 %v19894_v38  ;;  %v19900_v38 = vld [vmem:[#allocation28_spill] sm:$0xff] }
 0x257   : > { %12138 = vmatpush1.bf16.msra.mxu0 %v19895_v58 }
 0x258   : > { %12522 = vmatpush1.bf16.msra.mxu1 %v19895_v58  ;;  %12140 = vmatprep.subr.bf16.mxu0 %v19896_v31  ;;  %v19901_v58 = vld [vmem:[#allocation116_spill] sm:$0xff] }
 0x259   : > { %12524 = vmatprep.subr.bf16.mxu1 %v19896_v31  ;;  %v19902_v31 = vld [vmem:[#allocation117_spill] sm:$0xff] }
 0x25b   : > { %12142 = vmatpush1.bf16.msra.mxu0 %v19897_v28 }
 0x25c   : > { %12526 = vmatpush1.bf16.msra.mxu1 %v19897_v28  ;;  %12144 = vmatprep.subr.bf16.mxu0 %v19898_v45  ;;  %v19903_v28 = vld [vmem:[#allocation118_spill] sm:$0xff] }
 0x25d   : > { %12528 = vmatprep.subr.bf16.mxu1 %v19898_v45  ;;  %v19904_v45 = vld [vmem:[#allocation119_spill] sm:$0xff] }
 0x25f   : > { %12146 = vmatpush1.bf16.msra.mxu0 %v19899_v48 }
 0x260   : > { %12530 = vmatpush1.bf16.msra.mxu1 %v19899_v48  ;;  %12148 = vmatprep.subr.bf16.mxu0 %v19900_v38  ;;  %v19905_v48 = vld [vmem:[#allocation120_spill] sm:$0xff] }
 0x261   : > { %12532 = vmatprep.subr.bf16.mxu1 %v19900_v38  ;;  %v19906_v38 = vld [vmem:[#allocation121_spill] sm:$0xff] }
 0x263   : > { %12150 = vmatpush1.bf16.msra.mxu0 %v19901_v58 }
 0x264   : > { %12534 = vmatpush1.bf16.msra.mxu1 %v19901_v58  ;;  %12152 = vmatprep.subr.bf16.mxu0 %v19902_v31  ;;  %v19907_v58 = vld [vmem:[#allocation122_spill] sm:$0xff] }
 0x265   : > { %12536 = vmatprep.subr.bf16.mxu1 %v19902_v31  ;;  %v19908_v31 = vld [vmem:[#allocation123_spill] sm:$0xff] }
 0x267   : > { %12154 = vmatpush1.bf16.msra.mxu0 %v19903_v28 }
 0x268   : > { %12538 = vmatpush1.bf16.msra.mxu1 %v19903_v28  ;;  %12156 = vmatprep.subr.bf16.mxu0 %v19904_v45  ;;  %v19909_v28 = vld [vmem:[#allocation124_spill] sm:$0xff] }
 0x269   : > { %12540 = vmatprep.subr.bf16.mxu1 %v19904_v45  ;;  %v19910_v45 = vld [vmem:[#allocation125_spill] sm:$0xff] }
 0x26b   : > { %12158 = vmatpush1.bf16.msra.mxu0 %v19905_v48 }
 0x26c   : > { %12542 = vmatpush1.bf16.msra.mxu1 %v19905_v48  ;;  %12160 = vmatprep.subr.bf16.mxu0 %v19906_v38  ;;  %v19911_v48 = vld [vmem:[#allocation126_spill] sm:$0xff] }
 0x26d   : > { %12544 = vmatprep.subr.bf16.mxu1 %v19906_v38  ;;  %v19912_v38 = vld [vmem:[#allocation131_spill] sm:$0xff] }
 0x26f   : > { %12162 = vmatpush1.bf16.msra.mxu0 %v19907_v58 }
 0x270   : > { %12546 = vmatpush1.bf16.msra.mxu1 %v19907_v58  ;;  %12164 = vmatprep.subr.bf16.mxu0 %v19908_v31  ;;  %v19913_v58 = vld [vmem:[#allocation133_spill] sm:$0xff] }
 0x271   : > { %12548 = vmatprep.subr.bf16.mxu1 %v19908_v31  ;;  %v19914_v31 = vld [vmem:[#allocation134_spill] sm:$0xff] }
 0x273   : > { %12166 = vmatpush1.bf16.msra.mxu0 %v19909_v28 }
 0x274   : > { %12550 = vmatpush1.bf16.msra.mxu1 %v19909_v28  ;;  %12168 = vmatprep.subr.bf16.mxu0 %v19910_v45  ;;  %v19915_v28 = vld [vmem:[#allocation135_spill] sm:$0xff] }
 0x275   : > { %12552 = vmatprep.subr.bf16.mxu1 %v19910_v45  ;;  %v19916_v45 = vld [vmem:[#allocation136_spill] sm:$0xff] }
 0x277   : > { %12170 = vmatpush1.bf16.msra.mxu0 %v19911_v48 }
 0x278   : > { %12554 = vmatpush1.bf16.msra.mxu1 %v19911_v48  ;;  %12172 = vmatprep.subr.bf16.mxu0 %v19912_v38  ;;  %v19917_v48 = vld [vmem:[#allocation137_spill] sm:$0xff] }
 0x279   : > { %12556 = vmatprep.subr.bf16.mxu1 %v19912_v38  ;;  %v19918_v38 = vld [vmem:[#allocation162_spill] sm:$0xff] }
 0x27b   : > { %12174 = vmatpush1.bf16.msra.mxu0 %v19913_v58 }
 0x27c   : > { %12558 = vmatpush1.bf16.msra.mxu1 %v19913_v58  ;;  %12176 = vmatprep.subr.bf16.mxu0 %v19914_v31  ;;  %v19919_v58 = vld [vmem:[#allocation163_spill] sm:$0xff] }
 0x27d   : > { %12560 = vmatprep.subr.bf16.mxu1 %v19914_v31  ;;  %v19920_v31 = vld [vmem:[#allocation164_spill] sm:$0xff] }
 0x27f   : > { %12178 = vmatpush1.bf16.msra.mxu0 %v19915_v28 }
 0x280   : > { %12562 = vmatpush1.bf16.msra.mxu1 %v19915_v28  ;;  %12180 = vmatprep.subr.bf16.mxu0 %v19916_v45  ;;  %v19921_v28 = vld [vmem:[#allocation165_spill] sm:$0xff] }
 0x281   : > { %12564 = vmatprep.subr.bf16.mxu1 %v19916_v45  ;;  %v19922_v45 = vld [vmem:[#allocation68_spill] sm:$0xff] }
 0x283   : > { %12182 = vmatpush1.bf16.msra.mxu0 %v19917_v48 }
 0x284   : > { %12566 = vmatpush1.bf16.msra.mxu1 %v19917_v48  ;;  %12184 = vmatprep.subr.bf16.mxu0 %v19918_v38  ;;  %v19930_v48 = vld [vmem:[#allocation139_spill] sm:$0xff] }
 0x285   : > { %12568 = vmatprep.subr.bf16.mxu1 %v19918_v38  ;;  %v19923_v38 = vld [vmem:[#allocation70_spill] sm:$0xff] }
 0x287   : > { %12186 = vmatpush1.bf16.msra.mxu0 %v19919_v58 }
 0x288   : > { %12570 = vmatpush1.bf16.msra.mxu1 %v19919_v58  ;;  %12188 = vmatprep.subr.bf16.mxu0 %v19920_v31  ;;  %v19924_v58 = vld [vmem:[#allocation72_spill] sm:$0xff] }
 0x289   : > { %12572 = vmatprep.subr.bf16.mxu1 %v19920_v31  ;;  %v19927_v31 = vld [vmem:[#allocation76_spill] sm:$0xff] }
 0x28b   : > { %12190 = vmatpush1.bf16.msra.mxu0 %v19921_v28 }
 0x28c   : > { %12574 = vmatpush1.bf16.msra.mxu1 %v19921_v28  ;;  %12192 = vmatprep.subr.bf16.mxu0 %v19922_v45  ;;  %v19925_v28 = vld [vmem:[#allocation73_spill] sm:$0xff] }
 0x28d   : > { %12576 = vmatprep.subr.bf16.mxu1 %v19922_v45  ;;  %v19926_v45 = vld [vmem:[#allocation75_spill] sm:$0xff] }
 0x28e   : > { %3636 = vmatmul.mubr.f32.vlgmr.msra.gmra.mrb[2].mxu0 %v16873_v62 }
 0x28f   : > { %4972 = vmatmul.mubr.f32.vlgmr.msra.gmra.mrb[2].mxu1 %v16875_v56  ;;  %12194 = vmatpush1.bf16.msra.mxu0 %v19923_v38  ;;  %v19948_v56 = vld [vmem:[#allocation156_spill] sm:$0xff] }
 0x290   : > { %12578 = vmatpush1.bf16.msra.mxu1 %v19923_v38  ;;  %12196 = vmatprep.subr.bf16.mxu0 %v19924_v58  ;;  %v19928_v38 = vld [vmem:[#allocation77_spill] sm:$0xff] }
 0x291   : > { %12580 = vmatprep.subr.bf16.mxu1 %v19924_v58  ;;  %3836 = vmatprep.mubr.f32.mxu0 %v16791_v9  ;;  %v19929_v58 = vld [vmem:[#allocation78_spill] sm:$0xff] }
 0x292   : > { %5172 = vmatprep.mubr.f32.mxu1 %v16794_v40 }
 0x293   : > { %12198 = vmatpush1.bf16.msra.mxu0 %v19925_v28 }
 0x294   : > { %12582 = vmatpush1.bf16.msra.mxu1 %v19925_v28  ;;  %12200 = vmatprep.subr.bf16.mxu0 %v19926_v45  ;;  %v19931_v28 = vld [vmem:[#allocation140_spill] sm:$0xff] }
 0x295   : > { %12584 = vmatprep.subr.bf16.mxu1 %v19926_v45  ;;  %v19932_v45 = vld [vmem:[#allocation141_spill] sm:$0xff] }
 0x297   : > { %12202 = vmatpush1.bf16.msra.mxu0 %v19927_v31 }
 0x298   : > { %12586 = vmatpush1.bf16.msra.mxu1 %v19927_v31  ;;  %12204 = vmatprep.subr.bf16.mxu0 %v19928_v38  ;;  %v19933_v31 = vld [vmem:[#allocation142_spill] sm:$0xff] }
 0x299   : > { %12588 = vmatprep.subr.bf16.mxu1 %v19928_v38  ;;  %v19934_v38 = vld [vmem:[#allocation143_spill] sm:$0xff] }
 0x29b   : > { %12206 = vmatpush1.bf16.msra.mxu0 %v19929_v58 }
 0x29c   : > { %12590 = vmatpush1.bf16.msra.mxu1 %v19929_v58  ;;  %12208 = vmatprep.subr.bf16.mxu0 %v19930_v48  ;;  %v19935_v58 = vld [vmem:[#allocation144_spill] sm:$0xff] }
 0x29d   : > { %12592 = vmatprep.subr.bf16.mxu1 %v19930_v48  ;;  %v19936_v48 = vld [vmem:[#allocation145_spill] sm:$0xff] }
 0x29f   : > { %12210 = vmatpush1.bf16.msra.mxu0 %v19931_v28 }
 0x2a0   : > { %12594 = vmatpush1.bf16.msra.mxu1 %v19931_v28  ;;  %12212 = vmatprep.subr.bf16.mxu0 %v19932_v45  ;;  %v19937_v28 = vld [vmem:[#allocation146_spill] sm:$0xff] }
 0x2a1   : > { %12596 = vmatprep.subr.bf16.mxu1 %v19932_v45  ;;  %v19938_v45 = vld [vmem:[#allocation147_spill] sm:$0xff] }
 0x2a3   : > { %12214 = vmatpush1.bf16.msra.mxu0 %v19933_v31 }
 0x2a4   : > { %12598 = vmatpush1.bf16.msra.mxu1 %v19933_v31  ;;  %12216 = vmatprep.subr.bf16.mxu0 %v19934_v38  ;;  %v19939_v31 = vld [vmem:[#allocation148_spill] sm:$0xff] }
 0x2a5   : > { %12600 = vmatprep.subr.bf16.mxu1 %v19934_v38  ;;  %v19940_v38 = vld [vmem:[#allocation149_spill] sm:$0xff] }
 0x2a7   : > { %12218 = vmatpush1.bf16.msra.mxu0 %v19935_v58 }
 0x2a8   : > { %12602 = vmatpush1.bf16.msra.mxu1 %v19935_v58  ;;  %12220 = vmatprep.subr.bf16.mxu0 %v19936_v48  ;;  %v19941_v58 = vld [vmem:[#allocation150_spill] sm:$0xff] }
 0x2a9   : > { %12604 = vmatprep.subr.bf16.mxu1 %v19936_v48  ;;  %v19942_v48 = vld [vmem:[#allocation151_spill] sm:$0xff] }
 0x2ab   : > { %12222 = vmatpush1.bf16.msra.mxu0 %v19937_v28 }
 0x2ac   : > { %12606 = vmatpush1.bf16.msra.mxu1 %v19937_v28  ;;  %12224 = vmatprep.subr.bf16.mxu0 %v19938_v45  ;;  %v1721_v28 = vstv %s17027_s11  ;;  %s11240_s11 = sld [smem:[#allocation10 + $0x2]] }
 0x2ad   : > { %12608 = vmatprep.subr.bf16.mxu1 %v19938_v45  ;;  %v19943_v45 = vld [vmem:[#allocation152_spill] sm:$0xff] }
 0x2af   : > { %12226 = vmatpush1.bf16.msra.mxu0 %v19939_v31 }
 0x2b0   : > { %12610 = vmatpush1.bf16.msra.mxu1 %v19939_v31  ;;  %12228 = vmatprep.subr.bf16.mxu0 %v19940_v38  ;;  %v389_v31 = vstv %s17023_s9  ;;  %s17123_s9 = sld [smem:[#allocation10 + $0x381]] }
 0x2b1   : > { %12612 = vmatprep.subr.bf16.mxu1 %v19940_v38  ;;  %v385_v38 = vstv %s17021_s7  ;;  %s17120_s7 = sld [smem:[#allocation10 + $0x380]] }
 0x2b3   : > { %12230 = vmatpush1.bf16.msra.mxu0 %v19941_v58 }
 0x2b4   : > { %12614 = vmatpush1.bf16.msra.mxu1 %v19941_v58  ;;  %12232 = vmatprep.subr.bf16.mxu0 %v19942_v48  ;;  %v19944_v58 = vld [vmem:[#allocation45_spill] sm:$0xff] }
 0x2b5   : > { %12616 = vmatprep.subr.bf16.mxu1 %v19942_v48  ;;  %v19945_v48 = vld [vmem:[#allocation153_spill] sm:$0xff] }
 0x2b7   : > { %12234 = vmatpush1.bf16.msra.mxu0 %v19943_v45 }
 0x2b8   : > { %12618 = vmatpush1.bf16.msra.mxu1 %v19943_v45  ;;  %12236 = vmatprep.subr.bf16.mxu0 %v19944_v58  ;;  %v19946_v45 = vld [vmem:[#allocation154_spill] sm:$0xff] }
 0x2b9   : > { %12620 = vmatprep.subr.bf16.mxu1 %v19944_v58  ;;  %v19947_v58 = vld [vmem:[#allocation155_spill] sm:$0xff] }
 0x2bb   : > { %12238 = vmatpush1.bf16.msra.mxu0 %v19945_v48 }
 0x2bc   : > { %12622 = vmatpush1.bf16.msra.mxu1 %v19945_v48  ;;  %12240 = vmatprep.subr.bf16.mxu0 %v19946_v45  ;;  %v19949_v48 = vld [vmem:[#allocation100_spill] sm:$0xff] }
 0x2bd   : > { %12624 = vmatprep.subr.bf16.mxu1 %v19946_v45  ;;  %v386_v62 = vmul.f32 %v19949_v48, %v385_v38  ;;  %v19950_v45 = vld [vmem:[#allocation101_spill] sm:$0xff]  ;;  %v1722_v4 = vmul.f32 %v19949_v48, %v1721_v28  ;;  %v396_v48 = vmul.f32 %v16859_v34, %v395_v1 }
 0x2be   : > { %v390_v57 = vmul.f32 %v19950_v45, %v389_v31  ;;  %v1726_v36 = vmul.f32 %v19950_v45, %v1725_v44 }
 0x2bf   : > { %12242 = vmatpush1.bf16.msra.mxu0 %v19947_v58 }
 0x2c0   : > { %12626 = vmatpush1.bf16.msra.mxu1 %v19947_v58  ;;  %12244 = vmatprep.subr.bf16.mxu0 %v19948_v56  ;;  %v19951_v58 = vld [vmem:[#allocation97_spill] sm:$0xff]  ;;  %v392_v45 = vadd.f32 %v390_v57, %v386_v62 }
 0x2c1   : > { %12628 = vmatprep.subr.bf16.mxu1 %v19948_v56  ;;  %v387_v0 = vmul.f32 %v19951_v58, %v385_v38  ;;  %v19953_v56 = vld [vmem:[#allocation98_spill] sm:$0xff]  ;;  %v1723_v13 = vmul.f32 %v19951_v58, %v1721_v28  ;;  %v1732_v38 = vmul.f32 %v16859_v34, %v1731_v41  ;;  %v19955_v28 = vld [vmem:[#allocation159_spill] sm:$0xff] }
 0x2c2   : > { %v391_v20 = vmul.f32 %v19953_v56, %v389_v31  ;;  %v1727_v37 = vmul.f32 %v19953_v56, %v1725_v44  ;;  %v1728_v31 = vadd.f32 %v1726_v36, %v1722_v4  ;;  %v397_v44 = vmul.f32 %v16766_v23, %v395_v1  ;;  %v19956_v56 = vld [vmem:[#allocation160_spill] sm:$0xff] }
 0x2c3   : > { %12246 = vmatpush1.bf16.msra.mxu0 %v19952_v12  ;;  %v398_v34 = vadd.f32 %v396_v48, %v392_v45  ;;  %v402_v36 = vmul.f32 %v16862_v39, %v401_v10  ;;  %v17089_v4 = vsel %vm360_vm8, 1.0, %v19871_v51  ;;  %v407_v1 = vstv %s17056_s29  ;;  %s17609_s29 = sld [smem:[#allocation10 + $0x182]] }
 0x2c4   : > { %12630 = vmatpush1.bf16.msra.mxu1 %v19952_v12  ;;  %12248 = vmatprep.subr.bf16.mxu0 %v19954_v8  ;;  %v1737_v12 = vstv %s17045_s24  ;;  %v393_v57 = vadd.f32 %v391_v20, %v387_v0  ;;  %v1729_v62 = vadd.f32 %v1727_v37, %v1723_v13  ;;  %v1734_v37 = vadd.f32 %v1732_v38, %v1728_v31  ;;  %v19957_v20 = vld [vmem:[#allocation161_spill] sm:$0xff]  ;;  %s17605_s24 = sld [smem:[#allocation10 + $0x103]] }
 0x2c5   : > { %12632 = vmatprep.subr.bf16.mxu1 %v19954_v8  ;;  %v1733_v8 = vmul.f32 %v16766_v23, %v1731_v41  ;;  %v1738_v0 = vmul.f32 %v16862_v39, %v1737_v12  ;;  %v1743_v41 = vstv %s17061_s28  ;;  %v403_v45 = vmul.f32 %v16769_v11, %v401_v10  ;;  %s17615_s28 = sld [smem:[#allocation10 + $0x183]] }
 0x2c6   : > { %v17103_v13 = vsel %vm361_vm9, 1.0, %v19871_v51  ;;  %v399_v48 = vadd.f32 %v397_v44, %v393_v57  ;;  %v1739_v39 = vmul.f32 %v16769_v11, %v1737_v12  ;;  %v404_v38 = vadd.f32 %v402_v36, %v398_v34 }
 0x2c7   : > { %12250 = vmatpush1.bf16.msra.mxu0 %v19955_v28  ;;  %v408_v31 = vmul.f32 %v17089_v4, %v407_v1  ;;  %v17113_v10 = vsel %vm366_vm10, 1.0, %v19871_v51  ;;  %v1744_v44 = vmul.f32 %v17089_v4, %v1743_v41  ;;  %v1749_v12 = vstv %s17078_s10  ;;  %s17631_s10 = sld [smem:[#allocation10 + $0x203]] }
 0x2c8   : > { %12634 = vmatpush1.bf16.msra.mxu1 %v19955_v28  ;;  %12252 = vmatprep.subr.bf16.mxu0 %v19956_v56  ;;  %v409_v34 = vmul.f32 %v17103_v13, %v407_v1  ;;  %v17129_v57 = vsel %vm367_vm11, 1.0, %v19871_v51  ;;  %v1745_v11 = vmul.f32 %v17103_v13, %v1743_v41  ;;  %v17138_v1 = vsel %vm372_vm12, 1.0, %v19871_v51 }
 0x2c9   : > { %12636 = vmatprep.subr.bf16.mxu1 %v19956_v56  ;;  %v1735_v56 = vadd.f32 %v1733_v8, %v1729_v62  ;;  %v1740_v8 = vadd.f32 %v1738_v0, %v1734_v37  ;;  %v405_v62 = vadd.f32 %v403_v45, %v399_v48  ;;  %v410_v0 = vadd.f32 %v408_v31, %v404_v38 }
 0x2ca   : > { %v419_v23 = vstv %s17092_s21  ;;  %v1750_v45 = vmul.f32 %v17113_v10, %v1749_v12  ;;  %v1755_v48 = vstv %s17097_s23  ;;  %v17153_v31 = vsel %vm373_vm13, 1.0, %v19871_v51  ;;  %s17639_s21 = sld [smem:[#allocation10 + $0x282]]  ;;  %s17646_s23 = sld [smem:[#allocation10 + $0x283]] }
 0x2cb   : > { %12254 = vmatpush1.bf16.msra.mxu0 %v19957_v20  ;;  %v1741_v36 = vadd.f32 %v1739_v39, %v1735_v56  ;;  %v19958_v56 = vand.u32 4294901760, %v16791_v9  ;;  %v19959_v39 = vand.u32 4294901760, %v16794_v40  ;;  %v1746_v41 = vadd.f32 %v1744_v44, %v1740_v8 }
 0x2cc   : > { %12638 = vmatpush1.bf16.msra.mxu1 %v19957_v20  ;;  %12256 = vmatprep.subr.bf16.mxu0 %v19700_v22  ;;  %v413_v20 = vstv %s17073_s30  ;;  %v411_v9 = vadd.f32 %v409_v34, %v405_v62  ;;  %v1751_v40 = vmul.f32 %v17129_v57, %v1749_v12  ;;  %v420_v44 = vmul.f32 %v17138_v1, %v419_v23  ;;  %s17622_s30 = sld [smem:[#allocation10 + $0x202]] }
 0x2cd   : > { %12640 = vmatprep.subr.bf16.mxu1 %v19700_v22  ;;  %v414_v37 = vmul.f32 %v17113_v10, %v413_v20  ;;  %v415_v38 = vmul.f32 %v17129_v57, %v413_v20  ;;  %v1756_v8 = vmul.f32 %v17138_v1, %v1755_v48  ;;  %v1752_v28 = vadd.f32 %v1750_v45, %v1746_v41 }
 0x2ce   : > { %3839 = vmatmul.mubr.f32.vlgmr.msra.gmra.mrb[2].mxu0 %v16882_v14  ;;  %v1761_v34 = vstv %s17123_s9  ;;  %v17170_v12 = vsel %vm379_vm15, 1.0, %v19871_v51  ;;  %s17660_s9 = sld [smem:[#allocation10 + $0x303]] }
 0x2cf   : > { %5175 = vmatmul.mubr.f32.vlgmr.msra.gmra.mrb[2].mxu1 %v16885_v7  ;;  %12258 = vmatpush1.bf16.msra.mxu0 %v19703_v49  ;;  %v416_v20 = vadd.f32 %v414_v37, %v410_v0  ;;  %v417_v46 = vadd.f32 %v415_v38, %v411_v9  ;;  %v1758_v45 = vadd.f32 %v1756_v8, %v1752_v28 }
 0x2d0   : > { %12642 = vmatpush1.bf16.msra.mxu1 %v19703_v49  ;;  %12260 = vmatprep.subr.bf16.mxu0 %v19704_v47 }
 0x2d1   : > { %12644 = vmatprep.subr.bf16.mxu1 %v19704_v47  ;;  %3976 = vmatprep.mubr.f32.mxu0 %v19958_v56  ;;  %v1747_v56 = vadd.f32 %v1745_v11, %v1741_v36  ;;  %v421_v11 = vmul.f32 %v17153_v31, %v419_v23  ;;  %v1757_v36 = vmul.f32 %v17153_v31, %v1755_v48 }
 0x2d2   : > { %5312 = vmatprep.mubr.f32.mxu1 %v19959_v39  ;;  %v425_v39 = vstv %s17120_s7  ;;  %v422_v0 = vadd.f32 %v420_v44, %v416_v20  ;;  %v1762_v23 = vmul.f32 %v17160_v43, %v1761_v34  ;;  %v1763_v48 = vmul.f32 %v17170_v12, %v1761_v34  ;;  %s17653_s7 = sld [smem:[#allocation10 + $0x302]] }
 0x2d3   : > { %12262 = vmatpush1.bf16.msra.mxu0 %v19707_v24  ;;  %v1753_v62 = vadd.f32 %v1751_v40, %v1747_v56  ;;  %v426_v37 = vmul.f32 %v17160_v43, %v425_v39  ;;  %v427_v41 = vmul.f32 %v17170_v12, %v425_v39  ;;  %v423_v51 = vadd.f32 %v421_v11, %v417_v46 }
 0x2d4   : > { %12646 = vmatpush1.bf16.msra.mxu1 %v19707_v24  ;;  %12264 = vmatprep.subr.bf16.mxu0 %v19708_v33  ;;  %v1764_v56 = vadd.f32 %v1762_v23, %v1758_v45  ;;  %v19961_v45 = vand.u32 4294901760, %v16882_v14  ;;  %v19962_v23 = vand.u32 4294901760, %v16885_v7  ;;  %v19968_v14 = vld [vmem:[#allocation85_spill] sm:$0xff]  ;;  %v19969_v7 = vld [vmem:[#allocation87_spill] sm:$0xff] }
 0x2d5   : > { %12648 = vmatprep.subr.bf16.mxu1 %v19708_v33  ;;  %v1759_v38 = vadd.f32 %v1757_v36, %v1753_v62  ;;  %v428_v9 = vadd.f32 %v426_v37, %v422_v0  ;;  %v429_v28 = vadd.f32 %v427_v41, %v423_v51  ;;  %v19960_v37 = vld [vmem:[#allocation83_spill] sm:$0xff]  ;;  %v19963_v41 = vld [vmem:[#allocation84_spill] sm:$0xff]  ;;  %v19964_v51 = vld [vmem:[#allocation106_spill] sm:$0xff] }
 0x2d7   : > { %12266 = vmatpush1.bf16.msra.mxu0 %v19709_v3  ;;  %v1765_v40 = vadd.f32 %v1763_v48, %v1759_v38  ;;  %v19965_v38 = vld [vmem:[#allocation26_spill] sm:$0xff]  ;;  %v19966_v48 = vld [vmem:[#allocation27_spill] sm:$0xff] }
 0x2d8   : > { %12650 = vmatpush1.bf16.msra.mxu1 %v19709_v3  ;;  %12268 = vmatprep.subr.bf16.mxu0 %v19710_v30 }
 0x2d9   : > { %12652 = vmatprep.subr.bf16.mxu1 %v19710_v30 }
 0x2db   : > { %12270 = vmatpush1.bf16.msra.mxu0 %v19711_v15 }
 0x2dc   : > { %12654 = vmatpush1.bf16.msra.mxu1 %v19711_v15  ;;  %12272 = vmatprep.subr.bf16.mxu0 %v19712_v5 }
 0x2dd   : > { %12656 = vmatprep.subr.bf16.mxu1 %v19712_v5 }
 0x2df   : > { %12274 = vmatpush1.bf16.msra.mxu0 %v19713_v32 }
 0x2e0   : > { %12658 = vmatpush1.bf16.msra.mxu1 %v19713_v32  ;;  %12276 = vmatprep.subr.bf16.mxu0 %v19714_v25 }
 0x2e1   : > { %12660 = vmatprep.subr.bf16.mxu1 %v19714_v25  ;;  %v1711_v20 = vpop.f32.mrb[0].mxu0 }
 0x2e2   : > { %v3047_v44 = vpop.f32.mrb[0].mxu1  ;;  %v1716_v8 = vmul.f32 %v1711_v20, %v428_v9  ;;  %v1713_v34 = vpop.f32.mrb[1].mxu0  ;;  %v19967_v9 = vld [vmem:[#allocation107_spill] sm:$0xff]  ;;  %v19973_v20 = vld [vmem:[#allocation105_spill] sm:$0xff] }
 0x2e3   : > { %v3052_v39 = vmul.f32 %v3047_v44, %v1764_v56  ;;  %v3049_v11 = vpop.f32.mrb[1].mxu1  ;;  %v1717_v46 = vmul.f32 %v1713_v34, %v429_v28  ;;  %12278 = vmatpush1.bf16.msra.mxu0 %v19715_v61  ;;  %v19970_v56 = vld [vmem:[#allocation95_spill] sm:$0xff]  ;;  %v19974_v44 = vld [vmem:[#allocation17_spill] sm:$0xff]  ;;  %v19977_v34 = vld [vmem:[#allocation18_spill] sm:$0xff] }
 0x2e4   : > { %v3053_v62 = vmul.f32 %v3049_v11, %v1765_v40  ;;  %12662 = vmatpush1.bf16.msra.mxu1 %v19715_v61  ;;  %12280 = vmatprep.subr.bf16.mxu0 %v19716_v19  ;;  %v19971_v28 = vld [vmem:[#allocation99_spill] sm:$0xff]  ;;  %v19972_v40 = vld [vmem:[#allocation102_spill] sm:$0xff] }
 0x2e5   : > { %v17189_v36 = vadd.f32 %v3052_v39, %v1716_v8  ;;  %12664 = vmatprep.subr.bf16.mxu1 %v19716_v19  ;;  %v19975_v8 = vld [vmem:[#allocation110_spill] sm:$0xff]  ;;  %v19976_v39 = vld [vmem:[#allocation111_spill] sm:$0xff] }
 0x2e6   : > { %v17193_v0 = vadd.f32 %v3053_v62, %v1717_v46  ;;  %v19978_v11 = vld [vmem:[#allocation19_spill] sm:$0xff]  ;;  %v19979_v46 = vld [vmem:[#allocation20_spill] sm:$0xff]  ;;  %v19980_v62 = vld [vmem:[#allocation21_spill] sm:$0xff] }
 0x2e7   : > { %12282 = vmatpush1.bf16.msra.mxu0 %v19717_v60 }
 0x2e8   : > { %12666 = vmatpush1.bf16.msra.mxu1 %v19717_v60  ;;  %12284 = vmatprep.subr.bf16.mxu0 %v19718_v2 }
 0x2e9   : > { %12668 = vmatprep.subr.bf16.mxu1 %v19718_v2 }
 0x2eb   : > { %12286 = vmatpush1.bf16.msra.mxu0 %v19719_v55 }
 0x2ec   : > { %12670 = vmatpush1.bf16.msra.mxu1 %v19719_v55  ;;  %12288 = vmatprep.subr.bf16.mxu0 %v19720_v42 }
 0x2ed   : > { %12672 = vmatprep.subr.bf16.mxu1 %v19720_v42 }
 0x2ef   : > { %12290 = vmatpush1.bf16.msra.mxu0 %v19721_v29 }
 0x2f0   : > { %12674 = vmatpush1.bf16.msra.mxu1 %v19721_v29  ;;  %12292 = vmatprep.subr.bf16.mxu0 %v19722_v59 }
 0x2f1   : > { %12676 = vmatprep.subr.bf16.mxu1 %v19722_v59 }
 0x2f3   : > { %12294 = vmatpush1.bf16.msra.mxu0 %v19723_v52 }
 0x2f4   : > { %12678 = vmatpush1.bf16.msra.mxu1 %v19723_v52  ;;  %12296 = vmatprep.subr.bf16.mxu0 %v19870_v50 }
 0x2f5   : > { %12680 = vmatprep.subr.bf16.mxu1 %v19870_v50 }
 0x2f7   : > { %12298 = vmatpush1.bf16.msra.mxu0 %v19874_v54 }
 0x2f8   : > { %12682 = vmatpush1.bf16.msra.mxu1 %v19874_v54  ;;  %12300 = vmatprep.subr.bf16.mxu0 %v19875_v63 }
 0x2f9   : > { %12684 = vmatprep.subr.bf16.mxu1 %v19875_v63 }
 0x2fb   : > { %12302 = vmatpush1.bf16.msra.mxu0 %v19876_v35 }
 0x2fc   : > { %12686 = vmatpush1.bf16.msra.mxu1 %v19876_v35  ;;  %12304 = vmatprep.subr.bf16.mxu0 %v19877_v53 }
 0x2fd   : > { %12688 = vmatprep.subr.bf16.mxu1 %v19877_v53 }
 0x2ff   : > { %12306 = vmatpush1.bf16.msra.mxu0 %v19880_v6 }
 0x300   : > { %12690 = vmatpush1.bf16.msra.mxu1 %v19880_v6  ;;  %12308 = vmatprep.subr.bf16.mxu0 %v19881_v26 }
 0x301   : > { %12692 = vmatprep.subr.bf16.mxu1 %v19881_v26 }
 0x303   : > { %12310 = vmatpush1.bf16.msra.mxu0 %v19882_v27 }
 0x304   : > { %12694 = vmatpush1.bf16.msra.mxu1 %v19882_v27  ;;  %12312 = vmatprep.subr.bf16.mxu0 %v19883_v21 }
 0x305   : > { %12696 = vmatprep.subr.bf16.mxu1 %v19883_v21 }
 0x307   : > { %12314 = vmatpush1.bf16.msra.mxu0 %v19733_v18 }
 0x308   : > { %12698 = vmatpush1.bf16.msra.mxu1 %v19733_v18  ;;  %12316 = vmatprep.subr.bf16.mxu0 %v19734_v16 }
 0x309   : > { %12700 = vmatprep.subr.bf16.mxu1 %v19734_v16 }
 0x30b   : > { %12318 = vmatpush1.bf16.msra.mxu0 %v19884_v17 }
 0x30c   : > { %12702 = vmatpush1.bf16.msra.mxu1 %v19884_v17  ;;  %12320 = vmatprep.subr.bf16.mxu0 %v19960_v37 }
 0x30d   : > { %12704 = vmatprep.subr.bf16.mxu1 %v19960_v37  ;;  %v4403_v37 = vstv %s17605_s24  ;;  %s18131_s24 = sld [smem:[#allocation10 + $0x104]] }
 0x30e   : > { %3980 = vmatmul.mubr.f32.vlgmr.msra.gmra.mrb[2].mxu0 %v19961_v45  ;;  %v19981_v45 = vld [vmem:[#allocation22_spill] sm:$0xff] }
 0x30f   : > { %5316 = vmatmul.mubr.f32.vlgmr.msra.gmra.mrb[2].mxu1 %v19962_v23  ;;  %12322 = vmatpush1.bf16.msra.mxu0 %v19963_v41  ;;  %v19982_v23 = vld [vmem:[#allocation23_spill] sm:$0xff] }
 0x310   : > { %12706 = vmatpush1.bf16.msra.mxu1 %v19963_v41  ;;  %12324 = vmatprep.subr.bf16.mxu0 %v19964_v51 }
 0x311   : > { %12708 = vmatprep.subr.bf16.mxu1 %v19964_v51  ;;  %4243 = vmatprep.mubr.f32.mxu0 %v19965_v38 }
 0x312   : > { %5579 = vmatprep.mubr.f32.mxu1 %v19966_v48 }
 0x313   : > { %12326 = vmatpush1.bf16.msra.mxu0 %v19967_v9 }
 0x314   : > { %12710 = vmatpush1.bf16.msra.mxu1 %v19967_v9  ;;  %12328 = vmatprep.subr.bf16.mxu0 %v19968_v14 }
 0x315   : > { %12712 = vmatprep.subr.bf16.mxu1 %v19968_v14  ;;  %v20063_v14 = vld [vmem:[#allocation157_spill] sm:$0xff] }
 0x317   : > { %12330 = vmatpush1.bf16.msra.mxu0 %v19969_v7 }
 0x318   : > { %12714 = vmatpush1.bf16.msra.mxu1 %v19969_v7  ;;  %12332 = vmatprep.subr.bf16.mxu0 %v19970_v56 }
 0x319   : > { %12716 = vmatprep.subr.bf16.mxu1 %v19970_v56  ;;  %v20002_v56 = vld [vmem:[#allocation90_spill] sm:$0xff] }
 0x31b   : > { %12334 = vmatpush1.bf16.msra.mxu0 %v19971_v28 }
 0x31c   : > { %12718 = vmatpush1.bf16.msra.mxu1 %v19971_v28  ;;  %12336 = vmatprep.subr.bf16.mxu0 %v19972_v40 }
 0x31d   : > { %12720 = vmatprep.subr.bf16.mxu1 %v19972_v40 }
 0x31f   : > { %12338 = vmatpush1.bf16.msra.mxu0 %v19973_v20 }
 0x320   : > { %12722 = vmatpush1.bf16.msra.mxu1 %v19973_v20  ;;  %12340 = vmatprep.subr.bf16.mxu0 %v19974_v44 }
 0x321   : > { %12724 = vmatprep.subr.bf16.mxu1 %v19974_v44 }
 0x323   : > { %12342 = vmatpush1.bf16.msra.mxu0 %v19975_v8 }
 0x324   : > { %12726 = vmatpush1.bf16.msra.mxu1 %v19975_v8  ;;  %12344 = vmatprep.subr.bf16.mxu0 %v19976_v39 }
 0x325   : > { %12728 = vmatprep.subr.bf16.mxu1 %v19976_v39 }
 0x327   : > { %12346 = vmatpush1.bf16.msra.mxu0 %v19977_v34 }
 0x328   : > { %12730 = vmatpush1.bf16.msra.mxu1 %v19977_v34  ;;  %12348 = vmatprep.subr.bf16.mxu0 %v19978_v11  ;;  %v19983_v34 = vld [vmem:[#allocation29_spill] sm:$0xff] }
 0x329   : > { %12732 = vmatprep.subr.bf16.mxu1 %v19978_v11  ;;  %v19984_v11 = vld [vmem:[#allocation30_spill] sm:$0xff] }
 0x32b   : > { %12350 = vmatpush1.bf16.msra.mxu0 %v19979_v46 }
 0x32c   : > { %12734 = vmatpush1.bf16.msra.mxu1 %v19979_v46  ;;  %12352 = vmatprep.subr.bf16.mxu0 %v19980_v62  ;;  %v19985_v46 = vld [vmem:[#allocation34_spill] sm:$0xff] }
 0x32d   : > { %12736 = vmatprep.subr.bf16.mxu1 %v19980_v62  ;;  %v19986_v62 = vld [vmem:[#allocation35_spill] sm:$0xff] }
 0x32f   : > { %12354 = vmatpush1.bf16.msra.mxu0 %v19981_v45 }
 0x330   : > { %12738 = vmatpush1.bf16.msra.mxu1 %v19981_v45  ;;  %12356 = vmatprep.subr.bf16.mxu0 %v19982_v23  ;;  %v19987_v45 = vld [vmem:[#allocation39_spill] sm:$0xff] }
 0x331   : > { %12740 = vmatprep.subr.bf16.mxu1 %v19982_v23  ;;  %v19988_v23 = vld [vmem:[#allocation43_spill] sm:$0xff] }
 0x333   : > { %12358 = vmatpush1.bf16.msra.mxu0 %v19983_v34 }
 0x334   : > { %12742 = vmatpush1.bf16.msra.mxu1 %v19983_v34  ;;  %12360 = vmatprep.subr.bf16.mxu0 %v19984_v11  ;;  %v19989_v34 = vld [vmem:[#allocation51_spill] sm:$0xff] }
 0x335   : > { %12744 = vmatprep.subr.bf16.mxu1 %v19984_v11  ;;  %v19990_v11 = vld [vmem:[#allocation52_spill] sm:$0xff] }
 0x337   : > { %12362 = vmatpush1.bf16.msra.mxu0 %v19985_v46 }
 0x338   : > { %12746 = vmatpush1.bf16.msra.mxu1 %v19985_v46  ;;  %12364 = vmatprep.subr.bf16.mxu0 %v19986_v62  ;;  %v19991_v46 = vld [vmem:[#allocation53_spill] sm:$0xff] }
 0x339   : > { %12748 = vmatprep.subr.bf16.mxu1 %v19986_v62  ;;  %v19992_v62 = vld [vmem:[#allocation54_spill] sm:$0xff] }
 0x33b   : > { %12366 = vmatpush1.bf16.msra.mxu0 %v19987_v45 }
 0x33c   : > { %12750 = vmatpush1.bf16.msra.mxu1 %v19987_v45  ;;  %12368 = vmatprep.subr.bf16.mxu0 %v19988_v23  ;;  %v19993_v45 = vld [vmem:[#allocation55_spill] sm:$0xff] }
 0x33d   : > { %12752 = vmatprep.subr.bf16.mxu1 %v19988_v23  ;;  %v19994_v23 = vld [vmem:[#allocation58_spill] sm:$0xff] }
 0x33f   : > { %12370 = vmatpush1.bf16.msra.mxu0 %v19989_v34 }
 0x340   : > { %12754 = vmatpush1.bf16.msra.mxu1 %v19989_v34  ;;  %12372 = vmatprep.subr.bf16.mxu0 %v19990_v11  ;;  %v19995_v34 = vld [vmem:[#allocation59_spill] sm:$0xff] }
 0x341   : > { %12756 = vmatprep.subr.bf16.mxu1 %v19990_v11  ;;  %v19997_v11 = vld [vmem:[#allocation36_spill] sm:$0xff] }
 0x343   : > { %12374 = vmatpush1.bf16.msra.mxu0 %v19991_v46 }
 0x344   : > { %12758 = vmatpush1.bf16.msra.mxu1 %v19991_v46  ;;  %12376 = vmatprep.subr.bf16.mxu0 %v19992_v62  ;;  %v19996_v46 = vld [vmem:[#allocation33_spill] sm:$0xff] }
 0x345   : > { %12760 = vmatprep.subr.bf16.mxu1 %v19992_v62 }
 0x347   : > { %12378 = vmatpush1.bf16.msra.mxu0 %v19993_v45 }
 0x348   : > { %12762 = vmatpush1.bf16.msra.mxu1 %v19993_v45  ;;  %12380 = vmatprep.subr.bf16.mxu0 %v19994_v23 }
 0x349   : > { %12764 = vmatprep.subr.bf16.mxu1 %v19994_v23 }
 0x34b   : > { %12382 = vmatpush1.bf16.msra.mxu0 %v19995_v34 }
 0x34c   : > { %12766 = vmatpush1.bf16.msra.mxu1 %v19995_v34  ;;  %12384 = vmatprep.subr.bf16.mxu0 %v19700_v22 }
 0x34d   : > { %12768 = vmatprep.subr.bf16.mxu1 %v19700_v22 }
 0x34e   : > { %4245 = vmatmul.mubr.f32.vlgmr.msra.gmra.mrb[2].mxu0 %v19996_v46 }
 0x34f   : > { %5581 = vmatmul.mubr.f32.vlgmr.msra.gmra.mrb[2].mxu1 %v19997_v11  ;;  %12386 = vmatpush1.bf16.msra.mxu0 %v19703_v49 }
 0x350   : > { %12770 = vmatpush1.bf16.msra.mxu1 %v19703_v49  ;;  %12388 = vmatprep.subr.bf16.mxu0 %v19704_v47 }
 0x351   : > { %12772 = vmatprep.subr.bf16.mxu1 %v19704_v47  ;;  %4380 = vmatprep.mubr.f32.mxu0 %v19965_v38  ;;  %v14533_v38 = vld [vmem:[%s14920_s5 + $0x8] sm:$0xff] }
 0x352   : > { %5716 = vmatprep.mubr.f32.mxu1 %v19966_v48  ;;  %v5775_v48 = vmul.f32 %v14533_v38, %v17103_v13  ;;  %v7111_v34 = vmul.f32 %v14533_v38, %v17129_v57 }
 0x353   : > { %12390 = vmatpush1.bf16.msra.mxu0 %v19707_v24 }
 0x354   : > { %12774 = vmatpush1.bf16.msra.mxu1 %v19707_v24  ;;  %12392 = vmatprep.subr.bf16.mxu0 %v19708_v33  ;;  %v17360_v23 = vand.u32 4294901760, %v5775_v48  ;;  %v17362_v45 = vand.u32 4294901760, %v7111_v34 }
 0x355   : > { %12776 = vmatprep.subr.bf16.mxu1 %v19708_v33 }
 0x356   : > { %19998 = vst [vmem:[#allocation37_spill] sm:$0xff] %v17360_v23  ;;  %19999 = vst [vmem:[#allocation38_spill] sm:$0xff] %v17362_v45  ;;  %v17369_v38 = vsub.f32 %v5775_v48, %v17360_v23  ;;  %v17372_v62 = vsub.f32 %v7111_v34, %v17362_v45 }
 0x357   : > { %12394 = vmatpush1.bf16.msra.mxu0 %v19709_v3 }
 0x358   : > { %12778 = vmatpush1.bf16.msra.mxu1 %v19709_v3  ;;  %12396 = vmatprep.subr.bf16.mxu0 %v19710_v30  ;;  %v19130_v39 = vand.u32 4294901760, %v17369_v38  ;;  %v19129_v8 = vand.u32 4294901760, %v17372_v62 }
 0x359   : > { %12780 = vmatprep.subr.bf16.mxu1 %v19710_v30 }
 0x35a   : > { %v5907_v34 = vsub.f32 %v17369_v38, %v19130_v39  ;;  %v7243_v48 = vsub.f32 %v17372_v62, %v19129_v8 }
 0x35b   : > { %12398 = vmatpush1.bf16.msra.mxu0 %v19711_v15 }
 0x35c   : > { %12782 = vmatpush1.bf16.msra.mxu1 %v19711_v15  ;;  %12400 = vmatprep.subr.bf16.mxu0 %v19712_v5  ;;  %v5908_v44 = vand.u32 4294901760, %v5907_v34  ;;  %v7244_v20 = vand.u32 4294901760, %v7243_v48 }
 0x35d   : > { %12784 = vmatprep.subr.bf16.mxu1 %v19712_v5 }
 0x35f   : > { %12402 = vmatpush1.bf16.msra.mxu0 %v19713_v32 }
 0x360   : > { %12786 = vmatpush1.bf16.msra.mxu1 %v19713_v32  ;;  %12404 = vmatprep.subr.bf16.mxu0 %v19714_v25 }
 0x361   : > { %12788 = vmatprep.subr.bf16.mxu1 %v19714_v25 }
 0x363   : > { %12406 = vmatpush1.bf16.msra.mxu0 %v19715_v61 }
 0x364   : > { %12790 = vmatpush1.bf16.msra.mxu1 %v19715_v61  ;;  %12408 = vmatprep.subr.bf16.mxu0 %v19716_v19 }
 0x365   : > { %12792 = vmatprep.subr.bf16.mxu1 %v19716_v19 }
 0x367   : > { %12410 = vmatpush1.bf16.msra.mxu0 %v19717_v60 }
 0x368   : > { %12794 = vmatpush1.bf16.msra.mxu1 %v19717_v60  ;;  %12412 = vmatprep.subr.bf16.mxu0 %v19718_v2 }
 0x369   : > { %12796 = vmatprep.subr.bf16.mxu1 %v19718_v2 }
 0x36b   : > { %12414 = vmatpush1.bf16.msra.mxu0 %v19719_v55 }
 0x36c   : > { %12798 = vmatpush1.bf16.msra.mxu1 %v19719_v55  ;;  %12416 = vmatprep.subr.bf16.mxu0 %v19720_v42 }
 0x36d   : > { %12800 = vmatprep.subr.bf16.mxu1 %v19720_v42 }
 0x36f   : > { %12418 = vmatpush1.bf16.msra.mxu0 %v19721_v29 }
 0x370   : > { %12802 = vmatpush1.bf16.msra.mxu1 %v19721_v29  ;;  %12420 = vmatprep.subr.bf16.mxu0 %v19722_v59 }
 0x371   : > { %12804 = vmatprep.subr.bf16.mxu1 %v19722_v59 }
 0x373   : > { %12422 = vmatpush1.bf16.msra.mxu0 %v19723_v52 }
 0x374   : > { %12806 = vmatpush1.bf16.msra.mxu1 %v19723_v52  ;;  %12424 = vmatprep.subr.bf16.mxu0 %v19870_v50 }
 0x375   : > { %12808 = vmatprep.subr.bf16.mxu1 %v19870_v50 }
 0x377   : > { %12426 = vmatpush1.bf16.msra.mxu0 %v19874_v54 }
 0x378   : > { %12810 = vmatpush1.bf16.msra.mxu1 %v19874_v54  ;;  %12428 = vmatprep.subr.bf16.mxu0 %v19875_v63 }
 0x379   : > { %12812 = vmatprep.subr.bf16.mxu1 %v19875_v63 }
 0x37b   : > { %12430 = vmatpush1.bf16.msra.mxu0 %v19876_v35 }
 0x37c   : > { %12814 = vmatpush1.bf16.msra.mxu1 %v19876_v35  ;;  %12432 = vmatprep.subr.bf16.mxu0 %v19877_v53 }
 0x37d   : > { %12816 = vmatprep.subr.bf16.mxu1 %v19877_v53 }
 0x37f   : > { %12434 = vmatpush1.bf16.msra.mxu0 %v19880_v6 }
 0x380   : > { %12818 = vmatpush1.bf16.msra.mxu1 %v19880_v6  ;;  %12436 = vmatprep.subr.bf16.mxu0 %v19881_v26 }
 0x381   : > { %12820 = vmatprep.subr.bf16.mxu1 %v19881_v26 }
 0x383   : > { %12438 = vmatpush1.bf16.msra.mxu0 %v19882_v27 }
 0x384   : > { %12822 = vmatpush1.bf16.msra.mxu1 %v19882_v27  ;;  %12440 = vmatprep.subr.bf16.mxu0 %v19883_v21 }
 0x385   : > { %12824 = vmatprep.subr.bf16.mxu1 %v19883_v21 }
 0x387   : > { %12442 = vmatpush1.bf16.msra.mxu0 %v19733_v18 }
 0x388   : > { %12826 = vmatpush1.bf16.msra.mxu1 %v19733_v18  ;;  %12444 = vmatprep.subr.bf16.mxu0 %v19734_v16 }
 0x389   : > { %12828 = vmatprep.subr.bf16.mxu1 %v19734_v16 }
 0x38b   : > { %12446 = vmatpush1.bf16.msra.mxu0 %v19884_v17 }
 0x38c   : > { %12830 = vmatpush1.bf16.msra.mxu1 %v19884_v17  ;;  %12832 = vmatprep.subr.bf16.mxu0 %v19700_v22 }
 0x38d   : > { %13216 = vmatprep.subr.bf16.mxu1 %v19700_v22 }
 0x38e   : > { %4382 = vmatmul.mubr.f32.vlgmr.msra.gmra.mrb[2].mxu0 %v19996_v46 }
 0x38f   : > { %5718 = vmatmul.mubr.f32.vlgmr.msra.gmra.mrb[2].mxu1 %v19997_v11  ;;  %12834 = vmatpush1.bf16.msra.mxu0 %v19703_v49 }
 0x390   : > { %13218 = vmatpush1.bf16.msra.mxu1 %v19703_v49  ;;  %12836 = vmatprep.subr.bf16.mxu0 %v19704_v47 }
 0x391   : > { %13220 = vmatprep.subr.bf16.mxu1 %v19704_v47  ;;  %5909 = vmatprep.mubr.f32.mxu0 %v5908_v44 }
 0x392   : > { %7245 = vmatprep.mubr.f32.mxu1 %v7244_v20  ;;  %v14534_v20 = vld [vmem:[%s14920_s5] sm:$0xff] }
 0x393   : > { %12838 = vmatpush1.bf16.msra.mxu0 %v19707_v24  ;;  %v5774_v44 = vmul.f32 %v14534_v20, %v17089_v4  ;;  %v7110_v11 = vmul.f32 %v14534_v20, %v17113_v10 }
 0x394   : > { %13222 = vmatpush1.bf16.msra.mxu1 %v19707_v24  ;;  %12840 = vmatprep.subr.bf16.mxu0 %v19708_v33 }
 0x395   : > { %13224 = vmatprep.subr.bf16.mxu1 %v19708_v33  ;;  %v17443_v46 = vand.u32 4294901760, %v5774_v44  ;;  %v17445_v34 = vand.u32 4294901760, %v7110_v11 }
 0x397   : > { %12842 = vmatpush1.bf16.msra.mxu0 %v19709_v3  ;;  %20000 = vst [vmem:[#allocation40_spill] sm:$0xff] %v17443_v46  ;;  %20001 = vst [vmem:[#allocation41_spill] sm:$0xff] %v17445_v34  ;;  %v17452_v48 = vsub.f32 %v5774_v44, %v17443_v46  ;;  %v17455_v20 = vsub.f32 %v7110_v11, %v17445_v34 }
 0x398   : > { %13226 = vmatpush1.bf16.msra.mxu1 %v19709_v3  ;;  %12844 = vmatprep.subr.bf16.mxu0 %v19710_v30 }
 0x399   : > { %13228 = vmatprep.subr.bf16.mxu1 %v19710_v30  ;;  %v19135_v8 = vand.u32 4294901760, %v17452_v48  ;;  %v19134_v39 = vand.u32 4294901760, %v17455_v20 }
 0x39b   : > { %12846 = vmatpush1.bf16.msra.mxu0 %v19711_v15  ;;  %v5913_v44 = vsub.f32 %v17452_v48, %v19135_v8  ;;  %v7249_v11 = vsub.f32 %v17455_v20, %v19134_v39  ;;  %v20003_v39 = vld [vmem:[#allocation92_spill] sm:$0xff]  ;;  %v20004_v8 = vld [vmem:[#allocation93_spill] sm:$0xff] }
 0x39c   : > { %13230 = vmatpush1.bf16.msra.mxu1 %v19711_v15  ;;  %12848 = vmatprep.subr.bf16.mxu0 %v19712_v5 }
 0x39d   : > { %13232 = vmatprep.subr.bf16.mxu1 %v19712_v5  ;;  %v5914_v40 = vand.u32 4294901760, %v5913_v44  ;;  %v7250_v28 = vand.u32 4294901760, %v7249_v11  ;;  %v20005_v44 = vld [vmem:[#allocation94_spill] sm:$0xff]  ;;  %v20006_v11 = vld [vmem:[#allocation112_spill] sm:$0xff] }
 0x39f   : > { %12850 = vmatpush1.bf16.msra.mxu0 %v19713_v32 }
 0x3a0   : > { %13234 = vmatpush1.bf16.msra.mxu1 %v19713_v32  ;;  %12852 = vmatprep.subr.bf16.mxu0 %v19714_v25 }
 0x3a1   : > { %13236 = vmatprep.subr.bf16.mxu1 %v19714_v25 }
 0x3a3   : > { %12854 = vmatpush1.bf16.msra.mxu0 %v19715_v61 }
 0x3a4   : > { %13238 = vmatpush1.bf16.msra.mxu1 %v19715_v61  ;;  %12856 = vmatprep.subr.bf16.mxu0 %v19716_v19 }
 0x3a5   : > { %13240 = vmatprep.subr.bf16.mxu1 %v19716_v19 }
 0x3a7   : > { %12858 = vmatpush1.bf16.msra.mxu0 %v19717_v60 }
 0x3a8   : > { %13242 = vmatpush1.bf16.msra.mxu1 %v19717_v60  ;;  %12860 = vmatprep.subr.bf16.mxu0 %v19718_v2 }
 0x3a9   : > { %13244 = vmatprep.subr.bf16.mxu1 %v19718_v2 }
 0x3ab   : > { %12862 = vmatpush1.bf16.msra.mxu0 %v19719_v55 }
 0x3ac   : > { %13246 = vmatpush1.bf16.msra.mxu1 %v19719_v55  ;;  %12864 = vmatprep.subr.bf16.mxu0 %v19720_v42 }
 0x3ad   : > { %13248 = vmatprep.subr.bf16.mxu1 %v19720_v42 }
 0x3af   : > { %12866 = vmatpush1.bf16.msra.mxu0 %v19721_v29 }
 0x3b0   : > { %13250 = vmatpush1.bf16.msra.mxu1 %v19721_v29  ;;  %12868 = vmatprep.subr.bf16.mxu0 %v19722_v59 }
 0x3b1   : > { %13252 = vmatprep.subr.bf16.mxu1 %v19722_v59 }
 0x3b3   : > { %12870 = vmatpush1.bf16.msra.mxu0 %v19723_v52 }
 0x3b4   : > { %13254 = vmatpush1.bf16.msra.mxu1 %v19723_v52  ;;  %12872 = vmatprep.subr.bf16.mxu0 %v19870_v50 }
 0x3b5   : > { %13256 = vmatprep.subr.bf16.mxu1 %v19870_v50 }
 0x3b7   : > { %12874 = vmatpush1.bf16.msra.mxu0 %v19874_v54 }
 0x3b8   : > { %13258 = vmatpush1.bf16.msra.mxu1 %v19874_v54  ;;  %12876 = vmatprep.subr.bf16.mxu0 %v19875_v63 }
 0x3b9   : > { %13260 = vmatprep.subr.bf16.mxu1 %v19875_v63 }
 0x3bb   : > { %12878 = vmatpush1.bf16.msra.mxu0 %v19876_v35 }
 0x3bc   : > { %13262 = vmatpush1.bf16.msra.mxu1 %v19876_v35  ;;  %12880 = vmatprep.subr.bf16.mxu0 %v19877_v53 }
 0x3bd   : > { %13264 = vmatprep.subr.bf16.mxu1 %v19877_v53 }
 0x3bf   : > { %12882 = vmatpush1.bf16.msra.mxu0 %v19880_v6 }
 0x3c0   : > { %13266 = vmatpush1.bf16.msra.mxu1 %v19880_v6  ;;  %12884 = vmatprep.subr.bf16.mxu0 %v19881_v26 }
 0x3c1   : > { %13268 = vmatprep.subr.bf16.mxu1 %v19881_v26 }
 0x3c3   : > { %12886 = vmatpush1.bf16.msra.mxu0 %v19882_v27 }
 0x3c4   : > { %13270 = vmatpush1.bf16.msra.mxu1 %v19882_v27  ;;  %12888 = vmatprep.subr.bf16.mxu0 %v19883_v21  ;;  %v20069_v27 = vld [vmem:[#allocation160_spill] sm:$0xff] }
 0x3c5   : > { %13272 = vmatprep.subr.bf16.mxu1 %v19883_v21 }
 0x3c7   : > { %12890 = vmatpush1.bf16.msra.mxu0 %v19733_v18 }
 0x3c8   : > { %13274 = vmatpush1.bf16.msra.mxu1 %v19733_v18  ;;  %12892 = vmatprep.subr.bf16.mxu0 %v19734_v16 }
 0x3c9   : > { %13276 = vmatprep.subr.bf16.mxu1 %v19734_v16 }
 0x3cb   : > { %12894 = vmatpush1.bf16.msra.mxu0 %v19884_v17 }
 0x3cc   : > { %13278 = vmatpush1.bf16.msra.mxu1 %v19884_v17  ;;  %12896 = vmatprep.subr.bf16.mxu0 %v20002_v56 }
 0x3cd   : > { %13280 = vmatprep.subr.bf16.mxu1 %v20002_v56  ;;  %v4397_v56 = vstv %s17597_s14  ;;  %s18125_s14 = sld [smem:[#allocation10 + $0x5]] }
 0x3ce   : > { %5915 = vmatmul.mubr.f32.vlgmr.msra.gmra.mrb[4].mxu0 %v5914_v40  ;;  %v20008_v40 = vld [vmem:[#allocation114_spill] sm:$0xff] }
 0x3cf   : > { %7251 = vmatmul.mubr.f32.vlgmr.msra.gmra.mrb[4].mxu1 %v7250_v28  ;;  %12898 = vmatpush1.bf16.msra.mxu0 %v20003_v39  ;;  %v20007_v28 = vld [vmem:[#allocation113_spill] sm:$0xff] }
 0x3d0   : > { %13282 = vmatpush1.bf16.msra.mxu1 %v20003_v39  ;;  %12900 = vmatprep.subr.bf16.mxu0 %v20004_v8  ;;  %v20010_v39 = vld [vmem:[#allocation24_spill] sm:$0xff] }
 0x3d1   : > { %13284 = vmatprep.subr.bf16.mxu1 %v20004_v8  ;;  %6306 = vmatprep.mubr.f32.mxu0 %v17360_v23  ;;  %v20009_v8 = vld [vmem:[#allocation115_spill] sm:$0xff]  ;;  %v20065_v23 = vld [vmem:[#allocation158_spill] sm:$0xff] }
 0x3d2   : > { %7642 = vmatprep.mubr.f32.mxu1 %v17362_v45 }
 0x3d3   : > { %12902 = vmatpush1.bf16.msra.mxu0 %v20005_v44 }
 0x3d4   : > { %13286 = vmatpush1.bf16.msra.mxu1 %v20005_v44  ;;  %12904 = vmatprep.subr.bf16.mxu0 %v20006_v11  ;;  %v20011_v44 = vld [vmem:[#allocation25_spill] sm:$0xff] }
 0x3d5   : > { %13288 = vmatprep.subr.bf16.mxu1 %v20006_v11  ;;  %v20012_v11 = vld [vmem:[#allocation28_spill] sm:$0xff] }
 0x3d7   : > { %12906 = vmatpush1.bf16.msra.mxu0 %v20007_v28 }
 0x3d8   : > { %13290 = vmatpush1.bf16.msra.mxu1 %v20007_v28  ;;  %12908 = vmatprep.subr.bf16.mxu0 %v20008_v40  ;;  %v20013_v28 = vld [vmem:[#allocation116_spill] sm:$0xff] }
 0x3d9   : > { %13292 = vmatprep.subr.bf16.mxu1 %v20008_v40  ;;  %v20014_v40 = vld [vmem:[#allocation117_spill] sm:$0xff] }
 0x3db   : > { %12910 = vmatpush1.bf16.msra.mxu0 %v20009_v8 }
 0x3dc   : > { %13294 = vmatpush1.bf16.msra.mxu1 %v20009_v8  ;;  %12912 = vmatprep.subr.bf16.mxu0 %v20010_v39  ;;  %v20015_v8 = vld [vmem:[#allocation118_spill] sm:$0xff] }
 0x3dd   : > { %13296 = vmatprep.subr.bf16.mxu1 %v20010_v39  ;;  %v20016_v39 = vld [vmem:[#allocation119_spill] sm:$0xff] }
 0x3df   : > { %12914 = vmatpush1.bf16.msra.mxu0 %v20011_v44 }
 0x3e0   : > { %13298 = vmatpush1.bf16.msra.mxu1 %v20011_v44  ;;  %12916 = vmatprep.subr.bf16.mxu0 %v20012_v11  ;;  %v20017_v44 = vld [vmem:[#allocation120_spill] sm:$0xff] }
 0x3e1   : > { %13300 = vmatprep.subr.bf16.mxu1 %v20012_v11  ;;  %v20018_v11 = vld [vmem:[#allocation121_spill] sm:$0xff] }
 0x3e3   : > { %12918 = vmatpush1.bf16.msra.mxu0 %v20013_v28 }
 0x3e4   : > { %13302 = vmatpush1.bf16.msra.mxu1 %v20013_v28  ;;  %12920 = vmatprep.subr.bf16.mxu0 %v20014_v40  ;;  %v20019_v28 = vld [vmem:[#allocation122_spill] sm:$0xff] }
 0x3e5   : > { %13304 = vmatprep.subr.bf16.mxu1 %v20014_v40  ;;  %v20020_v40 = vld [vmem:[#allocation123_spill] sm:$0xff] }
 0x3e7   : > { %12922 = vmatpush1.bf16.msra.mxu0 %v20015_v8 }
 0x3e8   : > { %13306 = vmatpush1.bf16.msra.mxu1 %v20015_v8  ;;  %12924 = vmatprep.subr.bf16.mxu0 %v20016_v39  ;;  %v20021_v8 = vld [vmem:[#allocation124_spill] sm:$0xff] }
 0x3e9   : > { %13308 = vmatprep.subr.bf16.mxu1 %v20016_v39  ;;  %v20022_v39 = vld [vmem:[#allocation125_spill] sm:$0xff] }
 0x3eb   : > { %12926 = vmatpush1.bf16.msra.mxu0 %v20017_v44 }
 0x3ec   : > { %13310 = vmatpush1.bf16.msra.mxu1 %v20017_v44  ;;  %12928 = vmatprep.subr.bf16.mxu0 %v20018_v11  ;;  %v20023_v44 = vld [vmem:[#allocation126_spill] sm:$0xff] }
 0x3ed   : > { %13312 = vmatprep.subr.bf16.mxu1 %v20018_v11  ;;  %v20024_v11 = vld [vmem:[#allocation131_spill] sm:$0xff] }
 0x3ef   : > { %12930 = vmatpush1.bf16.msra.mxu0 %v20019_v28 }
 0x3f0   : > { %13314 = vmatpush1.bf16.msra.mxu1 %v20019_v28  ;;  %12932 = vmatprep.subr.bf16.mxu0 %v20020_v40  ;;  %v20025_v28 = vld [vmem:[#allocation133_spill] sm:$0xff] }
 0x3f1   : > { %13316 = vmatprep.subr.bf16.mxu1 %v20020_v40  ;;  %v20026_v40 = vld [vmem:[#allocation134_spill] sm:$0xff] }
 0x3f3   : > { %12934 = vmatpush1.bf16.msra.mxu0 %v20021_v8 }
 0x3f4   : > { %13318 = vmatpush1.bf16.msra.mxu1 %v20021_v8  ;;  %12936 = vmatprep.subr.bf16.mxu0 %v20022_v39  ;;  %v20027_v8 = vld [vmem:[#allocation135_spill] sm:$0xff] }
 0x3f5   : > { %13320 = vmatprep.subr.bf16.mxu1 %v20022_v39  ;;  %v20028_v39 = vld [vmem:[#allocation136_spill] sm:$0xff] }
 0x3f7   : > { %12938 = vmatpush1.bf16.msra.mxu0 %v20023_v44 }
 0x3f8   : > { %13322 = vmatpush1.bf16.msra.mxu1 %v20023_v44  ;;  %12940 = vmatprep.subr.bf16.mxu0 %v20024_v11  ;;  %v20029_v44 = vld [vmem:[#allocation137_spill] sm:$0xff] }
 0x3f9   : > { %13324 = vmatprep.subr.bf16.mxu1 %v20024_v11  ;;  %v20030_v11 = vld [vmem:[#allocation162_spill] sm:$0xff] }
 0x3fb   : > { %12942 = vmatpush1.bf16.msra.mxu0 %v20025_v28 }
 0x3fc   : > { %13326 = vmatpush1.bf16.msra.mxu1 %v20025_v28  ;;  %12944 = vmatprep.subr.bf16.mxu0 %v20026_v40  ;;  %v20031_v28 = vld [vmem:[#allocation163_spill] sm:$0xff] }
 0x3fd   : > { %13328 = vmatprep.subr.bf16.mxu1 %v20026_v40  ;;  %v20032_v40 = vld [vmem:[#allocation164_spill] sm:$0xff] }
 0x3ff   : > { %12946 = vmatpush1.bf16.msra.mxu0 %v20027_v8 }
 0x400   : > { %13330 = vmatpush1.bf16.msra.mxu1 %v20027_v8  ;;  %12948 = vmatprep.subr.bf16.mxu0 %v20028_v39  ;;  %v20033_v8 = vld [vmem:[#allocation165_spill] sm:$0xff] }
 0x401   : > { %13332 = vmatprep.subr.bf16.mxu1 %v20028_v39  ;;  %v20034_v39 = vld [vmem:[#allocation68_spill] sm:$0xff] }
 0x403   : > { %12950 = vmatpush1.bf16.msra.mxu0 %v20029_v44 }
 0x404   : > { %13334 = vmatpush1.bf16.msra.mxu1 %v20029_v44  ;;  %12952 = vmatprep.subr.bf16.mxu0 %v20030_v11  ;;  %v20042_v44 = vld [vmem:[#allocation139_spill] sm:$0xff] }
 0x405   : > { %13336 = vmatprep.subr.bf16.mxu1 %v20030_v11  ;;  %v20035_v11 = vld [vmem:[#allocation70_spill] sm:$0xff] }
 0x407   : > { %12954 = vmatpush1.bf16.msra.mxu0 %v20031_v28 }
 0x408   : > { %13338 = vmatpush1.bf16.msra.mxu1 %v20031_v28  ;;  %12956 = vmatprep.subr.bf16.mxu0 %v20032_v40  ;;  %v20036_v28 = vld [vmem:[#allocation72_spill] sm:$0xff] }
 0x409   : > { %13340 = vmatprep.subr.bf16.mxu1 %v20032_v40  ;;  %v20039_v40 = vld [vmem:[#allocation76_spill] sm:$0xff] }
 0x40b   : > { %12958 = vmatpush1.bf16.msra.mxu0 %v20033_v8 }
 0x40c   : > { %13342 = vmatpush1.bf16.msra.mxu1 %v20033_v8  ;;  %12960 = vmatprep.subr.bf16.mxu0 %v20034_v39  ;;  %v20037_v8 = vld [vmem:[#allocation73_spill] sm:$0xff] }
 0x40d   : > { %13344 = vmatprep.subr.bf16.mxu1 %v20034_v39  ;;  %v20038_v39 = vld [vmem:[#allocation75_spill] sm:$0xff] }
 0x40e   : > { %6308 = vmatmul.mubr.f32.vlgmr.msra.gmra.mrb[4].mxu0 %v17443_v46  ;;  %v20062_v46 = vld [vmem:[#allocation101_spill] sm:$0xff] }
 0x40f   : > { %7644 = vmatmul.mubr.f32.vlgmr.msra.gmra.mrb[4].mxu1 %v17445_v34  ;;  %12962 = vmatpush1.bf16.msra.mxu0 %v20035_v11  ;;  %v4398_v41 = vmul.f32 %v20062_v46, %v4397_v56 }
 0x410   : > { %13346 = vmatpush1.bf16.msra.mxu1 %v20035_v11  ;;  %12964 = vmatprep.subr.bf16.mxu0 %v20036_v28  ;;  %v20040_v11 = vld [vmem:[#allocation77_spill] sm:$0xff] }
 0x411   : > { %13348 = vmatprep.subr.bf16.mxu1 %v20036_v28  ;;  %6508 = vmatprep.mubr.f32.mxu0 %v17369_v38  ;;  %v20041_v28 = vld [vmem:[#allocation78_spill] sm:$0xff] }
 0x412   : > { %7844 = vmatprep.mubr.f32.mxu1 %v17372_v62 }
 0x413   : > { %12966 = vmatpush1.bf16.msra.mxu0 %v20037_v8 }
 0x414   : > { %13350 = vmatpush1.bf16.msra.mxu1 %v20037_v8  ;;  %12968 = vmatprep.subr.bf16.mxu0 %v20038_v39  ;;  %v20043_v8 = vld [vmem:[#allocation140_spill] sm:$0xff] }
 0x415   : > { %13352 = vmatprep.subr.bf16.mxu1 %v20038_v39  ;;  %v20044_v39 = vld [vmem:[#allocation141_spill] sm:$0xff] }
 0x417   : > { %12970 = vmatpush1.bf16.msra.mxu0 %v20039_v40 }
 0x418   : > { %13354 = vmatpush1.bf16.msra.mxu1 %v20039_v40  ;;  %12972 = vmatprep.subr.bf16.mxu0 %v20040_v11  ;;  %v20045_v40 = vld [vmem:[#allocation142_spill] sm:$0xff] }
 0x419   : > { %13356 = vmatprep.subr.bf16.mxu1 %v20040_v11  ;;  %v20046_v11 = vld [vmem:[#allocation143_spill] sm:$0xff] }
 0x41b   : > { %12974 = vmatpush1.bf16.msra.mxu0 %v20041_v28 }
 0x41c   : > { %13358 = vmatpush1.bf16.msra.mxu1 %v20041_v28  ;;  %12976 = vmatprep.subr.bf16.mxu0 %v20042_v44  ;;  %v20047_v28 = vld [vmem:[#allocation144_spill] sm:$0xff] }
 0x41d   : > { %13360 = vmatprep.subr.bf16.mxu1 %v20042_v44  ;;  %v20048_v44 = vld [vmem:[#allocation145_spill] sm:$0xff] }
 0x41f   : > { %12978 = vmatpush1.bf16.msra.mxu0 %v20043_v8 }
 0x420   : > { %13362 = vmatpush1.bf16.msra.mxu1 %v20043_v8  ;;  %12980 = vmatprep.subr.bf16.mxu0 %v20044_v39  ;;  %v20049_v8 = vld [vmem:[#allocation146_spill] sm:$0xff] }
 0x421   : > { %13364 = vmatprep.subr.bf16.mxu1 %v20044_v39  ;;  %v20050_v39 = vld [vmem:[#allocation147_spill] sm:$0xff] }
 0x423   : > { %12982 = vmatpush1.bf16.msra.mxu0 %v20045_v40 }
 0x424   : > { %13366 = vmatpush1.bf16.msra.mxu1 %v20045_v40  ;;  %12984 = vmatprep.subr.bf16.mxu0 %v20046_v11  ;;  %v20051_v40 = vld [vmem:[#allocation148_spill] sm:$0xff] }
 0x425   : > { %13368 = vmatprep.subr.bf16.mxu1 %v20046_v11  ;;  %v20052_v11 = vld [vmem:[#allocation149_spill] sm:$0xff] }
 0x427   : > { %12986 = vmatpush1.bf16.msra.mxu0 %v20047_v28 }
 0x428   : > { %13370 = vmatpush1.bf16.msra.mxu1 %v20047_v28  ;;  %12988 = vmatprep.subr.bf16.mxu0 %v20048_v44  ;;  %v20053_v28 = vld [vmem:[#allocation150_spill] sm:$0xff] }
 0x429   : > { %13372 = vmatprep.subr.bf16.mxu1 %v20048_v44  ;;  %v20054_v44 = vld [vmem:[#allocation151_spill] sm:$0xff] }
 0x42b   : > { %12990 = vmatpush1.bf16.msra.mxu0 %v20049_v8 }
 0x42c   : > { %13374 = vmatpush1.bf16.msra.mxu1 %v20049_v8  ;;  %12992 = vmatprep.subr.bf16.mxu0 %v20050_v39  ;;  %v20055_v8 = vld [vmem:[#allocation152_spill] sm:$0xff] }
 0x42d   : > { %13376 = vmatprep.subr.bf16.mxu1 %v20050_v39  ;;  %v20056_v39 = vld [vmem:[#allocation45_spill] sm:$0xff] }
 0x42f   : > { %12994 = vmatpush1.bf16.msra.mxu0 %v20051_v40 }
 0x430   : > { %13378 = vmatpush1.bf16.msra.mxu1 %v20051_v40  ;;  %12996 = vmatprep.subr.bf16.mxu0 %v20052_v11  ;;  %v20060_v40 = vld [vmem:[#allocation156_spill] sm:$0xff] }
 0x431   : > { %13380 = vmatprep.subr.bf16.mxu1 %v20052_v11  ;;  %v3061_v11 = vstv %s11241_s12  ;;  %s17676_s12 = sld [smem:[#allocation10 + $0x383]] }
 0x432   : > { %v3062_v7 = vmul.f32 %v20062_v46, %v3061_v11 }
 0x433   : > { %12998 = vmatpush1.bf16.msra.mxu0 %v20053_v28 }
 0x434   : > { %13382 = vmatpush1.bf16.msra.mxu1 %v20053_v28  ;;  %13000 = vmatprep.subr.bf16.mxu0 %v20054_v44  ;;  %v20057_v28 = vld [vmem:[#allocation153_spill] sm:$0xff] }
 0x435   : > { %13384 = vmatprep.subr.bf16.mxu1 %v20054_v44  ;;  %v20058_v44 = vld [vmem:[#allocation154_spill] sm:$0xff] }
 0x437   : > { %13002 = vmatpush1.bf16.msra.mxu0 %v20055_v8 }
 0x438   : > { %13386 = vmatpush1.bf16.msra.mxu1 %v20055_v8  ;;  %13004 = vmatprep.subr.bf16.mxu0 %v20056_v39  ;;  %v3057_v8 = vstv %s11240_s11  ;;  %s17669_s11 = sld [smem:[#allocation10 + $0x382]] }
 0x439   : > { %13388 = vmatprep.subr.bf16.mxu1 %v20056_v39  ;;  %v20059_v39 = vld [vmem:[#allocation155_spill] sm:$0xff]  ;;  %v3059_v9 = vmul.f32 %v19951_v58, %v3057_v8 }
 0x43b   : > { %13006 = vmatpush1.bf16.msra.mxu0 %v20057_v28 }
 0x43c   : > { %13390 = vmatpush1.bf16.msra.mxu1 %v20057_v28  ;;  %13008 = vmatprep.subr.bf16.mxu0 %v20058_v44  ;;  %v4393_v28 = vstv %s17595_s13  ;;  %s11257_s13 = sld [smem:[#allocation10 + $0x84]] }
 0x43d   : > { %13392 = vmatprep.subr.bf16.mxu1 %v20058_v44  ;;  %v20061_v44 = vld [vmem:[#allocation100_spill] sm:$0xff] }
 0x43e   : > { %v3058_v34 = vmul.f32 %v20061_v44, %v3057_v8  ;;  %v4394_v51 = vmul.f32 %v20061_v44, %v4393_v28  ;;  %v20066_v8 = vld [vmem:[#allocation31_spill] sm:$0xff] }
 0x43f   : > { %13010 = vmatpush1.bf16.msra.mxu0 %v20059_v39  ;;  %v20068_v44 = vld [vmem:[#allocation103_spill] sm:$0xff] }
 0x440   : > { %13394 = vmatpush1.bf16.msra.mxu1 %v20059_v39  ;;  %13012 = vmatprep.subr.bf16.mxu0 %v20060_v40  ;;  %v3067_v39 = vstv %s17601_s27  ;;  %v3064_v16 = vadd.f32 %v3062_v7, %v3058_v34  ;;  %v4404_v7 = vmul.f32 %v20066_v8, %v4403_v37  ;;  %s18127_s27 = sld [smem:[#allocation10 + $0x85]] }
 0x441   : > { %13396 = vmatprep.subr.bf16.mxu1 %v20060_v40  ;;  %v20064_v40 = vld [vmem:[#allocation98_spill] sm:$0xff]  ;;  %v3068_v18 = vmul.f32 %v20066_v8, %v3067_v39  ;;  %v3069_v21 = vmul.f32 %v20068_v44, %v3067_v39  ;;  %v3079_v39 = vstv %s17622_s30  ;;  %s18145_s30 = sld [smem:[#allocation10 + $0x185]] }
 0x442   : > { %v3063_v45 = vmul.f32 %v20064_v40, %v3061_v11  ;;  %v4399_v17 = vmul.f32 %v20064_v40, %v4397_v56  ;;  %v20067_v11 = vld [vmem:[#allocation159_spill] sm:$0xff]  ;;  %v4409_v56 = vstv %s17615_s28  ;;  %s18139_s28 = sld [smem:[#allocation10 + $0x184]] }
 0x443   : > { %13014 = vmatpush1.bf16.msra.mxu0 %v20063_v14  ;;  %v3070_v40 = vadd.f32 %v3068_v18, %v3064_v16  ;;  %v4415_v18 = vstv %s17631_s10  ;;  %s18152_s10 = sld [smem:[#allocation10 + $0x204]] }
 0x444   : > { %13398 = vmatpush1.bf16.msra.mxu1 %v20063_v14  ;;  %13016 = vmatprep.subr.bf16.mxu0 %v20065_v23  ;;  %v4395_v14 = vmul.f32 %v19951_v58, %v4393_v28  ;;  %v3065_v46 = vadd.f32 %v3063_v45, %v3059_v9  ;;  %v4400_v28 = vadd.f32 %v4398_v41, %v4394_v51  ;;  %v20070_v58 = vld [vmem:[#allocation32_spill] sm:$0xff]  ;;  %v20071_v9 = vld [vmem:[#allocation161_spill] sm:$0xff] }
 0x445   : > { %13400 = vmatprep.subr.bf16.mxu1 %v20065_v23  ;;  %v3073_v23 = vstv %s17609_s29  ;;  %v20072_v51 = vld [vmem:[#allocation104_spill] sm:$0xff]  ;;  %v4410_v16 = vmul.f32 %v20070_v58, %v4409_v56  ;;  %s18135_s29 = sld [smem:[#allocation10 + $0x105]] }
 0x446   : > { %v4401_v34 = vadd.f32 %v4399_v17, %v4395_v14  ;;  %v3074_v26 = vmul.f32 %v20070_v58, %v3073_v23  ;;  %v3071_v41 = vadd.f32 %v3069_v21, %v3065_v46  ;;  %v3075_v45 = vmul.f32 %v20072_v51, %v3073_v23 }
 0x447   : > { %13018 = vmatpush1.bf16.msra.mxu0 %v20067_v11  ;;  %v4406_v17 = vadd.f32 %v4404_v7, %v4400_v28  ;;  %v4411_v14 = vmul.f32 %v20072_v51, %v4409_v56  ;;  %v3080_v23 = vmul.f32 %v17089_v4, %v3079_v39  ;;  %v3085_v46 = vstv %s17639_s21  ;;  %s18161_s21 = sld [smem:[#allocation10 + $0x205]] }
 0x448   : > { %13402 = vmatpush1.bf16.msra.mxu1 %v20067_v11  ;;  %13020 = vmatprep.subr.bf16.mxu0 %v20069_v27  ;;  %v4405_v11 = vmul.f32 %v20068_v44, %v4403_v37  ;;  %v3076_v21 = vadd.f32 %v3074_v26, %v3070_v40  ;;  %v3077_v28 = vadd.f32 %v3075_v45, %v3071_v41  ;;  %v4421_v40 = vstv %s17646_s23  ;;  %s18169_s23 = sld [smem:[#allocation10 + $0x284]] }
 0x449   : > { %13404 = vmatprep.subr.bf16.mxu1 %v20069_v27  ;;  %v4412_v7 = vadd.f32 %v4410_v16, %v4406_v17  ;;  %v4416_v26 = vmul.f32 %v17089_v4, %v4415_v18  ;;  %v20073_v51 = vand.u32 4294901760, %v17369_v38  ;;  %v20074_v41 = vand.u32 4294901760, %v17372_v62 }
 0x44a   : > { %v4407_v37 = vadd.f32 %v4405_v11, %v4401_v34  ;;  %v3081_v11 = vmul.f32 %v17103_v13, %v3079_v39  ;;  %v4417_v34 = vmul.f32 %v17103_v13, %v4415_v18  ;;  %v3082_v39 = vadd.f32 %v3080_v23, %v3076_v21 }
 0x44b   : > { %13022 = vmatpush1.bf16.msra.mxu0 %v20071_v9  ;;  %v3086_v45 = vmul.f32 %v17113_v10, %v3085_v46  ;;  %v3091_v17 = vstv %s17653_s7  ;;  %v4418_v38 = vadd.f32 %v4416_v26, %v4412_v7  ;;  %v4422_v62 = vmul.f32 %v17113_v10, %v4421_v40  ;;  %s18176_s7 = sld [smem:[#allocation10 + $0x285]] }
 0x44c   : > { %13406 = vmatpush1.bf16.msra.mxu1 %v20071_v9  ;;  %13024 = vmatprep.subr.bf16.mxu0 %v19700_v22  ;;  %v4413_v56 = vadd.f32 %v4411_v14, %v4407_v37  ;;  %v3083_v16 = vadd.f32 %v3081_v11, %v3077_v28  ;;  %v3087_v37 = vmul.f32 %v17129_v57, %v3085_v46  ;;  %v3097_v46 = vstv %s17669_s11  ;;  %s18190_s11 = sld [smem:[#allocation10 + $0x305]] }
 0x44d   : > { %13408 = vmatprep.subr.bf16.mxu1 %v19700_v22  ;;  %v4423_v14 = vmul.f32 %v17129_v57, %v4421_v40  ;;  %v3088_v21 = vadd.f32 %v3086_v45, %v3082_v39  ;;  %v3092_v23 = vmul.f32 %v17138_v1, %v3091_v17  ;;  %v3093_v11 = vmul.f32 %v17153_v31, %v3091_v17 }
 0x44e   : > { %6511 = vmatmul.mubr.f32.vlgmr.msra.gmra.mrb[4].mxu0 %v17452_v48  ;;  %v4419_v18 = vadd.f32 %v4417_v34, %v4413_v56  ;;  %v3089_v28 = vadd.f32 %v3087_v37, %v3083_v16  ;;  %v4424_v7 = vadd.f32 %v4422_v62, %v4418_v38  ;;  %v4433_v56 = vstv %s17676_s12  ;;  %s18199_s12 = sld [smem:[#allocation10 + $0x384]] }
 0x44f   : > { %7847 = vmatmul.mubr.f32.vlgmr.msra.gmra.mrb[4].mxu1 %v17455_v20  ;;  %13026 = vmatpush1.bf16.msra.mxu0 %v19703_v49  ;;  %v3098_v39 = vmul.f32 %v17160_v43, %v3097_v46  ;;  %v3099_v17 = vmul.f32 %v17170_v12, %v3097_v46  ;;  %v4434_v37 = vmul.f32 %v17160_v43, %v4433_v56 }
 0x450   : > { %13410 = vmatpush1.bf16.msra.mxu1 %v19703_v49  ;;  %13028 = vmatprep.subr.bf16.mxu0 %v19704_v47  ;;  %v4425_v40 = vadd.f32 %v4423_v14, %v4419_v18  ;;  %v3095_v45 = vadd.f32 %v3093_v11, %v3089_v28  ;;  %v4435_v62 = vmul.f32 %v17170_v12, %v4433_v56 }
 0x451   : > { %13412 = vmatprep.subr.bf16.mxu1 %v19704_v47  ;;  %6648 = vmatprep.mubr.f32.mxu0 %v20073_v51  ;;  %v4427_v51 = vstv %s17660_s9  ;;  %s18183_s9 = sld [smem:[#allocation10 + $0x304]] }
 0x452   : > { %7984 = vmatprep.mubr.f32.mxu1 %v20074_v41  ;;  %v4428_v26 = vmul.f32 %v17138_v1, %v4427_v51  ;;  %v4429_v34 = vmul.f32 %v17153_v31, %v4427_v51  ;;  %v3094_v41 = vadd.f32 %v3092_v23, %v3088_v21  ;;  %v3101_v18 = vadd.f32 %v3099_v17, %v3095_v45  ;;  %v20077_v17 = vld [vmem:[#allocation82_spill] sm:$0xff] }
 0x453   : > { %13030 = vmatpush1.bf16.msra.mxu0 %v19707_v24 }
 0x454   : > { %13414 = vmatpush1.bf16.msra.mxu1 %v19707_v24  ;;  %13032 = vmatprep.subr.bf16.mxu0 %v19708_v33  ;;  %v4430_v16 = vadd.f32 %v4428_v26, %v4424_v7  ;;  %v4431_v38 = vadd.f32 %v4429_v34, %v4425_v40  ;;  %v3100_v51 = vadd.f32 %v3098_v39, %v3094_v41 }
 0x455   : > { %13416 = vmatprep.subr.bf16.mxu1 %v19708_v33 }
 0x456   : > { %v4436_v14 = vadd.f32 %v4434_v37, %v4430_v16  ;;  %v4437_v46 = vadd.f32 %v4435_v62, %v4431_v38  ;;  %v20078_v16 = vld [vmem:[#allocation86_spill] sm:$0xff]  ;;  %v20079_v37 = vld [vmem:[#allocation88_spill] sm:$0xff]  ;;  %v20080_v38 = vld [vmem:[#allocation89_spill] sm:$0xff] }
 0x457   : > { %13034 = vmatpush1.bf16.msra.mxu0 %v19709_v3  ;;  %v20081_v62 = vld [vmem:[#allocation83_spill] sm:$0xff] }
 0x458   : > { %13418 = vmatpush1.bf16.msra.mxu1 %v19709_v3  ;;  %13036 = vmatprep.subr.bf16.mxu0 %v19710_v30 }
 0x459   : > { %13420 = vmatprep.subr.bf16.mxu1 %v19710_v30 }
 0x45b   : > { %13038 = vmatpush1.bf16.msra.mxu0 %v19711_v15 }
 0x45c   : > { %13422 = vmatpush1.bf16.msra.mxu1 %v19711_v15  ;;  %13040 = vmatprep.subr.bf16.mxu0 %v19712_v5 }
 0x45d   : > { %13424 = vmatprep.subr.bf16.mxu1 %v19712_v5 }
 0x45f   : > { %13042 = vmatpush1.bf16.msra.mxu0 %v19713_v32 }
 0x460   : > { %13426 = vmatpush1.bf16.msra.mxu1 %v19713_v32  ;;  %13044 = vmatprep.subr.bf16.mxu0 %v19714_v25 }
 0x461   : > { %13428 = vmatprep.subr.bf16.mxu1 %v19714_v25  ;;  %v4383_v21 = vpop.f32.mrb[2].mxu0 }
 0x462   : > { %v5719_v23 = vpop.f32.mrb[2].mxu1  ;;  %v4388_v28 = vmul.f32 %v4383_v21, %v3100_v51  ;;  %v4385_v11 = vpop.f32.mrb[3].mxu0  ;;  %v20082_v51 = vand.u32 4294901760, %v17452_v48  ;;  %v20085_v21 = vld [vmem:[#allocation106_spill] sm:$0xff]  ;;  %v20089_v48 = vld [vmem:[#allocation85_spill] sm:$0xff] }
 0x463   : > { %v5721_v7 = vpop.f32.mrb[3].mxu1  ;;  %v4389_v26 = vmul.f32 %v4385_v11, %v3101_v18  ;;  %13046 = vmatpush1.bf16.msra.mxu0 %v19715_v61  ;;  %v5724_v40 = vmul.f32 %v5719_v23, %v4436_v14  ;;  %v20083_v18 = vand.u32 4294901760, %v17455_v20  ;;  %v20084_v14 = vld [vmem:[#allocation84_spill] sm:$0xff]  ;;  %v20086_v23 = vld [vmem:[#allocation37_spill] sm:$0xff]  ;;  %v20090_v20 = vld [vmem:[#allocation87_spill] sm:$0xff] }
 0x464   : > { %13430 = vmatpush1.bf16.msra.mxu1 %v19715_v61  ;;  %v4390_v56 = vadd.f32 %v4388_v28, %v17189_v36  ;;  %13048 = vmatprep.subr.bf16.mxu0 %v19716_v19  ;;  %v5725_v41 = vmul.f32 %v5721_v7, %v4437_v46  ;;  %v20075_v36 = vld [vmem:[#allocation80_spill] sm:$0xff]  ;;  %v20087_v46 = vld [vmem:[#allocation38_spill] sm:$0xff]  ;;  %v20088_v28 = vld [vmem:[#allocation107_spill] sm:$0xff] }
 0x465   : > { %13432 = vmatprep.subr.bf16.mxu1 %v19716_v19  ;;  %v4391_v34 = vadd.f32 %v4389_v26, %v17193_v0  ;;  %v20076_v0 = vld [vmem:[#allocation81_spill] sm:$0xff]  ;;  %v20091_v11 = vld [vmem:[#allocation95_spill] sm:$0xff]  ;;  %v20093_v26 = vld [vmem:[#allocation102_spill] sm:$0xff] }
 0x466   : > { %v17721_v39 = vadd.f32 %v5724_v40, %v4390_v56  ;;  %v20092_v7 = vld [vmem:[#allocation99_spill] sm:$0xff]  ;;  %v20094_v56 = vld [vmem:[#allocation105_spill] sm:$0xff] }
 0x467   : > { %v17723_v45 = vadd.f32 %v5725_v41, %v4391_v34  ;;  %13050 = vmatpush1.bf16.msra.mxu0 %v19717_v60  ;;  %v20095_v40 = vld [vmem:[#allocation17_spill] sm:$0xff]  ;;  %v20096_v34 = vld [vmem:[#allocation110_spill] sm:$0xff]  ;;  %v20097_v41 = vld [vmem:[#allocation111_spill] sm:$0xff] }
 0x468   : > { %13434 = vmatpush1.bf16.msra.mxu1 %v19717_v60  ;;  %13052 = vmatprep.subr.bf16.mxu0 %v19718_v2 }
 0x469   : > { %13436 = vmatprep.subr.bf16.mxu1 %v19718_v2 }
 0x46b   : > { %13054 = vmatpush1.bf16.msra.mxu0 %v19719_v55 }
 0x46c   : > { %13438 = vmatpush1.bf16.msra.mxu1 %v19719_v55  ;;  %13056 = vmatprep.subr.bf16.mxu0 %v19720_v42 }
 0x46d   : > { %13440 = vmatprep.subr.bf16.mxu1 %v19720_v42 }
 0x46f   : > { %13058 = vmatpush1.bf16.msra.mxu0 %v19721_v29 }
 0x470   : > { %13442 = vmatpush1.bf16.msra.mxu1 %v19721_v29  ;;  %13060 = vmatprep.subr.bf16.mxu0 %v19722_v59 }
 0x471   : > { %13444 = vmatprep.subr.bf16.mxu1 %v19722_v59 }
 0x473   : > { %13062 = vmatpush1.bf16.msra.mxu0 %v19723_v52 }
 0x474   : > { %13446 = vmatpush1.bf16.msra.mxu1 %v19723_v52  ;;  %13064 = vmatprep.subr.bf16.mxu0 %v19870_v50 }
 0x475   : > { %13448 = vmatprep.subr.bf16.mxu1 %v19870_v50 }
 0x477   : > { %13066 = vmatpush1.bf16.msra.mxu0 %v19874_v54 }
 0x478   : > { %13450 = vmatpush1.bf16.msra.mxu1 %v19874_v54  ;;  %13068 = vmatprep.subr.bf16.mxu0 %v19875_v63 }
 0x479   : > { %13452 = vmatprep.subr.bf16.mxu1 %v19875_v63 }
 0x47b   : > { %13070 = vmatpush1.bf16.msra.mxu0 %v19876_v35 }
 0x47c   : > { %13454 = vmatpush1.bf16.msra.mxu1 %v19876_v35  ;;  %13072 = vmatprep.subr.bf16.mxu0 %v19877_v53 }
 0x47d   : > { %13456 = vmatprep.subr.bf16.mxu1 %v19877_v53 }
 0x47f   : > { %13074 = vmatpush1.bf16.msra.mxu0 %v19880_v6 }
 0x480   : > { %13458 = vmatpush1.bf16.msra.mxu1 %v19880_v6  ;;  %13076 = vmatprep.subr.bf16.mxu0 %v20075_v36 }
 0x481   : > { %13460 = vmatprep.subr.bf16.mxu1 %v20075_v36 }
 0x483   : > { %13078 = vmatpush1.bf16.msra.mxu0 %v20076_v0 }
 0x484   : > { %13462 = vmatpush1.bf16.msra.mxu1 %v20076_v0  ;;  %13080 = vmatprep.subr.bf16.mxu0 %v20077_v17 }
 0x485   : > { %13464 = vmatprep.subr.bf16.mxu1 %v20077_v17 }
 0x487   : > { %13082 = vmatpush1.bf16.msra.mxu0 %v20078_v16 }
 0x488   : > { %13466 = vmatpush1.bf16.msra.mxu1 %v20078_v16  ;;  %13084 = vmatprep.subr.bf16.mxu0 %v20079_v37 }
 0x489   : > { %13468 = vmatprep.subr.bf16.mxu1 %v20079_v37 }
 0x48b   : > { %13086 = vmatpush1.bf16.msra.mxu0 %v20080_v38 }
 0x48c   : > { %13470 = vmatpush1.bf16.msra.mxu1 %v20080_v38  ;;  %13088 = vmatprep.subr.bf16.mxu0 %v20081_v62 }
 0x48d   : > { %13472 = vmatprep.subr.bf16.mxu1 %v20081_v62 }
 0x48e   : > { %6652 = vmatmul.mubr.f32.vlgmr.msra.gmra.mrb[4].mxu0 %v20082_v51  ;;  %v20098_v51 = vld [vmem:[#allocation18_spill] sm:$0xff] }
 0x48f   : > { %7988 = vmatmul.mubr.f32.vlgmr.msra.gmra.mrb[4].mxu1 %v20083_v18  ;;  %13090 = vmatpush1.bf16.msra.mxu0 %v20084_v14  ;;  %v20099_v18 = vld [vmem:[#allocation19_spill] sm:$0xff] }
 0x490   : > { %13474 = vmatpush1.bf16.msra.mxu1 %v20084_v14  ;;  %13092 = vmatprep.subr.bf16.mxu0 %v20085_v21  ;;  %v20185_v14 = vld [vmem:[#allocation97_spill] sm:$0xff] }
 0x491   : > { %13476 = vmatprep.subr.bf16.mxu1 %v20085_v21  ;;  %6915 = vmatprep.mubr.f32.mxu0 %v20086_v23  ;;  %v20123_v21 = vld [vmem:[#allocation90_spill] sm:$0xff] }
 0x492   : > { %8251 = vmatprep.mubr.f32.mxu1 %v20087_v46 }
 0x493   : > { %13094 = vmatpush1.bf16.msra.mxu0 %v20088_v28 }
 0x494   : > { %13478 = vmatpush1.bf16.msra.mxu1 %v20088_v28  ;;  %13096 = vmatprep.subr.bf16.mxu0 %v20089_v48 }
 0x495   : > { %13480 = vmatprep.subr.bf16.mxu1 %v20089_v48 }
 0x497   : > { %13098 = vmatpush1.bf16.msra.mxu0 %v20090_v20 }
 0x498   : > { %13482 = vmatpush1.bf16.msra.mxu1 %v20090_v20  ;;  %13100 = vmatprep.subr.bf16.mxu0 %v20091_v11 }
 0x499   : > { %13484 = vmatprep.subr.bf16.mxu1 %v20091_v11 }
 0x49b   : > { %13102 = vmatpush1.bf16.msra.mxu0 %v20092_v7 }
 0x49c   : > { %13486 = vmatpush1.bf16.msra.mxu1 %v20092_v7  ;;  %13104 = vmatprep.subr.bf16.mxu0 %v20093_v26 }
 0x49d   : > { %13488 = vmatprep.subr.bf16.mxu1 %v20093_v26 }
 0x49f   : > { %13106 = vmatpush1.bf16.msra.mxu0 %v20094_v56 }
 0x4a0   : > { %13490 = vmatpush1.bf16.msra.mxu1 %v20094_v56  ;;  %13108 = vmatprep.subr.bf16.mxu0 %v20095_v40  ;;  %v20100_v56 = vld [vmem:[#allocation20_spill] sm:$0xff] }
 0x4a1   : > { %13492 = vmatprep.subr.bf16.mxu1 %v20095_v40  ;;  %v20101_v40 = vld [vmem:[#allocation21_spill] sm:$0xff] }
 0x4a3   : > { %13110 = vmatpush1.bf16.msra.mxu0 %v20096_v34 }
 0x4a4   : > { %13494 = vmatpush1.bf16.msra.mxu1 %v20096_v34  ;;  %13112 = vmatprep.subr.bf16.mxu0 %v20097_v41  ;;  %v20102_v34 = vld [vmem:[#allocation22_spill] sm:$0xff] }
 0x4a5   : > { %13496 = vmatprep.subr.bf16.mxu1 %v20097_v41  ;;  %v20103_v41 = vld [vmem:[#allocation23_spill] sm:$0xff] }
 0x4a7   : > { %13114 = vmatpush1.bf16.msra.mxu0 %v20098_v51 }
 0x4a8   : > { %13498 = vmatpush1.bf16.msra.mxu1 %v20098_v51  ;;  %13116 = vmatprep.subr.bf16.mxu0 %v20099_v18  ;;  %v20104_v51 = vld [vmem:[#allocation29_spill] sm:$0xff] }
 0x4a9   : > { %13500 = vmatprep.subr.bf16.mxu1 %v20099_v18  ;;  %v20105_v18 = vld [vmem:[#allocation30_spill] sm:$0xff] }
 0x4ab   : > { %13118 = vmatpush1.bf16.msra.mxu0 %v20100_v56 }
 0x4ac   : > { %13502 = vmatpush1.bf16.msra.mxu1 %v20100_v56  ;;  %13120 = vmatprep.subr.bf16.mxu0 %v20101_v40  ;;  %v20106_v56 = vld [vmem:[#allocation34_spill] sm:$0xff] }
 0x4ad   : > { %13504 = vmatprep.subr.bf16.mxu1 %v20101_v40  ;;  %v20107_v40 = vld [vmem:[#allocation35_spill] sm:$0xff] }
 0x4af   : > { %13122 = vmatpush1.bf16.msra.mxu0 %v20102_v34 }
 0x4b0   : > { %13506 = vmatpush1.bf16.msra.mxu1 %v20102_v34  ;;  %13124 = vmatprep.subr.bf16.mxu0 %v20103_v41  ;;  %v20108_v34 = vld [vmem:[#allocation39_spill] sm:$0xff] }
 0x4b1   : > { %13508 = vmatprep.subr.bf16.mxu1 %v20103_v41  ;;  %v20109_v41 = vld [vmem:[#allocation43_spill] sm:$0xff] }
 0x4b3   : > { %13126 = vmatpush1.bf16.msra.mxu0 %v20104_v51 }
 0x4b4   : > { %13510 = vmatpush1.bf16.msra.mxu1 %v20104_v51  ;;  %13128 = vmatprep.subr.bf16.mxu0 %v20105_v18  ;;  %v20110_v51 = vld [vmem:[#allocation51_spill] sm:$0xff] }
 0x4b5   : > { %13512 = vmatprep.subr.bf16.mxu1 %v20105_v18  ;;  %v20111_v18 = vld [vmem:[#allocation52_spill] sm:$0xff] }
 0x4b7   : > { %13130 = vmatpush1.bf16.msra.mxu0 %v20106_v56 }
 0x4b8   : > { %13514 = vmatpush1.bf16.msra.mxu1 %v20106_v56  ;;  %13132 = vmatprep.subr.bf16.mxu0 %v20107_v40  ;;  %v20112_v56 = vld [vmem:[#allocation53_spill] sm:$0xff] }
 0x4b9   : > { %13516 = vmatprep.subr.bf16.mxu1 %v20107_v40  ;;  %v20113_v40 = vld [vmem:[#allocation54_spill] sm:$0xff] }
 0x4bb   : > { %13134 = vmatpush1.bf16.msra.mxu0 %v20108_v34 }
 0x4bc   : > { %13518 = vmatpush1.bf16.msra.mxu1 %v20108_v34  ;;  %13136 = vmatprep.subr.bf16.mxu0 %v20109_v41  ;;  %v20114_v34 = vld [vmem:[#allocation55_spill] sm:$0xff] }
 0x4bd   : > { %13520 = vmatprep.subr.bf16.mxu1 %v20109_v41  ;;  %v20115_v41 = vld [vmem:[#allocation58_spill] sm:$0xff] }
 0x4bf   : > { %13138 = vmatpush1.bf16.msra.mxu0 %v20110_v51 }
 0x4c0   : > { %13522 = vmatpush1.bf16.msra.mxu1 %v20110_v51  ;;  %13140 = vmatprep.subr.bf16.mxu0 %v20111_v18  ;;  %v20116_v51 = vld [vmem:[#allocation59_spill] sm:$0xff] }
 0x4c1   : > { %13524 = vmatprep.subr.bf16.mxu1 %v20111_v18  ;;  %v20118_v18 = vld [vmem:[#allocation41_spill] sm:$0xff] }
 0x4c3   : > { %13142 = vmatpush1.bf16.msra.mxu0 %v20112_v56 }
 0x4c4   : > { %13526 = vmatpush1.bf16.msra.mxu1 %v20112_v56  ;;  %13144 = vmatprep.subr.bf16.mxu0 %v20113_v40  ;;  %v20117_v56 = vld [vmem:[#allocation40_spill] sm:$0xff] }
 0x4c5   : > { %13528 = vmatprep.subr.bf16.mxu1 %v20113_v40 }
 0x4c7   : > { %13146 = vmatpush1.bf16.msra.mxu0 %v20114_v34 }
 0x4c8   : > { %13530 = vmatpush1.bf16.msra.mxu1 %v20114_v34  ;;  %13148 = vmatprep.subr.bf16.mxu0 %v20115_v41 }
 0x4c9   : > { %13532 = vmatprep.subr.bf16.mxu1 %v20115_v41 }
 0x4cb   : > { %13150 = vmatpush1.bf16.msra.mxu0 %v20116_v51 }
 0x4cc   : > { %13534 = vmatpush1.bf16.msra.mxu1 %v20116_v51  ;;  %13152 = vmatprep.subr.bf16.mxu0 %v19700_v22 }
 0x4cd   : > { %13536 = vmatprep.subr.bf16.mxu1 %v19700_v22 }
 0x4ce   : > { %6917 = vmatmul.mubr.f32.vlgmr.msra.gmra.mrb[4].mxu0 %v20117_v56 }
 0x4cf   : > { %8253 = vmatmul.mubr.f32.vlgmr.msra.gmra.mrb[4].mxu1 %v20118_v18  ;;  %13154 = vmatpush1.bf16.msra.mxu0 %v19703_v49 }
 0x4d0   : > { %13538 = vmatpush1.bf16.msra.mxu1 %v19703_v49  ;;  %13156 = vmatprep.subr.bf16.mxu0 %v19704_v47 }
 0x4d1   : > { %13540 = vmatprep.subr.bf16.mxu1 %v19704_v47  ;;  %7052 = vmatprep.mubr.f32.mxu0 %v20086_v23  ;;  %v14535_v23 = vld [vmem:[%s14920_s5 + $0x8] sm:$0xff] }
 0x4d2   : > { %8388 = vmatprep.mubr.f32.mxu1 %v20087_v46  ;;  %v8447_v46 = vmul.f32 %v14535_v23, %v17153_v31  ;;  %v9783_v51 = vmul.f32 %v14535_v23, %v17170_v12 }
 0x4d3   : > { %13158 = vmatpush1.bf16.msra.mxu0 %v19707_v24 }
 0x4d4   : > { %13542 = vmatpush1.bf16.msra.mxu1 %v19707_v24  ;;  %13160 = vmatprep.subr.bf16.mxu0 %v19708_v33  ;;  %v17890_v41 = vand.u32 4294901760, %v8447_v46  ;;  %v17892_v34 = vand.u32 4294901760, %v9783_v51 }
 0x4d5   : > { %13544 = vmatprep.subr.bf16.mxu1 %v19708_v33 }
 0x4d6   : > { %20119 = vst [vmem:[#allocation42_spill] sm:$0xff] %v17890_v41  ;;  %20120 = vst [vmem:[#allocation44_spill] sm:$0xff] %v17892_v34  ;;  %v17899_v23 = vsub.f32 %v8447_v46, %v17890_v41  ;;  %v17902_v40 = vsub.f32 %v9783_v51, %v17892_v34 }
 0x4d7   : > { %13162 = vmatpush1.bf16.msra.mxu0 %v19709_v3 }
 0x4d8   : > { %13546 = vmatpush1.bf16.msra.mxu1 %v19709_v3  ;;  %13164 = vmatprep.subr.bf16.mxu0 %v19710_v30  ;;  %v19251_v26 = vand.u32 4294901760, %v17899_v23  ;;  %v19250_v7 = vand.u32 4294901760, %v17902_v40 }
 0x4d9   : > { %13548 = vmatprep.subr.bf16.mxu1 %v19710_v30 }
 0x4da   : > { %v8579_v51 = vsub.f32 %v17899_v23, %v19251_v26  ;;  %v9915_v46 = vsub.f32 %v17902_v40, %v19250_v7 }
 0x4db   : > { %13166 = vmatpush1.bf16.msra.mxu0 %v19711_v15 }
 0x4dc   : > { %13550 = vmatpush1.bf16.msra.mxu1 %v19711_v15  ;;  %13168 = vmatprep.subr.bf16.mxu0 %v19712_v5  ;;  %v8580_v11 = vand.u32 4294901760, %v8579_v51  ;;  %v9916_v20 = vand.u32 4294901760, %v9915_v46 }
 0x4dd   : > { %13552 = vmatprep.subr.bf16.mxu1 %v19712_v5 }
 0x4df   : > { %13170 = vmatpush1.bf16.msra.mxu0 %v19713_v32 }
 0x4e0   : > { %13554 = vmatpush1.bf16.msra.mxu1 %v19713_v32  ;;  %13172 = vmatprep.subr.bf16.mxu0 %v19714_v25 }
 0x4e1   : > { %13556 = vmatprep.subr.bf16.mxu1 %v19714_v25 }
 0x4e3   : > { %13174 = vmatpush1.bf16.msra.mxu0 %v19715_v61 }
 0x4e4   : > { %13558 = vmatpush1.bf16.msra.mxu1 %v19715_v61  ;;  %13176 = vmatprep.subr.bf16.mxu0 %v19716_v19 }
 0x4e5   : > { %13560 = vmatprep.subr.bf16.mxu1 %v19716_v19 }
 0x4e7   : > { %13178 = vmatpush1.bf16.msra.mxu0 %v19717_v60 }
 0x4e8   : > { %13562 = vmatpush1.bf16.msra.mxu1 %v19717_v60  ;;  %13180 = vmatprep.subr.bf16.mxu0 %v19718_v2 }
 0x4e9   : > { %13564 = vmatprep.subr.bf16.mxu1 %v19718_v2 }
 0x4eb   : > { %13182 = vmatpush1.bf16.msra.mxu0 %v19719_v55 }
 0x4ec   : > { %13566 = vmatpush1.bf16.msra.mxu1 %v19719_v55  ;;  %13184 = vmatprep.subr.bf16.mxu0 %v19720_v42 }
 0x4ed   : > { %13568 = vmatprep.subr.bf16.mxu1 %v19720_v42 }
 0x4ef   : > { %13186 = vmatpush1.bf16.msra.mxu0 %v19721_v29 }
 0x4f0   : > { %13570 = vmatpush1.bf16.msra.mxu1 %v19721_v29  ;;  %13188 = vmatprep.subr.bf16.mxu0 %v19722_v59 }
 0x4f1   : > { %13572 = vmatprep.subr.bf16.mxu1 %v19722_v59 }
 0x4f3   : > { %13190 = vmatpush1.bf16.msra.mxu0 %v19723_v52 }
 0x4f4   : > { %13574 = vmatpush1.bf16.msra.mxu1 %v19723_v52  ;;  %13192 = vmatprep.subr.bf16.mxu0 %v19870_v50 }
 0x4f5   : > { %13576 = vmatprep.subr.bf16.mxu1 %v19870_v50 }
 0x4f7   : > { %13194 = vmatpush1.bf16.msra.mxu0 %v19874_v54 }
 0x4f8   : > { %13578 = vmatpush1.bf16.msra.mxu1 %v19874_v54  ;;  %13196 = vmatprep.subr.bf16.mxu0 %v19875_v63 }
 0x4f9   : > { %13580 = vmatprep.subr.bf16.mxu1 %v19875_v63 }
 0x4fb   : > { %13198 = vmatpush1.bf16.msra.mxu0 %v19876_v35 }
 0x4fc   : > { %13582 = vmatpush1.bf16.msra.mxu1 %v19876_v35  ;;  %13200 = vmatprep.subr.bf16.mxu0 %v19877_v53 }
 0x4fd   : > { %13584 = vmatprep.subr.bf16.mxu1 %v19877_v53 }
 0x4ff   : > { %13202 = vmatpush1.bf16.msra.mxu0 %v19880_v6 }
 0x500   : > { %13586 = vmatpush1.bf16.msra.mxu1 %v19880_v6  ;;  %13204 = vmatprep.subr.bf16.mxu0 %v20075_v36 }
 0x501   : > { %13588 = vmatprep.subr.bf16.mxu1 %v20075_v36 }
 0x503   : > { %13206 = vmatpush1.bf16.msra.mxu0 %v20076_v0 }
 0x504   : > { %13590 = vmatpush1.bf16.msra.mxu1 %v20076_v0  ;;  %13208 = vmatprep.subr.bf16.mxu0 %v20077_v17 }
 0x505   : > { %13592 = vmatprep.subr.bf16.mxu1 %v20077_v17 }
 0x507   : > { %13210 = vmatpush1.bf16.msra.mxu0 %v20078_v16 }
 0x508   : > { %13594 = vmatpush1.bf16.msra.mxu1 %v20078_v16  ;;  %13212 = vmatprep.subr.bf16.mxu0 %v20079_v37 }
 0x509   : > { %13596 = vmatprep.subr.bf16.mxu1 %v20079_v37 }
 0x50b   : > { %13214 = vmatpush1.bf16.msra.mxu0 %v20080_v38 }
 0x50c   : > { %13598 = vmatpush1.bf16.msra.mxu1 %v20080_v38  ;;  %13600 = vmatprep.subr.bf16.mxu0 %v19700_v22 }
 0x50d   : > { %13984 = vmatprep.subr.bf16.mxu1 %v19700_v22 }
 0x50e   : > { %7054 = vmatmul.mubr.f32.vlgmr.msra.gmra.mrb[4].mxu0 %v20117_v56 }
 0x50f   : > { %8390 = vmatmul.mubr.f32.vlgmr.msra.gmra.mrb[4].mxu1 %v20118_v18  ;;  %13602 = vmatpush1.bf16.msra.mxu0 %v19703_v49 }
 0x510   : > { %13986 = vmatpush1.bf16.msra.mxu1 %v19703_v49  ;;  %13604 = vmatprep.subr.bf16.mxu0 %v19704_v47 }
 0x511   : > { %13988 = vmatprep.subr.bf16.mxu1 %v19704_v47  ;;  %8581 = vmatprep.mubr.f32.mxu0 %v8580_v11 }
 0x512   : > { %9917 = vmatprep.mubr.f32.mxu1 %v9916_v20  ;;  %v14536_v20 = vld [vmem:[%s14920_s5] sm:$0xff]  ;;  %s11256_s5 = sld [smem:[#allocation10 + $0x4]] }
 0x513   : > { %13606 = vmatpush1.bf16.msra.mxu0 %v19707_v24  ;;  %v8446_v11 = vmul.f32 %v14536_v20, %v17138_v1  ;;  %v9782_v56 = vmul.f32 %v14536_v20, %v17160_v43 }
 0x514   : > { %13990 = vmatpush1.bf16.msra.mxu1 %v19707_v24  ;;  %13608 = vmatprep.subr.bf16.mxu0 %v19708_v33 }
 0x515   : > { %13992 = vmatprep.subr.bf16.mxu1 %v19708_v33  ;;  %v17973_v18 = vand.u32 4294901760, %v8446_v11  ;;  %v17975_v51 = vand.u32 4294901760, %v9782_v56 }
 0x517   : > { %13610 = vmatpush1.bf16.msra.mxu0 %v19709_v3  ;;  %20121 = vst [vmem:[#allocation46_spill] sm:$0xff] %v17973_v18  ;;  %20122 = vst [vmem:[#allocation47_spill] sm:$0xff] %v17975_v51  ;;  %v17982_v46 = vsub.f32 %v8446_v11, %v17973_v18  ;;  %v17985_v20 = vsub.f32 %v9782_v56, %v17975_v51 }
 0x518   : > { %13994 = vmatpush1.bf16.msra.mxu1 %v19709_v3  ;;  %13612 = vmatprep.subr.bf16.mxu0 %v19710_v30 }
 0x519   : > { %13996 = vmatprep.subr.bf16.mxu1 %v19710_v30  ;;  %v19256_v7 = vand.u32 4294901760, %v17982_v46  ;;  %v19255_v26 = vand.u32 4294901760, %v17985_v20 }
 0x51b   : > { %13614 = vmatpush1.bf16.msra.mxu0 %v19711_v15  ;;  %v8585_v11 = vsub.f32 %v17982_v46, %v19256_v7  ;;  %v9921_v56 = vsub.f32 %v17985_v20, %v19255_v26  ;;  %v20124_v26 = vld [vmem:[#allocation92_spill] sm:$0xff]  ;;  %v20125_v7 = vld [vmem:[#allocation93_spill] sm:$0xff] }
 0x51c   : > { %13998 = vmatpush1.bf16.msra.mxu1 %v19711_v15  ;;  %13616 = vmatprep.subr.bf16.mxu0 %v19712_v5 }
 0x51d   : > { %14000 = vmatprep.subr.bf16.mxu1 %v19712_v5  ;;  %v8586_v48 = vand.u32 4294901760, %v8585_v11  ;;  %v9922_v28 = vand.u32 4294901760, %v9921_v56  ;;  %v20126_v11 = vld [vmem:[#allocation94_spill] sm:$0xff]  ;;  %v20127_v56 = vld [vmem:[#allocation112_spill] sm:$0xff] }
 0x51f   : > { %13618 = vmatpush1.bf16.msra.mxu0 %v19713_v32 }
 0x520   : > { %14002 = vmatpush1.bf16.msra.mxu1 %v19713_v32  ;;  %13620 = vmatprep.subr.bf16.mxu0 %v19714_v25 }
 0x521   : > { %14004 = vmatprep.subr.bf16.mxu1 %v19714_v25 }
 0x523   : > { %13622 = vmatpush1.bf16.msra.mxu0 %v19715_v61 }
 0x524   : > { %14006 = vmatpush1.bf16.msra.mxu1 %v19715_v61  ;;  %13624 = vmatprep.subr.bf16.mxu0 %v19716_v19 }
 0x525   : > { %14008 = vmatprep.subr.bf16.mxu1 %v19716_v19 }
 0x527   : > { %13626 = vmatpush1.bf16.msra.mxu0 %v19717_v60 }
 0x528   : > { %14010 = vmatpush1.bf16.msra.mxu1 %v19717_v60  ;;  %13628 = vmatprep.subr.bf16.mxu0 %v19718_v2 }
 0x529   : > { %14012 = vmatprep.subr.bf16.mxu1 %v19718_v2 }
 0x52b   : > { %13630 = vmatpush1.bf16.msra.mxu0 %v19719_v55 }
 0x52c   : > { %14014 = vmatpush1.bf16.msra.mxu1 %v19719_v55  ;;  %13632 = vmatprep.subr.bf16.mxu0 %v19720_v42 }
 0x52d   : > { %14016 = vmatprep.subr.bf16.mxu1 %v19720_v42 }
 0x52f   : > { %13634 = vmatpush1.bf16.msra.mxu0 %v19721_v29 }
 0x530   : > { %14018 = vmatpush1.bf16.msra.mxu1 %v19721_v29  ;;  %13636 = vmatprep.subr.bf16.mxu0 %v19722_v59 }
 0x531   : > { %14020 = vmatprep.subr.bf16.mxu1 %v19722_v59 }
 0x533   : > { %13638 = vmatpush1.bf16.msra.mxu0 %v19723_v52 }
 0x534   : > { %14022 = vmatpush1.bf16.msra.mxu1 %v19723_v52  ;;  %13640 = vmatprep.subr.bf16.mxu0 %v19870_v50 }
 0x535   : > { %14024 = vmatprep.subr.bf16.mxu1 %v19870_v50 }
 0x537   : > { %13642 = vmatpush1.bf16.msra.mxu0 %v19874_v54 }
 0x538   : > { %14026 = vmatpush1.bf16.msra.mxu1 %v19874_v54  ;;  %13644 = vmatprep.subr.bf16.mxu0 %v19875_v63 }
 0x539   : > { %14028 = vmatprep.subr.bf16.mxu1 %v19875_v63 }
 0x53b   : > { %13646 = vmatpush1.bf16.msra.mxu0 %v19876_v35 }
 0x53c   : > { %14030 = vmatpush1.bf16.msra.mxu1 %v19876_v35  ;;  %13648 = vmatprep.subr.bf16.mxu0 %v19877_v53 }
 0x53d   : > { %14032 = vmatprep.subr.bf16.mxu1 %v19877_v53 }
 0x53f   : > { %13650 = vmatpush1.bf16.msra.mxu0 %v19880_v6 }
 0x540   : > { %14034 = vmatpush1.bf16.msra.mxu1 %v19880_v6  ;;  %13652 = vmatprep.subr.bf16.mxu0 %v20075_v36 }
 0x541   : > { %14036 = vmatprep.subr.bf16.mxu1 %v20075_v36 }
 0x543   : > { %13654 = vmatpush1.bf16.msra.mxu0 %v20076_v0 }
 0x544   : > { %14038 = vmatpush1.bf16.msra.mxu1 %v20076_v0  ;;  %13656 = vmatprep.subr.bf16.mxu0 %v20077_v17  ;;  %v7075_v0 = vstv %s18135_s29  ;;  %s11274_s29 = sld [smem:[#allocation10 + $0x106]] }
 0x545   : > { %14040 = vmatprep.subr.bf16.mxu1 %v20077_v17 }
 0x547   : > { %13658 = vmatpush1.bf16.msra.mxu0 %v20078_v16 }
 0x548   : > { %14042 = vmatpush1.bf16.msra.mxu1 %v20078_v16  ;;  %13660 = vmatprep.subr.bf16.mxu0 %v20079_v37 }
 0x549   : > { %14044 = vmatprep.subr.bf16.mxu1 %v20079_v37  ;;  %v20187_v37 = vld [vmem:[#allocation158_spill] sm:$0xff] }
 0x54b   : > { %13662 = vmatpush1.bf16.msra.mxu0 %v20080_v38 }
 0x54c   : > { %14046 = vmatpush1.bf16.msra.mxu1 %v20080_v38  ;;  %13664 = vmatprep.subr.bf16.mxu0 %v20123_v21 }
 0x54d   : > { %14048 = vmatprep.subr.bf16.mxu1 %v20123_v21  ;;  %v20128_v21 = vld [vmem:[#allocation113_spill] sm:$0xff] }
 0x54e   : > { %8587 = vmatmul.mubr.f32.vlgmr.msra.gmra.mrb[6].mxu0 %v8586_v48  ;;  %v20130_v48 = vld [vmem:[#allocation115_spill] sm:$0xff] }
 0x54f   : > { %9923 = vmatmul.mubr.f32.vlgmr.msra.gmra.mrb[6].mxu1 %v9922_v28  ;;  %13666 = vmatpush1.bf16.msra.mxu0 %v20124_v26  ;;  %v20129_v28 = vld [vmem:[#allocation114_spill] sm:$0xff] }
 0x550   : > { %14050 = vmatpush1.bf16.msra.mxu1 %v20124_v26  ;;  %13668 = vmatprep.subr.bf16.mxu0 %v20125_v7  ;;  %v20132_v26 = vld [vmem:[#allocation25_spill] sm:$0xff] }
 0x551   : > { %14052 = vmatprep.subr.bf16.mxu1 %v20125_v7  ;;  %8978 = vmatprep.mubr.f32.mxu0 %v17890_v41  ;;  %v20131_v7 = vld [vmem:[#allocation24_spill] sm:$0xff]  ;;  %v20184_v41 = vld [vmem:[#allocation157_spill] sm:$0xff] }
 0x552   : > { %10314 = vmatprep.mubr.f32.mxu1 %v17892_v34 }
 0x553   : > { %13670 = vmatpush1.bf16.msra.mxu0 %v20126_v11 }
 0x554   : > { %14054 = vmatpush1.bf16.msra.mxu1 %v20126_v11  ;;  %13672 = vmatprep.subr.bf16.mxu0 %v20127_v56  ;;  %v20133_v11 = vld [vmem:[#allocation28_spill] sm:$0xff] }
 0x555   : > { %14056 = vmatprep.subr.bf16.mxu1 %v20127_v56  ;;  %v20134_v56 = vld [vmem:[#allocation116_spill] sm:$0xff] }
 0x557   : > { %13674 = vmatpush1.bf16.msra.mxu0 %v20128_v21 }
 0x558   : > { %14058 = vmatpush1.bf16.msra.mxu1 %v20128_v21  ;;  %13676 = vmatprep.subr.bf16.mxu0 %v20129_v28  ;;  %v20135_v21 = vld [vmem:[#allocation117_spill] sm:$0xff] }
 0x559   : > { %14060 = vmatprep.subr.bf16.mxu1 %v20129_v28  ;;  %v20136_v28 = vld [vmem:[#allocation118_spill] sm:$0xff] }
 0x55b   : > { %13678 = vmatpush1.bf16.msra.mxu0 %v20130_v48 }
 0x55c   : > { %14062 = vmatpush1.bf16.msra.mxu1 %v20130_v48  ;;  %13680 = vmatprep.subr.bf16.mxu0 %v20131_v7  ;;  %v20137_v48 = vld [vmem:[#allocation119_spill] sm:$0xff] }
 0x55d   : > { %14064 = vmatprep.subr.bf16.mxu1 %v20131_v7  ;;  %v20138_v7 = vld [vmem:[#allocation120_spill] sm:$0xff] }
 0x55f   : > { %13682 = vmatpush1.bf16.msra.mxu0 %v20132_v26 }
 0x560   : > { %14066 = vmatpush1.bf16.msra.mxu1 %v20132_v26  ;;  %13684 = vmatprep.subr.bf16.mxu0 %v20133_v11  ;;  %v20139_v26 = vld [vmem:[#allocation121_spill] sm:$0xff] }
 0x561   : > { %14068 = vmatprep.subr.bf16.mxu1 %v20133_v11  ;;  %v20140_v11 = vld [vmem:[#allocation122_spill] sm:$0xff] }
 0x563   : > { %13686 = vmatpush1.bf16.msra.mxu0 %v20134_v56 }
 0x564   : > { %14070 = vmatpush1.bf16.msra.mxu1 %v20134_v56  ;;  %13688 = vmatprep.subr.bf16.mxu0 %v20135_v21  ;;  %v20141_v56 = vld [vmem:[#allocation123_spill] sm:$0xff] }
 0x565   : > { %14072 = vmatprep.subr.bf16.mxu1 %v20135_v21  ;;  %v20142_v21 = vld [vmem:[#allocation124_spill] sm:$0xff] }
 0x567   : > { %13690 = vmatpush1.bf16.msra.mxu0 %v20136_v28 }
 0x568   : > { %14074 = vmatpush1.bf16.msra.mxu1 %v20136_v28  ;;  %13692 = vmatprep.subr.bf16.mxu0 %v20137_v48  ;;  %v20143_v28 = vld [vmem:[#allocation125_spill] sm:$0xff] }
 0x569   : > { %14076 = vmatprep.subr.bf16.mxu1 %v20137_v48  ;;  %v20144_v48 = vld [vmem:[#allocation126_spill] sm:$0xff] }
 0x56b   : > { %13694 = vmatpush1.bf16.msra.mxu0 %v20138_v7 }
 0x56c   : > { %14078 = vmatpush1.bf16.msra.mxu1 %v20138_v7  ;;  %13696 = vmatprep.subr.bf16.mxu0 %v20139_v26  ;;  %v20145_v7 = vld [vmem:[#allocation131_spill] sm:$0xff] }
 0x56d   : > { %14080 = vmatprep.subr.bf16.mxu1 %v20139_v26  ;;  %v20146_v26 = vld [vmem:[#allocation133_spill] sm:$0xff] }
 0x56f   : > { %13698 = vmatpush1.bf16.msra.mxu0 %v20140_v11 }
 0x570   : > { %14082 = vmatpush1.bf16.msra.mxu1 %v20140_v11  ;;  %13700 = vmatprep.subr.bf16.mxu0 %v20141_v56  ;;  %v20147_v11 = vld [vmem:[#allocation134_spill] sm:$0xff] }
 0x571   : > { %14084 = vmatprep.subr.bf16.mxu1 %v20141_v56  ;;  %v20148_v56 = vld [vmem:[#allocation135_spill] sm:$0xff] }
 0x573   : > { %13702 = vmatpush1.bf16.msra.mxu0 %v20142_v21 }
 0x574   : > { %14086 = vmatpush1.bf16.msra.mxu1 %v20142_v21  ;;  %13704 = vmatprep.subr.bf16.mxu0 %v20143_v28  ;;  %v20149_v21 = vld [vmem:[#allocation136_spill] sm:$0xff] }
 0x575   : > { %14088 = vmatprep.subr.bf16.mxu1 %v20143_v28  ;;  %v20150_v28 = vld [vmem:[#allocation137_spill] sm:$0xff] }
 0x577   : > { %13706 = vmatpush1.bf16.msra.mxu0 %v20144_v48 }
 0x578   : > { %14090 = vmatpush1.bf16.msra.mxu1 %v20144_v48  ;;  %13708 = vmatprep.subr.bf16.mxu0 %v20145_v7  ;;  %v20151_v48 = vld [vmem:[#allocation162_spill] sm:$0xff] }
 0x579   : > { %14092 = vmatprep.subr.bf16.mxu1 %v20145_v7  ;;  %v20152_v7 = vld [vmem:[#allocation163_spill] sm:$0xff] }
 0x57b   : > { %13710 = vmatpush1.bf16.msra.mxu0 %v20146_v26 }
 0x57c   : > { %14094 = vmatpush1.bf16.msra.mxu1 %v20146_v26  ;;  %13712 = vmatprep.subr.bf16.mxu0 %v20147_v11  ;;  %v20153_v26 = vld [vmem:[#allocation164_spill] sm:$0xff] }
 0x57d   : > { %14096 = vmatprep.subr.bf16.mxu1 %v20147_v11  ;;  %v20154_v11 = vld [vmem:[#allocation165_spill] sm:$0xff] }
 0x57f   : > { %13714 = vmatpush1.bf16.msra.mxu0 %v20148_v56 }
 0x580   : > { %14098 = vmatpush1.bf16.msra.mxu1 %v20148_v56  ;;  %13716 = vmatprep.subr.bf16.mxu0 %v20149_v21  ;;  %v20155_v56 = vld [vmem:[#allocation68_spill] sm:$0xff] }
 0x581   : > { %14100 = vmatprep.subr.bf16.mxu1 %v20149_v21  ;;  %v20156_v21 = vld [vmem:[#allocation70_spill] sm:$0xff] }
 0x583   : > { %13718 = vmatpush1.bf16.msra.mxu0 %v20150_v28 }
 0x584   : > { %14102 = vmatpush1.bf16.msra.mxu1 %v20150_v28  ;;  %13720 = vmatprep.subr.bf16.mxu0 %v20151_v48  ;;  %v20157_v28 = vld [vmem:[#allocation72_spill] sm:$0xff] }
 0x585   : > { %14104 = vmatprep.subr.bf16.mxu1 %v20151_v48  ;;  %v20158_v48 = vld [vmem:[#allocation73_spill] sm:$0xff] }
 0x587   : > { %13722 = vmatpush1.bf16.msra.mxu0 %v20152_v7 }
 0x588   : > { %14106 = vmatpush1.bf16.msra.mxu1 %v20152_v7  ;;  %13724 = vmatprep.subr.bf16.mxu0 %v20153_v26  ;;  %v20159_v7 = vld [vmem:[#allocation75_spill] sm:$0xff] }
 0x589   : > { %14108 = vmatprep.subr.bf16.mxu1 %v20153_v26  ;;  %v20160_v26 = vld [vmem:[#allocation76_spill] sm:$0xff] }
 0x58b   : > { %13726 = vmatpush1.bf16.msra.mxu0 %v20154_v11 }
 0x58c   : > { %14110 = vmatpush1.bf16.msra.mxu1 %v20154_v11  ;;  %13728 = vmatprep.subr.bf16.mxu0 %v20155_v56  ;;  %v20161_v11 = vld [vmem:[#allocation77_spill] sm:$0xff] }
 0x58d   : > { %14112 = vmatprep.subr.bf16.mxu1 %v20155_v56  ;;  %v20162_v56 = vld [vmem:[#allocation78_spill] sm:$0xff] }
 0x58e   : > { %8980 = vmatmul.mubr.f32.vlgmr.msra.gmra.mrb[6].mxu0 %v17973_v18  ;;  %v20183_v18 = vld [vmem:[#allocation101_spill] sm:$0xff] }
 0x58f   : > { %10316 = vmatmul.mubr.f32.vlgmr.msra.gmra.mrb[6].mxu1 %v17975_v51  ;;  %13730 = vmatpush1.bf16.msra.mxu0 %v20156_v21 }
 0x590   : > { %14114 = vmatpush1.bf16.msra.mxu1 %v20156_v21  ;;  %13732 = vmatprep.subr.bf16.mxu0 %v20157_v28  ;;  %v20163_v21 = vld [vmem:[#allocation139_spill] sm:$0xff] }
 0x591   : > { %14116 = vmatprep.subr.bf16.mxu1 %v20157_v28  ;;  %9180 = vmatprep.mubr.f32.mxu0 %v17899_v23  ;;  %v20164_v28 = vld [vmem:[#allocation140_spill] sm:$0xff] }
 0x592   : > { %10516 = vmatprep.mubr.f32.mxu1 %v17902_v40 }
 0x593   : > { %13734 = vmatpush1.bf16.msra.mxu0 %v20158_v48 }
 0x594   : > { %14118 = vmatpush1.bf16.msra.mxu1 %v20158_v48  ;;  %13736 = vmatprep.subr.bf16.mxu0 %v20159_v7  ;;  %v20165_v48 = vld [vmem:[#allocation141_spill] sm:$0xff] }
 0x595   : > { %14120 = vmatprep.subr.bf16.mxu1 %v20159_v7  ;;  %v20166_v7 = vld [vmem:[#allocation142_spill] sm:$0xff] }
 0x597   : > { %13738 = vmatpush1.bf16.msra.mxu0 %v20160_v26 }
 0x598   : > { %14122 = vmatpush1.bf16.msra.mxu1 %v20160_v26  ;;  %13740 = vmatprep.subr.bf16.mxu0 %v20161_v11  ;;  %v20167_v26 = vld [vmem:[#allocation143_spill] sm:$0xff] }
 0x599   : > { %14124 = vmatprep.subr.bf16.mxu1 %v20161_v11  ;;  %v20168_v11 = vld [vmem:[#allocation144_spill] sm:$0xff] }
 0x59b   : > { %13742 = vmatpush1.bf16.msra.mxu0 %v20162_v56 }
 0x59c   : > { %14126 = vmatpush1.bf16.msra.mxu1 %v20162_v56  ;;  %13744 = vmatprep.subr.bf16.mxu0 %v20163_v21  ;;  %v20169_v56 = vld [vmem:[#allocation145_spill] sm:$0xff] }
 0x59d   : > { %14128 = vmatprep.subr.bf16.mxu1 %v20163_v21  ;;  %v20170_v21 = vld [vmem:[#allocation146_spill] sm:$0xff] }
 0x59f   : > { %13746 = vmatpush1.bf16.msra.mxu0 %v20164_v28 }
 0x5a0   : > { %14130 = vmatpush1.bf16.msra.mxu1 %v20164_v28  ;;  %13748 = vmatprep.subr.bf16.mxu0 %v20165_v48  ;;  %v20171_v28 = vld [vmem:[#allocation147_spill] sm:$0xff] }
 0x5a1   : > { %14132 = vmatprep.subr.bf16.mxu1 %v20165_v48  ;;  %v20172_v48 = vld [vmem:[#allocation148_spill] sm:$0xff] }
 0x5a3   : > { %13750 = vmatpush1.bf16.msra.mxu0 %v20166_v7 }
 0x5a4   : > { %14134 = vmatpush1.bf16.msra.mxu1 %v20166_v7  ;;  %13752 = vmatprep.subr.bf16.mxu0 %v20167_v26  ;;  %v20173_v7 = vld [vmem:[#allocation149_spill] sm:$0xff] }
 0x5a5   : > { %14136 = vmatprep.subr.bf16.mxu1 %v20167_v26  ;;  %v20174_v26 = vld [vmem:[#allocation150_spill] sm:$0xff] }
 0x5a7   : > { %13754 = vmatpush1.bf16.msra.mxu0 %v20168_v11 }
 0x5a8   : > { %14138 = vmatpush1.bf16.msra.mxu1 %v20168_v11  ;;  %13756 = vmatprep.subr.bf16.mxu0 %v20169_v56  ;;  %v20175_v11 = vld [vmem:[#allocation151_spill] sm:$0xff] }
 0x5a9   : > { %14140 = vmatprep.subr.bf16.mxu1 %v20169_v56  ;;  %v20176_v56 = vld [vmem:[#allocation152_spill] sm:$0xff] }
 0x5ab   : > { %13758 = vmatpush1.bf16.msra.mxu0 %v20170_v21 }
 0x5ac   : > { %14142 = vmatpush1.bf16.msra.mxu1 %v20170_v21  ;;  %13760 = vmatprep.subr.bf16.mxu0 %v20171_v28  ;;  %v20177_v21 = vld [vmem:[#allocation45_spill] sm:$0xff] }
 0x5ad   : > { %14144 = vmatprep.subr.bf16.mxu1 %v20171_v28  ;;  %v20178_v28 = vld [vmem:[#allocation153_spill] sm:$0xff] }
 0x5af   : > { %13762 = vmatpush1.bf16.msra.mxu0 %v20172_v48 }
 0x5b0   : > { %14146 = vmatpush1.bf16.msra.mxu1 %v20172_v48  ;;  %13764 = vmatprep.subr.bf16.mxu0 %v20173_v7  ;;  %v20179_v48 = vld [vmem:[#allocation154_spill] sm:$0xff] }
 0x5b1   : > { %14148 = vmatprep.subr.bf16.mxu1 %v20173_v7  ;;  %v20180_v7 = vld [vmem:[#allocation155_spill] sm:$0xff] }
 0x5b3   : > { %13766 = vmatpush1.bf16.msra.mxu0 %v20174_v26 }
 0x5b4   : > { %14150 = vmatpush1.bf16.msra.mxu1 %v20174_v26  ;;  %13768 = vmatprep.subr.bf16.mxu0 %v20175_v11  ;;  %v5729_v26 = vstv %s11256_s5  ;;  %s18206_s5 = sld [smem:[#allocation10 + $0x385]] }
 0x5b5   : > { %14152 = vmatprep.subr.bf16.mxu1 %v20175_v11  ;;  %v5733_v11 = vstv %s11257_s13  ;;  %v5731_v62 = vmul.f32 %v20185_v14, %v5729_v26  ;;  %s11272_s13 = sld [smem:[#allocation10 + $0x6]] }
 0x5b6   : > { %v5734_v34 = vmul.f32 %v20183_v18, %v5733_v11 }
 0x5b7   : > { %13770 = vmatpush1.bf16.msra.mxu0 %v20176_v56 }
 0x5b8   : > { %14154 = vmatpush1.bf16.msra.mxu1 %v20176_v56  ;;  %13772 = vmatprep.subr.bf16.mxu0 %v20177_v21  ;;  %v20181_v56 = vld [vmem:[#allocation156_spill] sm:$0xff] }
 0x5b9   : > { %14156 = vmatprep.subr.bf16.mxu1 %v20177_v21  ;;  %v7065_v21 = vstv %s18125_s14  ;;  %s11273_s14 = sld [smem:[#allocation10 + $0x86]] }
 0x5bb   : > { %13774 = vmatpush1.bf16.msra.mxu0 %v20178_v28 }
 0x5bc   : > { %14158 = vmatpush1.bf16.msra.mxu1 %v20178_v28  ;;  %13776 = vmatprep.subr.bf16.mxu0 %v20179_v48  ;;  %v7069_v28 = vstv %s18127_s27  ;;  %s11280_s27 = sld [smem:[#allocation10 + $0x7]] }
 0x5bd   : > { %14160 = vmatprep.subr.bf16.mxu1 %v20179_v48  ;;  %v20182_v48 = vld [vmem:[#allocation100_spill] sm:$0xff]  ;;  %v7070_v17 = vmul.f32 %v20183_v18, %v7069_v28 }
 0x5be   : > { %v5730_v51 = vmul.f32 %v20182_v48, %v5729_v26  ;;  %v7066_v16 = vmul.f32 %v20182_v48, %v7065_v21 }
 0x5bf   : > { %13778 = vmatpush1.bf16.msra.mxu0 %v20180_v7 }
 0x5c0   : > { %14162 = vmatpush1.bf16.msra.mxu1 %v20180_v7  ;;  %13780 = vmatprep.subr.bf16.mxu0 %v20181_v56  ;;  %v5739_v7 = vstv %s18131_s24  ;;  %v5736_v6 = vadd.f32 %v5734_v34, %v5730_v51  ;;  %v7076_v34 = vmul.f32 %v20066_v8, %v7075_v0  ;;  %v7081_v51 = vstv %s18145_s30  ;;  %s11281_s24 = sld [smem:[#allocation10 + $0x87]]  ;;  %s18433_s30 = sld [smem:[#allocation10 + $0x186]] }
 0x5c1   : > { %14164 = vmatprep.subr.bf16.mxu1 %v20181_v56  ;;  %v20186_v56 = vld [vmem:[#allocation98_spill] sm:$0xff]  ;;  %v5740_v26 = vmul.f32 %v20066_v8, %v5739_v7  ;;  %v5741_v48 = vmul.f32 %v20068_v44, %v5739_v7  ;;  %v5757_v7 = vstv %s18169_s23  ;;  %s18445_s23 = sld [smem:[#allocation10 + $0x207]] }
 0x5c2   : > { %v5735_v38 = vmul.f32 %v20186_v56, %v5733_v11  ;;  %v7071_v36 = vmul.f32 %v20186_v56, %v7069_v28  ;;  %v20188_v11 = vld [vmem:[#allocation159_spill] sm:$0xff] }
 0x5c3   : > { %13782 = vmatpush1.bf16.msra.mxu0 %v20184_v41  ;;  %v5742_v56 = vadd.f32 %v5740_v26, %v5736_v6  ;;  %v7082_v6 = vmul.f32 %v20070_v58, %v7081_v51 }
 0x5c4   : > { %14166 = vmatpush1.bf16.msra.mxu1 %v20184_v41  ;;  %13784 = vmatprep.subr.bf16.mxu0 %v20187_v37  ;;  %v7067_v41 = vmul.f32 %v20185_v14, %v7065_v21  ;;  %v5737_v18 = vadd.f32 %v5735_v38, %v5731_v62  ;;  %v7072_v21 = vadd.f32 %v7070_v17, %v7066_v16  ;;  %v5751_v38 = vstv %s18152_s10  ;;  %v20189_v17 = vld [vmem:[#allocation104_spill] sm:$0xff]  ;;  %s18435_s10 = sld [smem:[#allocation10 + $0x187]] }
 0x5c5   : > { %14168 = vmatprep.subr.bf16.mxu1 %v20187_v37  ;;  %v5745_v37 = vstv %s18139_s28  ;;  %v5753_v26 = vmul.f32 %v17103_v13, %v5751_v38  ;;  %s11282_s28 = sld [smem:[#allocation10 + $0x107]] }
 0x5c6   : > { %v7073_v28 = vadd.f32 %v7071_v36, %v7067_v41  ;;  %v5746_v14 = vmul.f32 %v20070_v58, %v5745_v37  ;;  %v5747_v16 = vmul.f32 %v20189_v17, %v5745_v37  ;;  %v7078_v36 = vadd.f32 %v7076_v34, %v7072_v21 }
 0x5c7   : > { %13786 = vmatpush1.bf16.msra.mxu0 %v20188_v11 }
 0x5c8   : > { %14170 = vmatpush1.bf16.msra.mxu1 %v20188_v11  ;;  %13788 = vmatprep.subr.bf16.mxu0 %v20069_v27  ;;  %v7077_v11 = vmul.f32 %v20068_v44, %v7075_v0  ;;  %v7087_v0 = vstv %s18161_s21  ;;  %v7084_v37 = vadd.f32 %v7082_v6, %v7078_v36  ;;  %v5759_v36 = vmul.f32 %v17129_v57, %v5757_v7  ;;  %s18439_s21 = sld [smem:[#allocation10 + $0x206]] }
 0x5c9   : > { %14172 = vmatprep.subr.bf16.mxu1 %v20069_v27  ;;  %v5743_v27 = vadd.f32 %v5741_v48, %v5737_v18  ;;  %v5748_v18 = vadd.f32 %v5746_v14, %v5742_v56  ;;  %v5752_v48 = vmul.f32 %v17089_v4, %v5751_v38  ;;  %v7088_v14 = vmul.f32 %v17089_v4, %v7087_v0 }
 0x5ca   : > { %v7079_v62 = vadd.f32 %v7077_v11, %v7073_v28  ;;  %v7093_v56 = vstv %s18176_s7  ;;  %v7089_v34 = vmul.f32 %v17103_v13, %v7087_v0  ;;  %v20191_v28 = vand.u32 4294901760, %v17902_v40  ;;  %s18451_s7 = sld [smem:[#allocation10 + $0x286]] }
 0x5cb   : > { %13790 = vmatpush1.bf16.msra.mxu0 %v20071_v9  ;;  %v5749_v41 = vadd.f32 %v5747_v16, %v5743_v27  ;;  %v5754_v11 = vadd.f32 %v5752_v48, %v5748_v18  ;;  %v5758_v38 = vmul.f32 %v17113_v10, %v5757_v7  ;;  %v5763_v27 = vstv %s18183_s9  ;;  %s18456_s9 = sld [smem:[#allocation10 + $0x287]] }
 0x5cc   : > { %14174 = vmatpush1.bf16.msra.mxu1 %v20071_v9  ;;  %13792 = vmatprep.subr.bf16.mxu0 %v19700_v22  ;;  %v7083_v9 = vmul.f32 %v20189_v17, %v7081_v51  ;;  %v20190_v51 = vand.u32 4294901760, %v17899_v23  ;;  %v7090_v23 = vadd.f32 %v7088_v14, %v7084_v37  ;;  %v7094_v40 = vmul.f32 %v17113_v10, %v7093_v56 }
 0x5cd   : > { %14176 = vmatprep.subr.bf16.mxu1 %v19700_v22  ;;  %v5755_v16 = vadd.f32 %v5753_v26, %v5749_v41  ;;  %v7099_v6 = vstv %s18190_s11  ;;  %v5764_v18 = vmul.f32 %v17138_v1, %v5763_v27  ;;  %v5769_v48 = vstv %s18199_s12  ;;  %s18461_s11 = sld [smem:[#allocation10 + $0x306]]  ;;  %s18466_s12 = sld [smem:[#allocation10 + $0x307]] }
 0x5ce   : > { %9183 = vmatmul.mubr.f32.vlgmr.msra.gmra.mrb[6].mxu0 %v17982_v46  ;;  %v7085_v21 = vadd.f32 %v7083_v9, %v7079_v62  ;;  %v7095_v62 = vmul.f32 %v17129_v57, %v7093_v56  ;;  %v5760_v9 = vadd.f32 %v5758_v38, %v5754_v11  ;;  %v5765_v41 = vmul.f32 %v17153_v31, %v5763_v27 }
 0x5cf   : > { %10519 = vmatmul.mubr.f32.vlgmr.msra.gmra.mrb[6].mxu1 %v17985_v20  ;;  %13794 = vmatpush1.bf16.msra.mxu0 %v19703_v49  ;;  %v5761_v7 = vadd.f32 %v5759_v36, %v5755_v16  ;;  %v7096_v26 = vadd.f32 %v7094_v40, %v7090_v23  ;;  %v7100_v37 = vmul.f32 %v17138_v1, %v7099_v6  ;;  %v7105_v14 = vstv %s18206_s5  ;;  %s18471_s5 = sld [smem:[#allocation10 + $0x386]] }
 0x5d0   : > { %14178 = vmatpush1.bf16.msra.mxu1 %v19703_v49  ;;  %13796 = vmatprep.subr.bf16.mxu0 %v19704_v47  ;;  %v7091_v0 = vadd.f32 %v7089_v34, %v7085_v21  ;;  %v7101_v21 = vmul.f32 %v17153_v31, %v7099_v6  ;;  %v5766_v34 = vadd.f32 %v5764_v18, %v5760_v9 }
 0x5d1   : > { %14180 = vmatprep.subr.bf16.mxu1 %v19704_v47  ;;  %9320 = vmatprep.mubr.f32.mxu0 %v20190_v51  ;;  %v5770_v51 = vmul.f32 %v17160_v43, %v5769_v48  ;;  %v5771_v11 = vmul.f32 %v17170_v12, %v5769_v48  ;;  %v7102_v38 = vadd.f32 %v7100_v37, %v7096_v26 }
 0x5d2   : > { %10656 = vmatprep.mubr.f32.mxu1 %v20191_v28  ;;  %v7097_v56 = vadd.f32 %v7095_v62, %v7091_v0  ;;  %v5767_v28 = vadd.f32 %v5765_v41, %v5761_v7  ;;  %v7106_v27 = vmul.f32 %v17160_v43, %v7105_v14  ;;  %v7107_v36 = vmul.f32 %v17170_v12, %v7105_v14 }
 0x5d3   : > { %13798 = vmatpush1.bf16.msra.mxu0 %v19707_v24  ;;  %v5772_v23 = vadd.f32 %v5770_v51, %v5766_v34  ;;  %v20194_v51 = vld [vmem:[#allocation81_spill] sm:$0xff] }
 0x5d4   : > { %14182 = vmatpush1.bf16.msra.mxu1 %v19707_v24  ;;  %13800 = vmatprep.subr.bf16.mxu0 %v19708_v33  ;;  %v7103_v16 = vadd.f32 %v7101_v21, %v7097_v56  ;;  %v5773_v40 = vadd.f32 %v5771_v11, %v5767_v28  ;;  %v7108_v6 = vadd.f32 %v7106_v27, %v7102_v38  ;;  %v20195_v28 = vld [vmem:[#allocation82_spill] sm:$0xff]  ;;  %v20197_v38 = vld [vmem:[#allocation88_spill] sm:$0xff]  ;;  %v20198_v27 = vld [vmem:[#allocation89_spill] sm:$0xff] }
 0x5d5   : > { %14184 = vmatprep.subr.bf16.mxu1 %v19708_v33  ;;  %v20196_v11 = vld [vmem:[#allocation86_spill] sm:$0xff] }
 0x5d6   : > { %v7109_v9 = vadd.f32 %v7107_v36, %v7103_v16  ;;  %v20199_v16 = vld [vmem:[#allocation83_spill] sm:$0xff]  ;;  %v20200_v36 = vand.u32 4294901760, %v17982_v46  ;;  %v20207_v46 = vld [vmem:[#allocation85_spill] sm:$0xff] }
 0x5d7   : > { %13802 = vmatpush1.bf16.msra.mxu0 %v19709_v3 }
 0x5d8   : > { %14186 = vmatpush1.bf16.msra.mxu1 %v19709_v3  ;;  %13804 = vmatprep.subr.bf16.mxu0 %v19710_v30 }
 0x5d9   : > { %14188 = vmatprep.subr.bf16.mxu1 %v19710_v30 }
 0x5db   : > { %13806 = vmatpush1.bf16.msra.mxu0 %v19711_v15 }
 0x5dc   : > { %14190 = vmatpush1.bf16.msra.mxu1 %v19711_v15  ;;  %13808 = vmatprep.subr.bf16.mxu0 %v19712_v5 }
 0x5dd   : > { %14192 = vmatprep.subr.bf16.mxu1 %v19712_v5 }
 0x5df   : > { %13810 = vmatpush1.bf16.msra.mxu0 %v19713_v32 }
 0x5e0   : > { %14194 = vmatpush1.bf16.msra.mxu1 %v19713_v32  ;;  %13812 = vmatprep.subr.bf16.mxu0 %v19714_v25 }
 0x5e1   : > { %14196 = vmatprep.subr.bf16.mxu1 %v19714_v25  ;;  %v7055_v0 = vpop.f32.mrb[4].mxu0 }
 0x5e2   : > { %v8391_v62 = vpop.f32.mrb[4].mxu1  ;;  %v7060_v18 = vmul.f32 %v7055_v0, %v5772_v23  ;;  %v7057_v48 = vpop.f32.mrb[5].mxu0  ;;  %v20201_v23 = vand.u32 4294901760, %v17985_v20  ;;  %v20204_v0 = vld [vmem:[#allocation42_spill] sm:$0xff]  ;;  %v20208_v20 = vld [vmem:[#allocation87_spill] sm:$0xff] }
 0x5e3   : > { %v8393_v7 = vpop.f32.mrb[5].mxu1  ;;  %v7061_v41 = vmul.f32 %v7057_v48, %v5773_v40  ;;  %13814 = vmatpush1.bf16.msra.mxu0 %v19715_v61  ;;  %v8396_v37 = vmul.f32 %v8391_v62, %v7108_v6  ;;  %v20202_v40 = vld [vmem:[#allocation84_spill] sm:$0xff]  ;;  %v20203_v6 = vld [vmem:[#allocation106_spill] sm:$0xff]  ;;  %v20210_v48 = vld [vmem:[#allocation99_spill] sm:$0xff] }
 0x5e4   : > { %14198 = vmatpush1.bf16.msra.mxu1 %v19715_v61  ;;  %v7062_v26 = vadd.f32 %v7060_v18, %v17721_v39  ;;  %13816 = vmatprep.subr.bf16.mxu0 %v19716_v19  ;;  %v8397_v56 = vmul.f32 %v8393_v7, %v7109_v9  ;;  %v20192_v39 = vld [vmem:[#allocation79_spill] sm:$0xff]  ;;  %v20205_v62 = vld [vmem:[#allocation44_spill] sm:$0xff]  ;;  %v20211_v7 = vld [vmem:[#allocation102_spill] sm:$0xff] }
 0x5e5   : > { %14200 = vmatprep.subr.bf16.mxu1 %v19716_v19  ;;  %v7063_v14 = vadd.f32 %v7061_v41, %v17723_v45  ;;  %v20193_v45 = vld [vmem:[#allocation80_spill] sm:$0xff]  ;;  %v20206_v9 = vld [vmem:[#allocation107_spill] sm:$0xff]  ;;  %v20212_v41 = vld [vmem:[#allocation105_spill] sm:$0xff] }
 0x5e6   : > { %v18251_v21 = vadd.f32 %v8396_v37, %v7062_v26  ;;  %v20209_v18 = vld [vmem:[#allocation95_spill] sm:$0xff]  ;;  %v20213_v26 = vld [vmem:[#allocation17_spill] sm:$0xff]  ;;  %v20214_v37 = vld [vmem:[#allocation110_spill] sm:$0xff] }
 0x5e7   : > { %v18253_v34 = vadd.f32 %v8397_v56, %v7063_v14  ;;  %13818 = vmatpush1.bf16.msra.mxu0 %v19717_v60  ;;  %v20215_v14 = vld [vmem:[#allocation111_spill] sm:$0xff]  ;;  %v20216_v56 = vld [vmem:[#allocation18_spill] sm:$0xff] }
 0x5e8   : > { %14202 = vmatpush1.bf16.msra.mxu1 %v19717_v60  ;;  %13820 = vmatprep.subr.bf16.mxu0 %v19718_v2 }
 0x5e9   : > { %14204 = vmatprep.subr.bf16.mxu1 %v19718_v2 }
 0x5eb   : > { %13822 = vmatpush1.bf16.msra.mxu0 %v19719_v55 }
 0x5ec   : > { %14206 = vmatpush1.bf16.msra.mxu1 %v19719_v55  ;;  %13824 = vmatprep.subr.bf16.mxu0 %v19720_v42 }
 0x5ed   : > { %14208 = vmatprep.subr.bf16.mxu1 %v19720_v42 }
 0x5ef   : > { %13826 = vmatpush1.bf16.msra.mxu0 %v19721_v29 }
 0x5f0   : > { %14210 = vmatpush1.bf16.msra.mxu1 %v19721_v29  ;;  %13828 = vmatprep.subr.bf16.mxu0 %v19722_v59 }
 0x5f1   : > { %14212 = vmatprep.subr.bf16.mxu1 %v19722_v59 }
 0x5f3   : > { %13830 = vmatpush1.bf16.msra.mxu0 %v19723_v52 }
 0x5f4   : > { %14214 = vmatpush1.bf16.msra.mxu1 %v19723_v52  ;;  %13832 = vmatprep.subr.bf16.mxu0 %v19870_v50 }
 0x5f5   : > { %14216 = vmatprep.subr.bf16.mxu1 %v19870_v50 }
 0x5f7   : > { %13834 = vmatpush1.bf16.msra.mxu0 %v19874_v54 }
 0x5f8   : > { %14218 = vmatpush1.bf16.msra.mxu1 %v19874_v54  ;;  %13836 = vmatprep.subr.bf16.mxu0 %v19875_v63 }
 0x5f9   : > { %14220 = vmatprep.subr.bf16.mxu1 %v19875_v63 }
 0x5fb   : > { %13838 = vmatpush1.bf16.msra.mxu0 %v19876_v35 }
 0x5fc   : > { %14222 = vmatpush1.bf16.msra.mxu1 %v19876_v35  ;;  %13840 = vmatprep.subr.bf16.mxu0 %v19877_v53 }
 0x5fd   : > { %14224 = vmatprep.subr.bf16.mxu1 %v19877_v53 }
 0x5ff   : > { %13842 = vmatpush1.bf16.msra.mxu0 %v20192_v39 }
 0x600   : > { %14226 = vmatpush1.bf16.msra.mxu1 %v20192_v39  ;;  %13844 = vmatprep.subr.bf16.mxu0 %v20193_v45 }
 0x601   : > { %14228 = vmatprep.subr.bf16.mxu1 %v20193_v45 }
 0x603   : > { %13846 = vmatpush1.bf16.msra.mxu0 %v20194_v51 }
 0x604   : > { %14230 = vmatpush1.bf16.msra.mxu1 %v20194_v51  ;;  %13848 = vmatprep.subr.bf16.mxu0 %v20195_v28 }
 0x605   : > { %14232 = vmatprep.subr.bf16.mxu1 %v20195_v28 }
 0x607   : > { %13850 = vmatpush1.bf16.msra.mxu0 %v20196_v11 }
 0x608   : > { %14234 = vmatpush1.bf16.msra.mxu1 %v20196_v11  ;;  %13852 = vmatprep.subr.bf16.mxu0 %v20197_v38 }
 0x609   : > { %14236 = vmatprep.subr.bf16.mxu1 %v20197_v38 }
 0x60b   : > { %13854 = vmatpush1.bf16.msra.mxu0 %v20198_v27 }
 0x60c   : > { %14238 = vmatpush1.bf16.msra.mxu1 %v20198_v27  ;;  %13856 = vmatprep.subr.bf16.mxu0 %v20199_v16 }
 0x60d   : > { %14240 = vmatprep.subr.bf16.mxu1 %v20199_v16  ;;  %v20217_v16 = vld [vmem:[#allocation19_spill] sm:$0xff] }
 0x60e   : > { %9324 = vmatmul.mubr.f32.vlgmr.msra.gmra.mrb[6].mxu0 %v20200_v36  ;;  %v20218_v36 = vld [vmem:[#allocation20_spill] sm:$0xff] }
 0x60f   : > { %10660 = vmatmul.mubr.f32.vlgmr.msra.gmra.mrb[6].mxu1 %v20201_v23  ;;  %13858 = vmatpush1.bf16.msra.mxu0 %v20202_v40  ;;  %v20219_v23 = vld [vmem:[#allocation21_spill] sm:$0xff] }
 0x610   : > { %14242 = vmatpush1.bf16.msra.mxu1 %v20202_v40  ;;  %13860 = vmatprep.subr.bf16.mxu0 %v20203_v6  ;;  %v20220_v40 = vld [vmem:[#allocation22_spill] sm:$0xff] }
 0x611   : > { %14244 = vmatprep.subr.bf16.mxu1 %v20203_v6  ;;  %9587 = vmatprep.mubr.f32.mxu0 %v20204_v0  ;;  %v20221_v6 = vld [vmem:[#allocation23_spill] sm:$0xff] }
 0x612   : > { %10923 = vmatprep.mubr.f32.mxu1 %v20205_v62 }
 0x613   : > { %13862 = vmatpush1.bf16.msra.mxu0 %v20206_v9 }
 0x614   : > { %14246 = vmatpush1.bf16.msra.mxu1 %v20206_v9  ;;  %13864 = vmatprep.subr.bf16.mxu0 %v20207_v46  ;;  %v20222_v9 = vld [vmem:[#allocation29_spill] sm:$0xff] }
 0x615   : > { %14248 = vmatprep.subr.bf16.mxu1 %v20207_v46  ;;  %v20223_v46 = vld [vmem:[#allocation30_spill] sm:$0xff] }
 0x617   : > { %13866 = vmatpush1.bf16.msra.mxu0 %v20208_v20 }
 0x618   : > { %14250 = vmatpush1.bf16.msra.mxu1 %v20208_v20  ;;  %13868 = vmatprep.subr.bf16.mxu0 %v20209_v18  ;;  %v20224_v20 = vld [vmem:[#allocation34_spill] sm:$0xff] }
 0x619   : > { %14252 = vmatprep.subr.bf16.mxu1 %v20209_v18  ;;  %v20225_v18 = vld [vmem:[#allocation35_spill] sm:$0xff] }
 0x61b   : > { %13870 = vmatpush1.bf16.msra.mxu0 %v20210_v48 }
 0x61c   : > { %14254 = vmatpush1.bf16.msra.mxu1 %v20210_v48  ;;  %13872 = vmatprep.subr.bf16.mxu0 %v20211_v7  ;;  %v20226_v48 = vld [vmem:[#allocation39_spill] sm:$0xff] }
 0x61d   : > { %14256 = vmatprep.subr.bf16.mxu1 %v20211_v7  ;;  %v20227_v7 = vld [vmem:[#allocation43_spill] sm:$0xff] }
 0x61f   : > { %13874 = vmatpush1.bf16.msra.mxu0 %v20212_v41 }
 0x620   : > { %14258 = vmatpush1.bf16.msra.mxu1 %v20212_v41  ;;  %13876 = vmatprep.subr.bf16.mxu0 %v20213_v26  ;;  %v20228_v41 = vld [vmem:[#allocation51_spill] sm:$0xff] }
 0x621   : > { %14260 = vmatprep.subr.bf16.mxu1 %v20213_v26  ;;  %v20229_v26 = vld [vmem:[#allocation52_spill] sm:$0xff] }
 0x623   : > { %13878 = vmatpush1.bf16.msra.mxu0 %v20214_v37 }
 0x624   : > { %14262 = vmatpush1.bf16.msra.mxu1 %v20214_v37  ;;  %13880 = vmatprep.subr.bf16.mxu0 %v20215_v14  ;;  %v20230_v37 = vld [vmem:[#allocation53_spill] sm:$0xff] }
 0x625   : > { %14264 = vmatprep.subr.bf16.mxu1 %v20215_v14  ;;  %v20231_v14 = vld [vmem:[#allocation54_spill] sm:$0xff] }
 0x627   : > { %13882 = vmatpush1.bf16.msra.mxu0 %v20216_v56 }
 0x628   : > { %14266 = vmatpush1.bf16.msra.mxu1 %v20216_v56  ;;  %13884 = vmatprep.subr.bf16.mxu0 %v20217_v16  ;;  %v20232_v56 = vld [vmem:[#allocation55_spill] sm:$0xff] }
 0x629   : > { %14268 = vmatprep.subr.bf16.mxu1 %v20217_v16  ;;  %v20233_v16 = vld [vmem:[#allocation58_spill] sm:$0xff] }
 0x62b   : > { %13886 = vmatpush1.bf16.msra.mxu0 %v20218_v36 }
 0x62c   : > { %14270 = vmatpush1.bf16.msra.mxu1 %v20218_v36  ;;  %13888 = vmatprep.subr.bf16.mxu0 %v20219_v23  ;;  %v20234_v36 = vld [vmem:[#allocation59_spill] sm:$0xff] }
 0x62d   : > { %14272 = vmatprep.subr.bf16.mxu1 %v20219_v23  ;;  %v20235_v23 = vld [vmem:[#allocation46_spill] sm:$0xff] }
 0x62f   : > { %13890 = vmatpush1.bf16.msra.mxu0 %v20220_v40 }
 0x630   : > { %14274 = vmatpush1.bf16.msra.mxu1 %v20220_v40  ;;  %13892 = vmatprep.subr.bf16.mxu0 %v20221_v6  ;;  %v20236_v40 = vld [vmem:[#allocation47_spill] sm:$0xff] }
 0x631   : > { %14276 = vmatprep.subr.bf16.mxu1 %v20221_v6  ;;  %v9759_v6 = vstv %s18445_s23 }
 0x633   : > { %13894 = vmatpush1.bf16.msra.mxu0 %v20222_v9 }
 0x634   : > { %14278 = vmatpush1.bf16.msra.mxu1 %v20222_v9  ;;  %13896 = vmatprep.subr.bf16.mxu0 %v20223_v46 }
 0x635   : > { %14280 = vmatprep.subr.bf16.mxu1 %v20223_v46 }
 0x637   : > { %13898 = vmatpush1.bf16.msra.mxu0 %v20224_v20 }
 0x638   : > { %14282 = vmatpush1.bf16.msra.mxu1 %v20224_v20  ;;  %13900 = vmatprep.subr.bf16.mxu0 %v20225_v18 }
 0x639   : > { %14284 = vmatprep.subr.bf16.mxu1 %v20225_v18  ;;  %v8429_v18 = vstv %s18451_s7 }
 0x63b   : > { %13902 = vmatpush1.bf16.msra.mxu0 %v20226_v48 }
 0x63c   : > { %14286 = vmatpush1.bf16.msra.mxu1 %v20226_v48  ;;  %13904 = vmatprep.subr.bf16.mxu0 %v20227_v7 }
 0x63d   : > { %14288 = vmatprep.subr.bf16.mxu1 %v20227_v7 }
 0x63f   : > { %13906 = vmatpush1.bf16.msra.mxu0 %v20228_v41 }
 0x640   : > { %14290 = vmatpush1.bf16.msra.mxu1 %v20228_v41  ;;  %13908 = vmatprep.subr.bf16.mxu0 %v20229_v26 }
 0x641   : > { %14292 = vmatprep.subr.bf16.mxu1 %v20229_v26  ;;  %v9765_v26 = vstv %s18456_s9 }
 0x643   : > { %13910 = vmatpush1.bf16.msra.mxu0 %v20230_v37 }
 0x644   : > { %14294 = vmatpush1.bf16.msra.mxu1 %v20230_v37  ;;  %13912 = vmatprep.subr.bf16.mxu0 %v20231_v14 }
 0x645   : > { %14296 = vmatprep.subr.bf16.mxu1 %v20231_v14  ;;  %v9761_v14 = vmul.f32 %v17103_v13, %v9759_v6 }
 0x647   : > { %13914 = vmatpush1.bf16.msra.mxu0 %v20232_v56 }
 0x648   : > { %14298 = vmatpush1.bf16.msra.mxu1 %v20232_v56  ;;  %13916 = vmatprep.subr.bf16.mxu0 %v20233_v16  ;;  %v8430_v56 = vmul.f32 %v17113_v10, %v8429_v18 }
 0x649   : > { %14300 = vmatprep.subr.bf16.mxu1 %v20233_v16  ;;  %v8435_v16 = vstv %s18461_s11 }
 0x64b   : > { %13918 = vmatpush1.bf16.msra.mxu0 %v20234_v36 }
 0x64c   : > { %14302 = vmatpush1.bf16.msra.mxu1 %v20234_v36  ;;  %13920 = vmatprep.subr.bf16.mxu0 %v19700_v22 }
 0x64d   : > { %14304 = vmatprep.subr.bf16.mxu1 %v19700_v22 }
 0x64e   : > { %9589 = vmatmul.mubr.f32.vlgmr.msra.gmra.mrb[6].mxu0 %v20235_v23 }
 0x64f   : > { %10925 = vmatmul.mubr.f32.vlgmr.msra.gmra.mrb[6].mxu1 %v20236_v40  ;;  %13922 = vmatpush1.bf16.msra.mxu0 %v19703_v49 }
 0x650   : > { %14306 = vmatpush1.bf16.msra.mxu1 %v19703_v49  ;;  %13924 = vmatprep.subr.bf16.mxu0 %v19704_v47  ;;  %v9741_v49 = vstv %s11281_s24 }
 0x651   : > { %14308 = vmatprep.subr.bf16.mxu1 %v19704_v47  ;;  %9724 = vmatprep.mubr.f32.mxu0 %v20204_v0  ;;  %v8405_v47 = vstv %s11273_s14  ;;  %s11294_s14 = sshll.u32 %s14757_s19, 8  ;;  %s11075_s19 = scalar_lea.sflag [#allocation4], %s14914_s6 }
 0x652   : > { %11060 = vmatprep.mubr.f32.mxu1 %v20205_v62 }
 0x653   : > { %13926 = vmatpush1.bf16.msra.mxu0 %v19707_v24 }
 0x654   : > { %14310 = vmatpush1.bf16.msra.mxu1 %v19707_v24  ;;  %13928 = vmatprep.subr.bf16.mxu0 %v19708_v33  ;;  %v20239_v24 = vld [vmem:[#allocation97_spill] sm:$0xff] }
 0x655   : > { %14312 = vmatprep.subr.bf16.mxu1 %v19708_v33  ;;  %v9737_v33 = vstv %s11280_s27  ;;  %s253_s27 = scalar_lea.vmem [#allocation11], %s11204_s8 }
 0x656   : > { %s11089_s24 = sshll.u32 %s253_s27, 4  ;;  %s18502_s24 = int_to_ptr.vmem [resolvable:$true] %s11089_s24 }
 0x657   : > { %13930 = vmatpush1.bf16.msra.mxu0 %v19709_v3  ;;  %s14623_s8 = scalar_lea.vmem %s18502_s24, 256 }
 0x658   : > { %14314 = vmatpush1.bf16.msra.mxu1 %v19709_v3  ;;  %13932 = vmatprep.subr.bf16.mxu0 %v19710_v30  ;;  %v8401_v3 = vstv %s11272_s13  ;;  %s11287_s13 = sld [smem:[#allocation10 + $0x387]]  ;;  %p14624_p9 = scmp.ne.s32.totalorder %s18502_s24, %s14623_s8 }
 0x659   : > { %14316 = vmatprep.subr.bf16.mxu1 %v19710_v30  ;;  %v20237_v30 = vld [vmem:[#allocation100_spill] sm:$0xff] }
 0x65a   : > { %v8402_v22 = vmul.f32 %v20237_v30, %v8401_v3  ;;  %p14625_p6 = pnand %p14624_p9, %p20241_p2 }
 0x65b   : > { %13934 = vmatpush1.bf16.msra.mxu0 %v19711_v15 }
 0x65c   : > { %14318 = vmatpush1.bf16.msra.mxu1 %v19711_v15  ;;  %13936 = vmatprep.subr.bf16.mxu0 %v19712_v5  ;;  %v9739_v15 = vmul.f32 %v20239_v24, %v9737_v33  ;;  %p14626_p3 = pneg %p14625_p6 }
 0x65d   : > { %14320 = vmatprep.subr.bf16.mxu1 %v19712_v5 }
 0x65f   : > { %13938 = vmatpush1.bf16.msra.mxu0 %v19713_v32 }
 0x660   : > { %14322 = vmatpush1.bf16.msra.mxu1 %v19713_v32  ;;  %13940 = vmatprep.subr.bf16.mxu0 %v19714_v25 }
 0x661   : > { %14324 = vmatprep.subr.bf16.mxu1 %v19714_v25 }
 0x663   : > { %13942 = vmatpush1.bf16.msra.mxu0 %v19715_v61 }
 0x664   : > { %14326 = vmatpush1.bf16.msra.mxu1 %v19715_v61  ;;  %13944 = vmatprep.subr.bf16.mxu0 %v19716_v19  ;;  %v8411_v61 = vstv %s11274_s29 }
 0x665   : > { %14328 = vmatprep.subr.bf16.mxu1 %v19716_v19  ;;  %v20240_v19 = vld [vmem:[#allocation98_spill] sm:$0xff]  ;;  %v8412_v25 = vmul.f32 %v20066_v8, %v8411_v61 }
 0x666   : > { %v9743_v5 = vmul.f32 %v20240_v19, %v9741_v49 }
 0x667   : > { %13946 = vmatpush1.bf16.msra.mxu0 %v19717_v60 }
 0x668   : > { %14330 = vmatpush1.bf16.msra.mxu1 %v19717_v60  ;;  %13948 = vmatprep.subr.bf16.mxu0 %v19718_v2  ;;  %v20238_v60 = vld [vmem:[#allocation101_spill] sm:$0xff] }
 0x669   : > { %14332 = vmatprep.subr.bf16.mxu1 %v19718_v2  ;;  %v8406_v2 = vmul.f32 %v20238_v60, %v8405_v47 }
 0x66b   : > { %13950 = vmatpush1.bf16.msra.mxu0 %v19719_v55  ;;  %v8408_v32 = vadd.f32 %v8406_v2, %v8402_v22  ;;  %v8441_v22 = vstv %s18471_s5 }
 0x66c   : > { %14334 = vmatpush1.bf16.msra.mxu1 %v19719_v55  ;;  %13952 = vmatprep.subr.bf16.mxu0 %v19720_v42  ;;  %v8403_v55 = vmul.f32 %v20239_v24, %v8401_v3  ;;  %v9766_v3 = vmul.f32 %v17113_v10, %v9765_v26  ;;  %v9777_v24 = vstv %s11287_s13  ;;  %v8442_v10 = vmul.f32 %v17160_v43, %v8441_v22 }
 0x66d   : > { %14336 = vmatprep.subr.bf16.mxu1 %v19720_v42  ;;  %v9747_v42 = vstv %s11282_s28 }
 0x66f   : > { %13954 = vmatpush1.bf16.msra.mxu0 %v19721_v29 }
 0x670   : > { %14338 = vmatpush1.bf16.msra.mxu1 %v19721_v29  ;;  %13956 = vmatprep.subr.bf16.mxu0 %v19722_v59  ;;  %v9742_v29 = vmul.f32 %v20238_v60, %v9741_v49 }
 0x671   : > { %14340 = vmatprep.subr.bf16.mxu1 %v19722_v59  ;;  %v9738_v59 = vmul.f32 %v20237_v30, %v9737_v33  ;;  %v8436_v30 = vmul.f32 %v17138_v1, %v8435_v16 }
 0x673   : > { %13958 = vmatpush1.bf16.msra.mxu0 %v19723_v52 }
 0x674   : > { %14342 = vmatpush1.bf16.msra.mxu1 %v19723_v52  ;;  %13960 = vmatprep.subr.bf16.mxu0 %v19870_v50  ;;  %v8407_v52 = vmul.f32 %v20240_v19, %v8405_v47  ;;  %v9771_v47 = vstv %s18466_s12 }
 0x675   : > { %14344 = vmatprep.subr.bf16.mxu1 %v19870_v50  ;;  %v8413_v50 = vmul.f32 %v20068_v44, %v8411_v61  ;;  %v9772_v61 = vmul.f32 %v17138_v1, %v9771_v47  ;;  %v9773_v19 = vmul.f32 %v17153_v31, %v9771_v47 }
 0x677   : > { %13962 = vmatpush1.bf16.msra.mxu0 %v19874_v54 }
 0x678   : > { %14346 = vmatpush1.bf16.msra.mxu1 %v19874_v54  ;;  %13964 = vmatprep.subr.bf16.mxu0 %v19875_v63  ;;  %v9744_v54 = vadd.f32 %v9742_v29, %v9738_v59 }
 0x679   : > { %14348 = vmatprep.subr.bf16.mxu1 %v19875_v63  ;;  %v9748_v63 = vmul.f32 %v20066_v8, %v9747_v42 }
 0x67b   : > { %13966 = vmatpush1.bf16.msra.mxu0 %v19876_v35  ;;  %v9750_v62 = vadd.f32 %v9748_v63, %v9744_v54 }
 0x67c   : > { %14350 = vmatpush1.bf16.msra.mxu1 %v19876_v35  ;;  %13968 = vmatprep.subr.bf16.mxu0 %v19877_v53  ;;  %v8409_v35 = vadd.f32 %v8407_v52, %v8403_v55 }
 0x67d   : > { %14352 = vmatprep.subr.bf16.mxu1 %v19877_v53  ;;  %v8417_v53 = vstv %s18433_s30  ;;  %s18500_s30 = scalar_lea.hbm %s18548_s4, %s11294_s14 }
 0x67e   : > { %v8419_v0 = vmul.f32 %v20189_v17, %v8417_v53 }
 0x67f   : > { %13970 = vmatpush1.bf16.msra.mxu0 %v20192_v39 }
 0x680   : > { %14354 = vmatpush1.bf16.msra.mxu1 %v20192_v39  ;;  %13972 = vmatprep.subr.bf16.mxu0 %v20193_v45  ;;  %v9753_v39 = vstv %s18435_s10  ;;  %s14710_s10 = smov [#allocation11]  }
 0x681   : > { %14356 = vmatprep.subr.bf16.mxu1 %v20193_v45  ;;  %v9745_v45 = vadd.f32 %v9743_v5, %v9739_v15  ;;  %v9754_v8 = vmul.f32 %v20070_v58, %v9753_v39  ;;  %v9779_v5 = vmul.f32 %v17170_v12, %v9777_v24 }
 0x683   : > { %13974 = vmatpush1.bf16.msra.mxu0 %v20194_v51  ;;  %v9756_v41 = vadd.f32 %v9754_v8, %v9750_v62 }
 0x684   : > { %14358 = vmatpush1.bf16.msra.mxu1 %v20194_v51  ;;  %13976 = vmatprep.subr.bf16.mxu0 %v20195_v28  ;;  %v9749_v51 = vmul.f32 %v20068_v44, %v9747_v42  ;;  %v9755_v44 = vmul.f32 %v20189_v17, %v9753_v39  ;;  %v9778_v42 = vmul.f32 %v17160_v43, %v9777_v24 }
 0x685   : > { %14360 = vmatprep.subr.bf16.mxu1 %v20195_v28  ;;  %v8414_v28 = vadd.f32 %v8412_v25, %v8408_v32 }
 0x686   : > { %v9751_v9 = vadd.f32 %v9749_v51, %v9745_v45 }
 0x687   : > { %13978 = vmatpush1.bf16.msra.mxu0 %v20196_v11 }
 0x688   : > { %14362 = vmatpush1.bf16.msra.mxu1 %v20196_v11  ;;  %13980 = vmatprep.subr.bf16.mxu0 %v20197_v38  ;;  %v8418_v11 = vmul.f32 %v20070_v58, %v8417_v53  ;;  %v9760_v58 = vmul.f32 %v17089_v4, %v9759_v6  ;;  %v9757_v37 = vadd.f32 %v9755_v44, %v9751_v9 }
 0x689   : > { %14364 = vmatprep.subr.bf16.mxu1 %v20197_v38  ;;  %v8423_v38 = vstv %s18439_s21  ;;  %s14627_s21 = sshll.u32 %s14710_s10, 4  ;;  %s14628_s21 = int_to_ptr.vmem [resolvable:$false] %s14627_s21 }
 0x68a   : > { %v8420_v46 = vadd.f32 %v8418_v11, %v8414_v28  ;;  %v8424_v20 = vmul.f32 %v17089_v4, %v8423_v38  ;;  %v8425_v7 = vmul.f32 %v17103_v13, %v8423_v38  ;;  %v9763_v33 = vadd.f32 %v9761_v14, %v9757_v37  ;;  %s14629_s23 = scalar_lea.vmem %s14628_s21, 512  ;;  %p14630_p13 = scmp.lt.s32.totalorder %s18502_s24, %s14628_s21 }
 0x68b   : > { %13982 = vmatpush1.bf16.msra.mxu0 %v20198_v27  ;;  %v9767_v4 = vmul.f32 %v17129_v57, %v9765_v26  ;;  %v8437_v13 = vmul.f32 %v17153_v31, %v8435_v16  ;;  %p14631_p7 = scmp.lt.s32.totalorder %s14629_s23, %s14623_s8 }
 0x68c   : > { %14366 = vmatpush1.bf16.msra.mxu1 %v20198_v27  ;;  %v8415_v27 = vadd.f32 %v8413_v50, %v8409_v35  ;;  %v8426_v17 = vadd.f32 %v8424_v20, %v8420_v46 }
 0x68d   : > { %v9769_v55 = vadd.f32 %v9767_v4, %v9763_v33  ;;  %p14632_p10 = por %p14631_p7, %p14630_p13 }
 0x68e   : > { %9726 = vmatmul.mubr.f32.vlgmr.msra.gmra.mrb[6].mxu0 %v20235_v23  ;;  %v8421_v48 = vadd.f32 %v8419_v0, %v8415_v27  ;;  %v8431_v23 = vmul.f32 %v17129_v57, %v8429_v18  ;;  %v8432_v49 = vadd.f32 %v8430_v56, %v8426_v17  ;;  %v8443_v57 = vmul.f32 %v17170_v12, %v8441_v22 }
 0x68f   : > { %11062 = vmatmul.mubr.f32.vlgmr.msra.gmra.mrb[6].mxu1 %v20236_v40  ;;  %v9762_v40 = vadd.f32 %v9760_v58, %v9756_v41  ;;  %v9775_v15 = vadd.f32 %v9773_v19, %v9769_v55  ;;  %p14633_p0 = pnand %p14632_p10, %p14626_p3 }
 0x690   : > { %v8427_v36 = vadd.f32 %v8425_v7, %v8421_v48  ;;  %v8438_v52 = vadd.f32 %v8436_v30, %v8432_v49 }
 0x691   : > { %v9768_v2 = vadd.f32 %v9766_v3, %v9762_v40  ;;  %v9781_v31 = vadd.f32 %v9779_v5, %v9775_v15 }
 0x692   : > { %v8433_v60 = vadd.f32 %v8431_v23, %v8427_v36  ;;  %v8444_v32 = vadd.f32 %v8442_v10, %v8438_v52 }
 0x693   : > { %v9774_v29 = vadd.f32 %v9772_v61, %v9768_v2 }
 0x694   : > { %v8439_v59 = vadd.f32 %v8437_v13, %v8433_v60 }
 0x695   : > { %v9780_v25 = vadd.f32 %v9778_v42, %v9774_v29 }
 0x696   : > { %v8445_v1 = vadd.f32 %v8443_v57, %v8439_v59 }
 0x761   : > { %v9727_v53 = vpop.f32.mrb[6].mxu0 }
 0x762   : > { %v11063_v35 = vpop.f32.mrb[6].mxu1  ;;  %v9732_v50 = vmul.f32 %v9727_v53, %v8444_v32  ;;  %v9729_v54 = vpop.f32.mrb[7].mxu0 }
 0x763   : > { %v11065_v63 = vpop.f32.mrb[7].mxu1  ;;  %v9733_v39 = vmul.f32 %v9729_v54, %v8445_v1  ;;  %v11068_v51 = vmul.f32 %v11063_v35, %v9780_v25 }
 0x764   : > { %v9734_v45 = vadd.f32 %v9732_v50, %v18251_v21  ;;  %v11069_v12 = vmul.f32 %v11065_v63, %v9781_v31 }
 0x765   : > { %v9735_v43 = vadd.f32 %v9733_v39, %v18253_v34 }
 0x766   : > { %v11070_v28 = vadd.f32 %v11068_v51, %v9734_v45 }
 0x767   : > { %v11071_v11 = vadd.f32 %v11069_v12, %v9735_v43 }
 0x768   : > { %11072 = vst [vmem:[%s253_s27] sm:$0xff] %v11070_v28 }
 0x769   : > { %11073 = vst [vmem:[%s253_s27 + $0x8] sm:$0xff] %v11071_v11 }
 0x76a   : > { %14636 = shalt.err (!%p14633_p0)
}
 0x76b   : > { %s14637_s6 = scalar_lea.hbm %s18500_s30, 256  ;;  %s14641_s11 = scalar_lea.hbm %s18548_s4, 512 }
 0x76c   : > { %p14638_p5 = scmp.ne.s32.totalorder %s18500_s30, %s14637_s6  ;;  %p14642_p1 = scmp.lt.u32.totalorder %s18500_s30, %s18548_s4 }
 0x76d   : > { %p14643_p11 = scmp.lt.u32.totalorder %s14641_s11, %s14637_s6  ;;  %p14645_p9 = scmp.lt.u32.totalorder %s14637_s6, %s18500_s30 }
 0x76e   : > { %p14639_p4 = pnand %p14638_p5, %p20241_p2 }
 0x76f   : > { %p14644_p12 = por %p14643_p11, %p14642_p1 }
 0x770   : > { %p14640_p8 = pneg %p14639_p4 }
 0x771   : > { %p14646_p6 = por %p14645_p9, %p14644_p12 }
 0x773   : > { %p14647_p3 = pnand %p14646_p6, %p14640_p8 }
 0x775   : > { %14650 = shalt.err (!%p14647_p3)
}
 0x776   : > { %14461 = dma.vmem_to_hbm [thread:$0]  (%p20241_p2), %s18502_s24, 256, %s18500_s30, %s11075_s19  }
 0x777 PF: > { %s11101_s13 = sand.u32 1, %s14689_s15   ;;  %p20242_p13 = scmp.ne.s32.totalorder %s19279_s22, 0 }
 0x778   : > { %p20243_p7 = scmp.ge.s32.totalorder %s14701_s18, 2  ;;  %s11102_s14 = scalar_lea.sflag [#allocation4], %s11101_s13 }
 0x77a   : > { %p14478_p10 = pnand %p20243_p7, %p20242_p13 }
 0x77c   : > { %14684 = dma.done.wait (!%p14478_p10), %s11102_s14, 256  }
 0x77d   : > { %14686 = vsyncadd (!%p14478_p10), %s11102_s14, 4294967040  ;;  %p20_p0 = scmp.ge.s32.totalorder %s14851_s25, 4   ;;  %s20244_s15 = smov %s14693_s16 }
 0x77e   : > { %s20245_s16 = smov %s14697_s17  ;;  %s20246_s17 = smov %s14861_s26 }
 0x77f   : > { %s20247_s18 = smov %s14851_s25  ;;  %22 = sbr.rel (!%p20_p0) target bundleno = 8 (0x8), region = 95 }
 0x786   :  { %11107 = vsyncpa [#allocation3], 1 }
 0x787   :  { %11109 = vsyncpa [#allocation3 + $0x1], 1 }
 0x788   :  { %11110 = vsyncpa [#allocation9], 1 }
 0x789   :  { %11111 = vsyncpa [#allocation4], 1 }
 0x78a   :  { %11113 = vsyncpa [#allocation4 + $0x1], 1 }
 0x78b   :  { %11114 = vsyncpa [#allocation5], 1 }
 0x78c   :  { %11116 = vsyncpa [#allocation5 + $0x1], 1 }
 0x78d   :  { %11117 = vsyncpa [#allocation6], 1 }
 0x78e   :  { %11119 = vsyncpa [#allocation6 + $0x1], 1 }

</bundles_post_ra>
